<compile_context>
chip_gen: v7x
topology: tpu7x:2x2x1
jax: 0.10.0
libtpu: 0.0.40
codegen_flags: <defaults>
</compile_context>

<pallas_src>
import jax
import jax.numpy as jnp
from jax import lax
from jax.experimental import pallas as pl
from jax.experimental.pallas import tpu as pltpu

_MASK_NEG = -1e30  # finite "-inf": exp(_MASK_NEG - m) == 0 in f32, no inf-inf NaN


# ----------------------------------------------------------------------------
# Fused 1x1-conv projections: q|k from x, v from y, as row-tiled matmuls.
# ----------------------------------------------------------------------------
def _proj_kernel(x_ref, y_ref, wqk_ref, bqk_ref, wv_ref, bv_ref, qk_ref, v_ref):
    x = x_ref[...].astype(jnp.bfloat16)
    y = y_ref[...].astype(jnp.bfloat16)
    qk = jnp.dot(x, wqk_ref[...], preferred_element_type=jnp.float32) + bqk_ref[...]
    v = jnp.dot(y, wv_ref[...], preferred_element_type=jnp.float32) + bv_ref[...]
    qk_ref[...] = qk.astype(qk_ref.dtype)
    v_ref[...] = v.astype(v_ref.dtype)


def _proj_all(x_flat, y_flat, wqk_t, bqk, wv_t, bv, *, tile_rows=1024):
    n, cin = x_flat.shape
    c2 = wqk_t.shape[1]
    c = wv_t.shape[1]
    tn = n if n <= tile_rows else tile_rows     # big row tiles, ragged tail ok
    grid = (pl.cdiv(n, tn),)
    return pl.pallas_call(
        _proj_kernel,
        out_shape=[
            jax.ShapeDtypeStruct((n, c2), jnp.bfloat16),
            jax.ShapeDtypeStruct((n, c), jnp.bfloat16),
        ],
        grid_spec=pltpu.PrefetchScalarGridSpec(
            num_scalar_prefetch=0,
            grid=grid,
            in_specs=[
                pl.BlockSpec((tn, cin), lambda i: (i, 0)),
                pl.BlockSpec((tn, cin), lambda i: (i, 0)),
                pl.BlockSpec((cin, c2), lambda i: (0, 0)),   # weights untiled
                pl.BlockSpec((1, c2), lambda i: (0, 0)),
                pl.BlockSpec((cin, c), lambda i: (0, 0)),
                pl.BlockSpec((1, c), lambda i: (0, 0)),
            ],
            out_specs=[
                pl.BlockSpec((tn, c2), lambda i: (i, 0)),
                pl.BlockSpec((tn, c), lambda i: (i, 0)),
            ],
        ),
        compiler_params=pltpu.CompilerParams(
            dimension_semantics=("parallel",)),
    )(x_flat, y_flat, wqk_t, bqk, wv_t, bv)


# ----------------------------------------------------------------------------
# Criss-cross attention core. Per (batch, W-query-tile) step:
#   qh/khT/vh : column-batched views (TW, H, C8) / (TW, C8, H) / (TW, H, C)
#   qw/kwT/vw : row-batched views    (H, TW, C8) / (H, C8, W) / (H, W, C)
# Joint softmax over the concatenated (H + W) key axis, self position on the
# H branch masked (finite -1e30).  Normalization folded into the outputs.
# ----------------------------------------------------------------------------
def _cc_attn_kernel(qh_ref, khT_ref, vh_ref, qw_ref, kwT_ref, vw_ref,
                    outh_ref, outw_ref):
    qh = qh_ref[0]      # (TW, H, C8)  bf16
    khT = khT_ref[0]    # (TW, C8, H)  bf16
    vh = vh_ref[0]      # (TW, H, C)   bf16
    qw = qw_ref[0]      # (H, TW, C8)  bf16
    kwT = kwT_ref[0]    # (H, C8, W)   bf16
    vw = vw_ref[0]      # (H, W, C)    bf16

    h_sz = qh.shape[1]

    # energies: bf16 operands on the MXU, f32 accumulation
    e_h = jnp.einsum('whc,wcg->whg', qh, khT,
                     preferred_element_type=jnp.float32)        # (TW, H, H)
    e_w = jnp.einsum('hwc,hcv->hwv', qw, kwT,
                     preferred_element_type=jnp.float32)        # (H, TW, W)

    # self-position mask on the H branch: 2-D additive mask, broadcast over TW
    diag = (lax.broadcasted_iota(jnp.int32, (h_sz, h_sz), 0) ==
            lax.broadcasted_iota(jnp.int32, (h_sz, h_sz), 1))
    e_h = e_h + jnp.where(diag, jnp.float32(_MASK_NEG), jnp.float32(0.0))[None]

    # joint softmax statistics over the concatenated (H + W) axis, in f32
    m_h = jnp.max(e_h, axis=-1)                  # (TW, H)
    m_w = jnp.max(e_w, axis=-1)                  # (H, TW)
    m = jnp.maximum(m_h.T, m_w)                  # (H, TW)
    p_h = jnp.exp(e_h - m.T[:, :, None])         # (TW, H, H)   exp(mask) -> 0
    p_w = jnp.exp(e_w - m[:, :, None])           # (H, TW, W)
    denom = jnp.sum(p_h, axis=-1).T + jnp.sum(p_w, axis=-1)     # (H, TW)
    inv = pl.reciprocal(denom, approx=True)                     # EUP slot

    # unnormalized P @ V (bf16 probabilities), normalize the C-wide results
    out_h = jnp.einsum('whg,wgc->whc', p_h.astype(jnp.bfloat16), vh,
                       preferred_element_type=jnp.float32)      # (TW, H, C)
    out_w = jnp.einsum('hwv,hvc->hwc', p_w.astype(jnp.bfloat16), vw,
                       preferred_element_type=jnp.float32)      # (H, TW, C)

    outh_ref[0] = (out_h * inv.T[:, :, None]).astype(outh_ref.dtype)
    outw_ref[0] = (out_w * inv[:, :, None]).astype(outw_ref.dtype)


def _cc_attention(qh, khT, vh, qw, kwT, vw):
    b, w_sz, h_sz, c8 = qh.shape
    c = vh.shape[-1]
    # Query tile along W bounds per-step VMEM and gives the megacore work
    # even when B == 1; keys/values for the W branch stay fully resident.
    tw = w_sz if w_sz <= 128 else 128
    grid = (b, pl.cdiv(w_sz, tw))
    grid_spec = pltpu.PrefetchScalarGridSpec(
        num_scalar_prefetch=0,
        grid=grid,
        in_specs=[
            pl.BlockSpec((1, tw, h_sz, c8), lambda i, j: (i, j, 0, 0)),
            pl.BlockSpec((1, tw, c8, h_sz), lambda i, j: (i, j, 0, 0)),
            pl.BlockSpec((1, tw, h_sz, c), lambda i, j: (i, j, 0, 0)),
            pl.BlockSpec((1, h_sz, tw, c8), lambda i, j: (i, 0, j, 0)),
            pl.BlockSpec((1, h_sz, c8, w_sz), lambda i, j: (i, 0, 0, 0)),
            pl.BlockSpec((1, h_sz, w_sz, c), lambda i, j: (i, 0, 0, 0)),
        ],
        out_specs=[
            pl.BlockSpec((1, tw, h_sz, c), lambda i, j: (i, j, 0, 0)),
            pl.BlockSpec((1, h_sz, tw, c), lambda i, j: (i, 0, j, 0)),
        ],
    )
    return pl.pallas_call(
        _cc_attn_kernel,
        out_shape=[
            jax.ShapeDtypeStruct((b, w_sz, h_sz, c), jnp.float32),
            jax.ShapeDtypeStruct((b, h_sz, w_sz, c), jnp.float32),
        ],
        grid_spec=grid_spec,
        compiler_params=pltpu.CompilerParams(
            dimension_semantics=("parallel", "parallel")),
    )(qh, khT, vh, qw, kwT, vw)


# ----------------------------------------------------------------------------
# Parameter preprocessing (done once, hoisted out of the forward pass).
# ----------------------------------------------------------------------------
def prepare_params(params):
    c8 = params['wq'].shape[0]
    c = params['wv'].shape[0]
    return {
        'wqk_t': jnp.concatenate([params['wq'], params['wk']],
                                 axis=0).T.astype(jnp.bfloat16),      # (C, 2*C8)
        'bqk': jnp.concatenate([params['bq'], params['bk']]
                               ).astype(jnp.float32).reshape(1, 2 * c8),
        'wv_t': params['wv'].T.astype(jnp.bfloat16),                  # (C, C)
        'bv': params['bv'].astype(jnp.float32).reshape(1, c),
        'gamma': params['gamma'],
    }


# ----------------------------------------------------------------------------
# Full module forward (NCHW in / NCHW out, matching the PyTorch module).
# ----------------------------------------------------------------------------
def criss_cross_attention(x, y, prep):
    b, c, h, w = x.shape
    c8 = prep['wqk_t'].shape[1] // 2

    # NCHW -> NHWC (channel-last so the 1x1 convs contract on lanes)
    x_hwc = jnp.transpose(x, (0, 2, 3, 1))
    y_hwc = jnp.transpose(y, (0, 2, 3, 1))

    qk_flat, v_flat = _proj_all(
        x_hwc.reshape(b * h * w, c), y_hwc.reshape(b * h * w, c),
        prep['wqk_t'], prep['bqk'], prep['wv_t'], prep['bv'])

    qk = qk_flat.reshape(b, h, w, 2 * c8)
    q_hwc = qk[..., :c8]
    k_hwc = qk[..., c8:]
    v_hwc = v_flat.reshape(b, h, w, c)

    # Column-batched (H-direction) views plus pre-transposed keys so every
    # in-kernel matmul is a plain batched (M,K)@(K,N) with no XLU transpose.
    # TODO(synk): deriving these views inside the attention kernel would need
    # a mixed major/minor-dim transpose that Mosaic does not lower; they are
    # left as cheap bf16 XLA transposes instead.
    qh = jnp.transpose(q_hwc, (0, 2, 1, 3))     # (B, W, H, C8)
    khT = jnp.transpose(k_hwc, (0, 2, 3, 1))    # (B, W, C8, H)
    vh = jnp.transpose(v_hwc, (0, 2, 1, 3))     # (B, W, H, C)
    kwT = jnp.transpose(k_hwc, (0, 1, 3, 2))    # (B, H, C8, W)

    out_h, out_w = _cc_attention(qh, khT, vh, q_hwc, kwT, v_hwc)

    # epilogue (fused by XLA into one pass): gamma * (out_H + out_W) + x
    out_hwc = prep['gamma'] * (jnp.transpose(out_h, (0, 2, 1, 3)) + out_w) + x_hwc
    return jnp.transpose(out_hwc, (0, 3, 1, 2)).astype(x.dtype)   # back to NCHW


# ----------------------------------------------------------------------------
# Pure-JAX f32 reference mirroring the PyTorch forward exactly.
# ----------------------------------------------------------------------------
def reference(x, y, params):
    def conv1x1(inp, wgt, bias):
        return jnp.einsum('oc,bchw->bohw', wgt, inp) + bias[None, :, None, None]

    _, _, h, _ = x.shape
    q = conv1x1(x, params['wq'], params['bq'])
    k = conv1x1(x, params['wk'], params['bk'])
    v = conv1x1(y, params['wv'], params['bv'])

    energy_h = jnp.einsum('bchw,bcgw->bhwg', q, k)
    eye = jnp.eye(h, dtype=bool)
    energy_h = jnp.where(eye[None, :, None, :], -jnp.inf, energy_h)
    energy_w = jnp.einsum('bchw,bchv->bhwv', q, k)

    att = jax.nn.softmax(jnp.concatenate([energy_h, energy_w], axis=-1), axis=-1)
    att_h = att[..., :h]
    att_w = att[..., h:]

    out_h = jnp.einsum('bcgw,bhwg->bchw', v, att_h)
    out_w = jnp.einsum('bchv,bhwv->bchw', v, att_w)
    return params['gamma'] * (out_h + out_w) + x


if __name__ == "__main__":
    B, C, H, W = 2, 16, 8, 16
    C8 = C // 8

    key = jax.random.PRNGKey(0)
    keys = jax.random.split(key, 8)
    params = {
        'wq': 0.1 * jax.random.normal(keys[0], (C8, C), jnp.float32),
        'bq': 0.05 * jax.random.normal(keys[1], (C8,), jnp.float32),
        'wk': 0.1 * jax.random.normal(keys[2], (C8, C), jnp.float32),
        'bk': 0.05 * jax.random.normal(keys[3], (C8,), jnp.float32),
        'wv': 0.1 * jax.random.normal(keys[4], (C, C), jnp.float32),
        'bv': 0.05 * jax.random.normal(keys[5], (C,), jnp.float32),
        # torch init is gamma = 0 (output would trivially equal x); use a
        # deterministic nonzero value so the attention path is exercised.
        'gamma': jnp.float32(0.5),
    }

    x = jax.random.normal(keys[6], (B, C, H, W), jnp.float32)
    y = jax.random.normal(keys[7], (B, C, H, W), jnp.float32)

    prep = prepare_params(params)
    fwd = jax.jit(criss_cross_attention)
    out = jax.block_until_ready(fwd(x, y, prep))
    ref = jax.block_until_ready(reference(x, y, params))

    assert out.shape == (B, C, H, W), out.shape
    max_err = float(jnp.max(jnp.abs(out - ref)))
    # bf16 MXU operands + approximate reciprocal => relaxed tolerance vs f32 ref
    assert jnp.allclose(out, ref, rtol=2e-2, atol=2e-2), max_err
    print("KERNEL_OK")
</pallas_src>

<mosaic_0001>
module attributes {stable_mosaic.version = 11 : i64} {
  func.func @_proj_kernel(%arg0: i32, %arg1: memref<256x16xf32, #tpu.memory_space<vmem>>, %arg2: memref<256x16xf32, #tpu.memory_space<vmem>>, %arg3: memref<16x4xbf16, #tpu.memory_space<vmem>>, %arg4: memref<1x4xf32, #tpu.memory_space<vmem>>, %arg5: memref<16x16xbf16, #tpu.memory_space<vmem>>, %arg6: memref<1x16xf32, #tpu.memory_space<vmem>>, %arg7: memref<256x4xbf16, #tpu.memory_space<vmem>>, %arg8: memref<256x16xbf16, #tpu.memory_space<vmem>>) attributes {dimension_semantics = [#tpu.dimension_semantics<parallel>], iteration_bounds = array<i64: 1>, scalar_prefetch = 0 : i64, scratch_operands = 0 : i64, tpu.core_type = #tpu.core_type<tc>, window_params = [{transform_indices = @transform_0, window_bounds = array<i64: 256, 16>}, {transform_indices = @transform_1, window_bounds = array<i64: 256, 16>}, {pipeline_mode = #tpu.pipeline_mode<synchronous>, transform_indices = @transform_2, window_bounds = array<i64: 16, 4>}, {pipeline_mode = #tpu.pipeline_mode<synchronous>, transform_indices = @transform_3, window_bounds = array<i64: 1, 4>}, {pipeline_mode = #tpu.pipeline_mode<synchronous>, transform_indices = @transform_4, window_bounds = array<i64: 16, 16>}, {pipeline_mode = #tpu.pipeline_mode<synchronous>, transform_indices = @transform_5, window_bounds = array<i64: 1, 16>}, {transform_indices = @transform_6, window_bounds = array<i64: 256, 4>}, {transform_indices = @transform_7, window_bounds = array<i64: 256, 16>}]} {
    %c0 = arith.constant 0 : index
    %c0_0 = arith.constant 0 : index
    %0 = vector.load %arg1[%c0, %c0_0] : memref<256x16xf32, #tpu.memory_space<vmem>>, vector<256x16xf32>
    %1 = arith.truncf %0 : vector<256x16xf32> to vector<256x16xbf16>
    %c0_1 = arith.constant 0 : index
    %c0_2 = arith.constant 0 : index
    %2 = vector.load %arg2[%c0_1, %c0_2] : memref<256x16xf32, #tpu.memory_space<vmem>>, vector<256x16xf32>
    %3 = arith.truncf %2 : vector<256x16xf32> to vector<256x16xbf16>
    %c0_3 = arith.constant 0 : index
    %c0_4 = arith.constant 0 : index
    %4 = vector.load %arg3[%c0_3, %c0_4] : memref<16x4xbf16, #tpu.memory_space<vmem>>, vector<16x4xbf16>
    %cst = arith.constant dense<0.000000e+00> : vector<256x4xf32>
    %5 = tpu.matmul %1, %4, %cst {dimension_numbers = #tpu.dot_dimension_numbers<[1], [0], [0], [1], [0, 0, 1, 1], [], []>} : vector<256x16xbf16>, vector<16x4xbf16>, vector<256x4xf32> -> vector<256x4xf32>
    %c0_5 = arith.constant 0 : index
    %c0_6 = arith.constant 0 : index
    %6 = vector.load %arg4[%c0_5, %c0_6] : memref<1x4xf32, #tpu.memory_space<vmem>>, vector<1x4xf32>
    %7 = vector.broadcast %6 : vector<1x4xf32> to vector<256x4xf32>
    %8 = arith.addf %5, %7 : vector<256x4xf32>
    %c0_7 = arith.constant 0 : index
    %c0_8 = arith.constant 0 : index
    %9 = vector.load %arg5[%c0_7, %c0_8] : memref<16x16xbf16, #tpu.memory_space<vmem>>, vector<16x16xbf16>
    %cst_9 = arith.constant dense<0.000000e+00> : vector<256x16xf32>
    %10 = tpu.matmul %3, %9, %cst_9 {dimension_numbers = #tpu.dot_dimension_numbers<[1], [0], [0], [1], [0, 0, 1, 1], [], []>} : vector<256x16xbf16>, vector<16x16xbf16>, vector<256x16xf32> -> vector<256x16xf32>
    %c0_10 = arith.constant 0 : index
    %c0_11 = arith.constant 0 : index
    %11 = vector.load %arg6[%c0_10, %c0_11] : memref<1x16xf32, #tpu.memory_space<vmem>>, vector<1x16xf32>
    %12 = vector.broadcast %11 : vector<1x16xf32> to vector<256x16xf32>
    %13 = arith.addf %10, %12 : vector<256x16xf32>
    %14 = arith.truncf %8 : vector<256x4xf32> to vector<256x4xbf16>
    %c0_12 = arith.constant 0 : index
    %c0_13 = arith.constant 0 : index
    %15 = vector.load %arg7[%c0_12, %c0_13] : memref<256x4xbf16, #tpu.memory_space<vmem>>, vector<256x4xbf16>
    tpu.vector_store %arg7[%c0_12, %c0_13], %14 {strides = array<i32>} : memref<256x4xbf16, #tpu.memory_space<vmem>>, vector<256x4xbf16>,
    %16 = arith.truncf %13 : vector<256x16xf32> to vector<256x16xbf16>
    %c0_14 = arith.constant 0 : index
    %c0_15 = arith.constant 0 : index
    %17 = vector.load %arg8[%c0_14, %c0_15] : memref<256x16xbf16, #tpu.memory_space<vmem>>, vector<256x16xbf16>
    tpu.vector_store %arg8[%c0_14, %c0_15], %16 {strides = array<i32>} : memref<256x16xbf16, #tpu.memory_space<vmem>>, vector<256x16xbf16>,
    return
  }
  func.func @transform_0(%arg0: i32) -> (i32, i32) {
    %c0_i32 = arith.constant 0 : i32
    %c0_i32_0 = arith.constant 0 : i32
    return %arg0, %c0_i32 : i32, i32
  }
  func.func @transform_1(%arg0: i32) -> (i32, i32) {
    %c0_i32 = arith.constant 0 : i32
    %c0_i32_0 = arith.constant 0 : i32
    return %arg0, %c0_i32 : i32, i32
  }
  func.func @transform_2(%arg0: i32) -> (i32, i32) {
    %c0_i32 = arith.constant 0 : i32
    %c0_i32_0 = arith.constant 0 : i32
    %c0_i32_1 = arith.constant 0 : i32
    return %c0_i32, %c0_i32_0 : i32, i32
  }
  func.func @transform_3(%arg0: i32) -> (i32, i32) {
    %c0_i32 = arith.constant 0 : i32
    %c0_i32_0 = arith.constant 0 : i32
    %c0_i32_1 = arith.constant 0 : i32
    return %c0_i32, %c0_i32_0 : i32, i32
  }
  func.func @transform_4(%arg0: i32) -> (i32, i32) {
    %c0_i32 = arith.constant 0 : i32
    %c0_i32_0 = arith.constant 0 : i32
    %c0_i32_1 = arith.constant 0 : i32
    return %c0_i32, %c0_i32_0 : i32, i32
  }
  func.func @transform_5(%arg0: i32) -> (i32, i32) {
    %c0_i32 = arith.constant 0 : i32
    %c0_i32_0 = arith.constant 0 : i32
    %c0_i32_1 = arith.constant 0 : i32
    return %c0_i32, %c0_i32_0 : i32, i32
  }
  func.func @transform_6(%arg0: i32) -> (i32, i32) {
    %c0_i32 = arith.constant 0 : i32
    %c0_i32_0 = arith.constant 0 : i32
    return %arg0, %c0_i32 : i32, i32
  }
  func.func @transform_7(%arg0: i32) -> (i32, i32) {
    %c0_i32 = arith.constant 0 : i32
    %c0_i32_0 = arith.constant 0 : i32
    return %arg0, %c0_i32 : i32, i32
  }
}

module attributes {stable_mosaic.version = 11 : i64} {
  func.func @_cc_attn_kernel(%arg0: i32, %arg1: i32, %arg2: memref<1x16x8x2xbf16, #tpu.memory_space<vmem>>, %arg3: memref<1x16x2x8xbf16, #tpu.memory_space<vmem>>, %arg4: memref<1x16x8x16xbf16, #tpu.memory_space<vmem>>, %arg5: memref<1x8x16x2xbf16, #tpu.memory_space<vmem>>, %arg6: memref<1x8x2x16xbf16, #tpu.memory_space<vmem>>, %arg7: memref<1x8x16x16xbf16, #tpu.memory_space<vmem>>, %arg8: memref<1x16x8x16xf32, #tpu.memory_space<vmem>>, %arg9: memref<1x8x16x16xf32, #tpu.memory_space<vmem>>) attributes {dimension_semantics = [#tpu.dimension_semantics<parallel>, #tpu.dimension_semantics<parallel>], iteration_bounds = array<i64: 2, 1>, scalar_prefetch = 0 : i64, scratch_operands = 0 : i64, tpu.core_type = #tpu.core_type<tc>, window_params = [{transform_indices = @transform_0, window_bounds = array<i64: 1, 16, 8, 2>}, {transform_indices = @transform_1, window_bounds = array<i64: 1, 16, 2, 8>}, {transform_indices = @transform_2, window_bounds = array<i64: 1, 16, 8, 16>}, {transform_indices = @transform_3, window_bounds = array<i64: 1, 8, 16, 2>}, {transform_indices = @transform_4, window_bounds = array<i64: 1, 8, 2, 16>}, {transform_indices = @transform_5, window_bounds = array<i64: 1, 8, 16, 16>}, {transform_indices = @transform_6, window_bounds = array<i64: 1, 16, 8, 16>}, {transform_indices = @transform_7, window_bounds = array<i64: 1, 8, 16, 16>}]} {
    %c0 = arith.constant 0 : index
    %c0_0 = arith.constant 0 : index
    %c0_1 = arith.constant 0 : index
    %c0_2 = arith.constant 0 : index
    %0 = vector.load %arg2[%c0, %c0_0, %c0_1, %c0_2] : memref<1x16x8x2xbf16, #tpu.memory_space<vmem>>, vector<1x16x8x2xbf16>
    %1 = vector.shape_cast %0 : vector<1x16x8x2xbf16> to vector<16x8x2xbf16>
    %c0_3 = arith.constant 0 : index
    %c0_4 = arith.constant 0 : index
    %c0_5 = arith.constant 0 : index
    %c0_6 = arith.constant 0 : index
    %2 = vector.load %arg3[%c0_3, %c0_4, %c0_5, %c0_6] : memref<1x16x2x8xbf16, #tpu.memory_space<vmem>>, vector<1x16x2x8xbf16>
    %3 = vector.shape_cast %2 : vector<1x16x2x8xbf16> to vector<16x2x8xbf16>
    %c0_7 = arith.constant 0 : index
    %c0_8 = arith.constant 0 : index
    %c0_9 = arith.constant 0 : index
    %c0_10 = arith.constant 0 : index
    %4 = vector.load %arg4[%c0_7, %c0_8, %c0_9, %c0_10] : memref<1x16x8x16xbf16, #tpu.memory_space<vmem>>, vector<1x16x8x16xbf16>
    %5 = vector.shape_cast %4 : vector<1x16x8x16xbf16> to vector<16x8x16xbf16>
    %c0_11 = arith.constant 0 : index
    %c0_12 = arith.constant 0 : index
    %c0_13 = arith.constant 0 : index
    %c0_14 = arith.constant 0 : index
    %6 = vector.load %arg5[%c0_11, %c0_12, %c0_13, %c0_14] : memref<1x8x16x2xbf16, #tpu.memory_space<vmem>>, vector<1x8x16x2xbf16>
    %7 = vector.shape_cast %6 : vector<1x8x16x2xbf16> to vector<8x16x2xbf16>
    %c0_15 = arith.constant 0 : index
    %c0_16 = arith.constant 0 : index
    %c0_17 = arith.constant 0 : index
    %c0_18 = arith.constant 0 : index
    %8 = vector.load %arg6[%c0_15, %c0_16, %c0_17, %c0_18] : memref<1x8x2x16xbf16, #tpu.memory_space<vmem>>, vector<1x8x2x16xbf16>
    %9 = vector.shape_cast %8 : vector<1x8x2x16xbf16> to vector<8x2x16xbf16>
    %c0_19 = arith.constant 0 : index
    %c0_20 = arith.constant 0 : index
    %c0_21 = arith.constant 0 : index
    %c0_22 = arith.constant 0 : index
    %10 = vector.load %arg7[%c0_19, %c0_20, %c0_21, %c0_22] : memref<1x8x16x16xbf16, #tpu.memory_space<vmem>>, vector<1x8x16x16xbf16>
    %11 = vector.shape_cast %10 : vector<1x8x16x16xbf16> to vector<8x16x16xbf16>
    "tpu.trace_start"() <{level = 10 : i32, message = "whc,wcg->whg"}> : () -> ()
    %cst = arith.constant dense<0.000000e+00> : vector<16x8x8xf32>
    %12 = tpu.matmul %1, %3, %cst {dimension_numbers = #tpu.dot_dimension_numbers<[2], [1], [1], [2], [0, 0, 0, 1, 1, 2], [0], [0]>} : vector<16x8x2xbf16>, vector<16x2x8xbf16>, vector<16x8x8xf32> -> vector<16x8x8xf32>
    "tpu.trace_stop"() : () -> ()
    "tpu.trace_start"() <{level = 10 : i32, message = "hwc,hcv->hwv"}> : () -> ()
    %cst_23 = arith.constant dense<0.000000e+00> : vector<8x16x16xf32>
    %13 = tpu.matmul %7, %9, %cst_23 {dimension_numbers = #tpu.dot_dimension_numbers<[2], [1], [1], [2], [0, 0, 0, 1, 1, 2], [0], [0]>} : vector<8x16x2xbf16>, vector<8x2x16xbf16>, vector<8x16x16xf32> -> vector<8x16x16xf32>
    "tpu.trace_stop"() : () -> ()
    %14 = tpu.iota {dimensions = array<i32: 0>} : vector<8x8xi32>
    %15 = tpu.iota {dimensions = array<i32: 1>} : vector<8x8xi32>
    %16 = arith.cmpi eq, %14, %15 : vector<8x8xi32>
    %cst_24 = arith.constant -1.000000e+30 : f32
    %cst_25 = arith.constant 0.000000e+00 : f32
    %17 = vector.broadcast %cst_24 : f32 to vector<8x8xf32>
    %18 = vector.broadcast %cst_25 : f32 to vector<8x8xf32>
    %19 = arith.select %16, %17, %18 : vector<8x8xi1>, vector<8x8xf32>
    %20 = vector.shape_cast %19 : vector<8x8xf32> to vector<1x8x8xf32>
    %21 = vector.broadcast %20 : vector<1x8x8xf32> to vector<16x8x8xf32>
    %22 = arith.addf %12, %21 : vector<16x8x8xf32>
    %cst_26 = arith.constant dense<0xFF800000> : vector<16x8xf32>
    %23 = vector.multi_reduction <maximumf>, %22, %cst_26 [2] : vector<16x8x8xf32> to vector<16x8xf32>
    %cst_27 = arith.constant dense<0xFF800000> : vector<8x16xf32>
    %24 = vector.multi_reduction <maximumf>, %13, %cst_27 [2] : vector<8x16x16xf32> to vector<8x16xf32>
    %25 = tpu.transpose %23, [1, 0] : vector<16x8xf32> -> vector<8x16xf32>
    %26 = arith.maximumf %25, %24 : vector<8x16xf32>
    %27 = tpu.transpose %26, [1, 0] : vector<8x16xf32> -> vector<16x8xf32>
    %28 = vector.shape_cast %27 : vector<16x8xf32> to vector<16x8x1xf32>
    %29 = vector.broadcast %28 : vector<16x8x1xf32> to vector<16x8x8xf32>
    %30 = arith.subf %22, %29 : vector<16x8x8xf32>
    %31 = math.exp %30 : vector<16x8x8xf32>
    %32 = vector.shape_cast %26 : vector<8x16xf32> to vector<8x16x1xf32>
    %33 = vector.broadcast %32 : vector<8x16x1xf32> to vector<8x16x16xf32>
    %34 = arith.subf %13, %33 : vector<8x16x16xf32>
    %35 = math.exp %34 : vector<8x16x16xf32>
    %cst_28 = arith.constant dense<0.000000e+00> : vector<16x8xf32>
    %36 = vector.multi_reduction <add>, %31, %cst_28 [2] : vector<16x8x8xf32> to vector<16x8xf32>
    %37 = tpu.transpose %36, [1, 0] : vector<16x8xf32> -> vector<8x16xf32>
    %cst_29 = arith.constant dense<0.000000e+00> : vector<8x16xf32>
    %38 = vector.multi_reduction <add>, %35, %cst_29 [2] : vector<8x16x16xf32> to vector<8x16xf32>
    %39 = arith.addf %37, %38 : vector<8x16xf32>
    %40 = tpu.reciprocal %39 {approx = true} : vector<8x16xf32> -> vector<8x16xf32>
    %41 = arith.truncf %31 : vector<16x8x8xf32> to vector<16x8x8xbf16>
    "tpu.trace_start"() <{level = 10 : i32, message = "whg,wgc->whc"}> : () -> ()
    %cst_30 = arith.constant dense<0.000000e+00> : vector<16x8x16xf32>
    %42 = tpu.matmul %41, %5, %cst_30 {dimension_numbers = #tpu.dot_dimension_numbers<[2], [1], [1], [2], [0, 0, 0, 1, 1, 2], [0], [0]>} : vector<16x8x8xbf16>, vector<16x8x16xbf16>, vector<16x8x16xf32> -> vector<16x8x16xf32>
    "tpu.trace_stop"() : () -> ()
    %43 = arith.truncf %35 : vector<8x16x16xf32> to vector<8x16x16xbf16>
    "tpu.trace_start"() <{level = 10 : i32, message = "hwv,hvc->hwc"}> : () -> ()
    %cst_31 = arith.constant dense<0.000000e+00> : vector<8x16x16xf32>
    %44 = tpu.matmul %43, %11, %cst_31 {dimension_numbers = #tpu.dot_dimension_numbers<[2], [1], [1], [2], [0, 0, 0, 1, 1, 2], [0], [0]>} : vector<8x16x16xbf16>, vector<8x16x16xbf16>, vector<8x16x16xf32> -> vector<8x16x16xf32>
    "tpu.trace_stop"() : () -> ()
    %45 = tpu.transpose %40, [1, 0] : vector<8x16xf32> -> vector<16x8xf32>
    %46 = vector.shape_cast %45 : vector<16x8xf32> to vector<16x8x1xf32>
    %47 = vector.broadcast %46 : vector<16x8x1xf32> to vector<16x8x16xf32>
    %48 = arith.mulf %42, %47 : vector<16x8x16xf32>
    %c0_32 = arith.constant 0 : index
    %c0_33 = arith.constant 0 : index
    %c0_34 = arith.constant 0 : index
    %c0_35 = arith.constant 0 : index
    %49 = vector.load %arg8[%c0_32, %c0_33, %c0_34, %c0_35] : memref<1x16x8x16xf32, #tpu.memory_space<vmem>>, vector<1x16x8x16xf32>
    %50 = vector.shape_cast %49 : vector<1x16x8x16xf32> to vector<16x8x16xf32>
    %51 = vector.shape_cast %48 : vector<16x8x16xf32> to vector<1x16x8x16xf32>
    tpu.vector_store %arg8[%c0_32, %c0_33, %c0_34, %c0_35], %51 {strides = array<i32>} : memref<1x16x8x16xf32, #tpu.memory_space<vmem>>, vector<1x16x8x16xf32>,
    %52 = vector.shape_cast %40 : vector<8x16xf32> to vector<8x16x1xf32>
    %53 = vector.broadcast %52 : vector<8x16x1xf32> to vector<8x16x16xf32>
    %54 = arith.mulf %44, %53 : vector<8x16x16xf32>
    %c0_36 = arith.constant 0 : index
    %c0_37 = arith.constant 0 : index
    %c0_38 = arith.constant 0 : index
    %c0_39 = arith.constant 0 : index
    %55 = vector.load %arg9[%c0_36, %c0_37, %c0_38, %c0_39] : memref<1x8x16x16xf32, #tpu.memory_space<vmem>>, vector<1x8x16x16xf32>
    %56 = vector.shape_cast %55 : vector<1x8x16x16xf32> to vector<8x16x16xf32>
    %57 = vector.shape_cast %54 : vector<8x16x16xf32> to vector<1x8x16x16xf32>
    tpu.vector_store %arg9[%c0_36, %c0_37, %c0_38, %c0_39], %57 {strides = array<i32>} : memref<1x8x16x16xf32, #tpu.memory_space<vmem>>, vector<1x8x16x16xf32>,
    return
  }
  func.func @transform_0(%arg0: i32, %arg1: i32) -> (i32, i32, i32, i32) {
    %c0_i32 = arith.constant 0 : i32
    %c0_i32_0 = arith.constant 0 : i32
    %c0_i32_1 = arith.constant 0 : i32
    return %arg0, %arg1, %c0_i32, %c0_i32_0 : i32, i32, i32, i32
  }
  func.func @transform_1(%arg0: i32, %arg1: i32) -> (i32, i32, i32, i32) {
    %c0_i32 = arith.constant 0 : i32
    %c0_i32_0 = arith.constant 0 : i32
    %c0_i32_1 = arith.constant 0 : i32
    return %arg0, %arg1, %c0_i32, %c0_i32_0 : i32, i32, i32, i32
  }
  func.func @transform_2(%arg0: i32, %arg1: i32) -> (i32, i32, i32, i32) {
    %c0_i32 = arith.constant 0 : i32
    %c0_i32_0 = arith.constant 0 : i32
    %c0_i32_1 = arith.constant 0 : i32
    return %arg0, %arg1, %c0_i32, %c0_i32_0 : i32, i32, i32, i32
  }
  func.func @transform_3(%arg0: i32, %arg1: i32) -> (i32, i32, i32, i32) {
    %c0_i32 = arith.constant 0 : i32
    %c0_i32_0 = arith.constant 0 : i32
    %c0_i32_1 = arith.constant 0 : i32
    return %arg0, %c0_i32, %arg1, %c0_i32_0 : i32, i32, i32, i32
  }
  func.func @transform_4(%arg0: i32, %arg1: i32) -> (i32, i32, i32, i32) {
    %c0_i32 = arith.constant 0 : i32
    %c0_i32_0 = arith.constant 0 : i32
    %c0_i32_1 = arith.constant 0 : i32
    %c0_i32_2 = arith.constant 0 : i32
    return %arg0, %c0_i32, %c0_i32_0, %c0_i32_1 : i32, i32, i32, i32
  }
  func.func @transform_5(%arg0: i32, %arg1: i32) -> (i32, i32, i32, i32) {
    %c0_i32 = arith.constant 0 : i32
    %c0_i32_0 = arith.constant 0 : i32
    %c0_i32_1 = arith.constant 0 : i32
    %c0_i32_2 = arith.constant 0 : i32
    return %arg0, %c0_i32, %c0_i32_0, %c0_i32_1 : i32, i32, i32, i32
  }
  func.func @transform_6(%arg0: i32, %arg1: i32) -> (i32, i32, i32, i32) {
    %c0_i32 = arith.constant 0 : i32
    %c0_i32_0 = arith.constant 0 : i32
    %c0_i32_1 = arith.constant 0 : i32
    return %arg0, %arg1, %c0_i32, %c0_i32_0 : i32, i32, i32, i32
  }
  func.func @transform_7(%arg0: i32, %arg1: i32) -> (i32, i32, i32, i32) {
    %c0_i32 = arith.constant 0 : i32
    %c0_i32_0 = arith.constant 0 : i32
    %c0_i32_1 = arith.constant 0 : i32
    return %arg0, %c0_i32, %arg1, %c0_i32_0 : i32, i32, i32, i32
  }
}

</mosaic_0001>

<bundles_post_ra>
// kernel: criss_cross_attention.2
= control target key start
LH: loop header
LB: loop body
LE: loop exit
PB: predicated region body
PF: predicated region fallthrough
CT: control target
= control target key end

     0   :  { %vm137_vm0 = vcmask 130048   ;;  %vm699_vm1 = vcmask 27648   ;;  %vm860_vm2 = vcmask 125952   ;;  %s1769_s2 = inlined_call_operand.vmem [shape: bf16[16,4], index: 2, kind: input, shape index: {}]   ;;  %s1770_s4 = inlined_call_operand.vmem [shape: bf16[16,16], index: 4, kind: input, shape index: {}]   ;;  %s1771_s0 = inlined_call_operand.vmem [shape: f32[256,16], index: 0, kind: input, shape index: {}]   ;;  %s1772_s1 = inlined_call_operand.vmem [shape: f32[256,16], index: 1, kind: input, shape index: {}]   ;;  %s1773_s3 = inlined_call_operand.vmem [shape: f32[1,4], index: 3, kind: input, shape index: {}]   ;;  %s1774_s5 = inlined_call_operand.vmem [shape: f32[1,16], index: 5, kind: input, shape index: {}]   ;;  %s1775_s6 = inlined_call_operand.vmem [shape: bf16[256,4], index: 6, kind: output, shape index: {0}]   ;;  %s1776_s7 = inlined_call_operand.vmem [shape: bf16[256,16], index: 7, kind: output, shape index: {1}]  }
   0x1   :  { %v1167_v0 = vld [vmem:[%s1769_s2] sm:$0xff]   ;;  %v27_v3 = vld [vmem:[%s1771_s0 + $0x8] sm:$0xff]  ;;  %v28_v7 = vld [vmem:[%s1771_s0 + $0x10] sm:$0xff] }
   0x2   :  { %v1168_v1 = vld [vmem:[%s1770_s4] sm:$0xff]   ;;  %1099 = vmatprep.subr.bf16.mxu0 %v1167_v0  ;;  %v75_v6 = vld [vmem:[%s1772_s1 + $0x8] sm:$0xff]  ;;  %v29_v8 = vld [vmem:[%s1771_s0 + $0x18] sm:$0xff] }
   0x3   :  { %v26_v2 = vld [vmem:[%s1771_s0] sm:$0xff]  ;;  %1133 = vmatprep.subr.bf16.mxu1 %v1168_v1  ;;  %1100 = vmatpush3.bf16.msra.mxu0 %v1167_v0  ;;  %v59_v10 = vpack.c.bf16 %v29_v8, %v28_v7  ;;  %v76_v11 = vld [vmem:[%s1772_s1 + $0x10] sm:$0xff]  ;;  %v77_v12 = vld [vmem:[%s1772_s1 + $0x18] sm:$0xff] }
   0x4   :  { %v74_v4 = vld [vmem:[%s1772_s1] sm:$0xff]  ;;  %v58_v5 = vpack.c.bf16 %v27_v3, %v26_v2  ;;  %1134 = vmatpush3.bf16.msra.mxu1 %v1168_v1  ;;  %v107_v14 = vpack.c.bf16 %v77_v12, %v76_v11  ;;  %v31_v15 = vld [vmem:[%s1771_s0 + $0x28] sm:$0xff]  ;;  %v32_v20 = vld [vmem:[%s1771_s0 + $0x30] sm:$0xff] }
   0x5   :  { %v106_v9 = vpack.c.bf16 %v75_v6, %v74_v4  ;;  %v30_v13 = vld [vmem:[%s1771_s0 + $0x20] sm:$0xff]  ;;  %v79_v17 = vld [vmem:[%s1772_s1 + $0x28] sm:$0xff]  ;;  %v33_v21 = vld [vmem:[%s1771_s0 + $0x38] sm:$0xff] }
   0x6   :  { %1101 = vmatprep.mubr.msk.bf16.mxu0 %vm137_vm0, %v58_v5  ;;  %v78_v16 = vld [vmem:[%s1772_s1 + $0x20] sm:$0xff]  ;;  %v60_v18 = vpack.c.bf16 %v31_v15, %v30_v13  ;;  %v80_v22 = vld [vmem:[%s1772_s1 + $0x30] sm:$0xff]  ;;  %v81_v23 = vld [vmem:[%s1772_s1 + $0x38] sm:$0xff]  ;;  %v61_v28 = vpack.c.bf16 %v33_v21, %v32_v20 }
   0x7   :  { %1135 = vmatprep.mubr.msk.bf16.mxu1 %vm137_vm0, %v106_v9  ;;  %1102 = vmatmul.mubr.msk.bf16.vlgmr.msra.gmra.mrb[0].mxu0 %vm137_vm0, %v59_v10  ;;  %v108_v19 = vpack.c.bf16 %v79_v17, %v78_v16  ;;  %v34_v24 = vld [vmem:[%s1771_s0 + $0x40] sm:$0xff]  ;;  %v35_v25 = vld [vmem:[%s1771_s0 + $0x48] sm:$0xff]  ;;  %v109_v29 = vpack.c.bf16 %v81_v23, %v80_v22  ;;  %v36_v32 = vld [vmem:[%s1771_s0 + $0x50] sm:$0xff] }
   0x8   :  { %1136 = vmatmul.mubr.msk.bf16.vlgmr.msra.gmra.mrb[0].mxu1 %vm137_vm0, %v107_v14  ;;  %1105 = vmatprep.mubr.msk.bf16.mxu0 %vm137_vm0, %v60_v18  ;;  %v82_v26 = vld [vmem:[%s1772_s1 + $0x40] sm:$0xff]  ;;  %v83_v27 = vld [vmem:[%s1772_s1 + $0x48] sm:$0xff]  ;;  %v62_v30 = vpack.c.bf16 %v35_v25, %v34_v24  ;;  %v37_v33 = vld [vmem:[%s1771_s0 + $0x58] sm:$0xff] }
   0x9   :  { %1139 = vmatprep.mubr.msk.bf16.mxu1 %vm137_vm0, %v108_v19  ;;  %v110_v31 = vpack.c.bf16 %v83_v27, %v82_v26  ;;  %v84_v34 = vld [vmem:[%s1772_s1 + $0x50] sm:$0xff]  ;;  %v85_v35 = vld [vmem:[%s1772_s1 + $0x58] sm:$0xff]  ;;  %v38_v36 = vld [vmem:[%s1771_s0 + $0x60] sm:$0xff]  ;;  %v63_v40 = vpack.c.bf16 %v37_v33, %v36_v32 }
   0xa   :  { %v39_v37 = vld [vmem:[%s1771_s0 + $0x68] sm:$0xff]  ;;  %v86_v38 = vld [vmem:[%s1772_s1 + $0x60] sm:$0xff]  ;;  %v111_v41 = vpack.c.bf16 %v85_v35, %v84_v34  ;;  %v40_v44 = vld [vmem:[%s1771_s0 + $0x70] sm:$0xff] }
   0xb   :  { %v87_v39 = vld [vmem:[%s1772_s1 + $0x68] sm:$0xff]  ;;  %v64_v42 = vpack.c.bf16 %v39_v37, %v38_v36  ;;  %v41_v45 = vld [vmem:[%s1771_s0 + $0x78] sm:$0xff]  ;;  %v88_v46 = vld [vmem:[%s1772_s1 + $0x70] sm:$0xff] }
   0xc   :  { %v112_v43 = vpack.c.bf16 %v87_v39, %v86_v38  ;;  %v89_v47 = vld [vmem:[%s1772_s1 + $0x78] sm:$0xff]  ;;  %v42_v48 = vld [vmem:[%s1771_s0 + $0x80] sm:$0xff]  ;;  %v43_v49 = vld [vmem:[%s1771_s0 + $0x88] sm:$0xff]  ;;  %v65_v52 = vpack.c.bf16 %v41_v45, %v40_v44 }
   0xd   :  { %v90_v50 = vld [vmem:[%s1772_s1 + $0x80] sm:$0xff]  ;;  %v91_v51 = vld [vmem:[%s1772_s1 + $0x88] sm:$0xff]  ;;  %v113_v53 = vpack.c.bf16 %v89_v47, %v88_v46  ;;  %v66_v54 = vpack.c.bf16 %v43_v49, %v42_v48  ;;  %v44_v56 = vld [vmem:[%s1771_s0 + $0x90] sm:$0xff] }
   0xe   :  { %v114_v55 = vpack.c.bf16 %v91_v51, %v90_v50  ;;  %v45_v57 = vld [vmem:[%s1771_s0 + $0x98] sm:$0xff]  ;;  %v92_v58 = vld [vmem:[%s1772_s1 + $0x90] sm:$0xff]  ;;  %v46_v60 = vld [vmem:[%s1771_s0 + $0xa0] sm:$0xff] }
   0xf   :  { %1106 = vmatmul.mubr.msk.bf16.gmra.mrb[4].mxu0 %vm137_vm0, %v61_v28  ;;  %v93_v59 = vld [vmem:[%s1772_s1 + $0x98] sm:$0xff]  ;;  %v47_v61 = vld [vmem:[%s1771_s0 + $0xa8] sm:$0xff]  ;;  %v94_v62 = vld [vmem:[%s1772_s1 + $0xa0] sm:$0xff]  ;;  %v67_v0 = vpack.c.bf16 %v45_v57, %v44_v56 }
  0x10   :  { %1140 = vmatmul.mubr.msk.bf16.gmra.mrb[4].mxu1 %vm137_vm0, %v109_v29  ;;  %1109 = vmatprep.mubr.msk.bf16.mxu0 %vm137_vm0, %v62_v30  ;;  %v95_v63 = vld [vmem:[%s1772_s1 + $0xa8] sm:$0xff]  ;;  %v115_v1 = vpack.c.bf16 %v93_v59, %v92_v58  ;;  %v68_v2 = vpack.c.bf16 %v47_v61, %v46_v60  ;;  %v48_v4 = vld [vmem:[%s1771_s0 + $0xb0] sm:$0xff]  ;;  %v49_v5 = vld [vmem:[%s1771_s0 + $0xb8] sm:$0xff] }
  0x11   :  { %1143 = vmatprep.mubr.msk.bf16.mxu1 %vm137_vm0, %v110_v31  ;;  %v116_v3 = vpack.c.bf16 %v95_v63, %v94_v62  ;;  %v96_v6 = vld [vmem:[%s1772_s1 + $0xb0] sm:$0xff]  ;;  %v97_v7 = vld [vmem:[%s1772_s1 + $0xb8] sm:$0xff]  ;;  %v50_v8 = vld [vmem:[%s1771_s0 + $0xc0] sm:$0xff]  ;;  %v69_v12 = vpack.c.bf16 %v49_v5, %v48_v4 }
  0x12   :  { %v51_v9 = vld [vmem:[%s1771_s0 + $0xc8] sm:$0xff]  ;;  %v98_v10 = vld [vmem:[%s1772_s1 + $0xc0] sm:$0xff]  ;;  %v117_v13 = vpack.c.bf16 %v97_v7, %v96_v6  ;;  %v52_v16 = vld [vmem:[%s1771_s0 + $0xd0] sm:$0xff] }
  0x13   :  { %v99_v11 = vld [vmem:[%s1772_s1 + $0xc8] sm:$0xff]  ;;  %v70_v14 = vpack.c.bf16 %v51_v9, %v50_v8  ;;  %v53_v17 = vld [vmem:[%s1771_s0 + $0xd8] sm:$0xff]  ;;  %v100_v18 = vld [vmem:[%s1772_s1 + $0xd0] sm:$0xff] }
  0x14   :  { %v118_v15 = vpack.c.bf16 %v99_v11, %v98_v10  ;;  %v101_v19 = vld [vmem:[%s1772_s1 + $0xd8] sm:$0xff]  ;;  %v54_v20 = vld [vmem:[%s1771_s0 + $0xe0] sm:$0xff]  ;;  %v55_v21 = vld [vmem:[%s1771_s0 + $0xe8] sm:$0xff]  ;;  %v71_v24 = vpack.c.bf16 %v53_v17, %v52_v16 }
  0x15   :  { %v102_v22 = vld [vmem:[%s1772_s1 + $0xe0] sm:$0xff]  ;;  %v103_v23 = vld [vmem:[%s1772_s1 + $0xe8] sm:$0xff]  ;;  %v119_v25 = vpack.c.bf16 %v101_v19, %v100_v18  ;;  %v72_v26 = vpack.c.bf16 %v55_v21, %v54_v20  ;;  %v56_v28 = vld [vmem:[%s1771_s0 + $0xf0] sm:$0xff] }
  0x16   :  { %v120_v27 = vpack.c.bf16 %v103_v23, %v102_v22  ;;  %v57_v29 = vld [vmem:[%s1771_s0 + $0xf8] sm:$0xff]  ;;  %v104_v30 = vld [vmem:[%s1772_s1 + $0xf0] sm:$0xff]  ;;  %v1442_v34 = vld [vmem:[%s1773_s3] ss:$0 sm:$0xff] }
  0x17   :  { %1110 = vmatmul.mubr.msk.bf16.gmra.mrb[8].mxu0 %vm137_vm0, %v63_v40  ;;  %v105_v31 = vld [vmem:[%s1772_s1 + $0xf8] sm:$0xff]  ;;  %v73_v32 = vpack.c.bf16 %v57_v29, %v56_v28  ;;  %v1447_v35 = vld [vmem:[%s1774_s5] ss:$0 sm:$0xff] }
  0x18   :  { %1144 = vmatmul.mubr.msk.bf16.gmra.mrb[8].mxu1 %vm137_vm0, %v111_v41  ;;  %1113 = vmatprep.mubr.msk.bf16.mxu0 %vm137_vm0, %v64_v42  ;;  %v121_v33 = vpack.c.bf16 %v105_v31, %v104_v30 }
  0x19   :  { %1147 = vmatprep.mubr.msk.bf16.mxu1 %vm137_vm0, %v112_v43 }
  0x1f   :  { %1114 = vmatmul.mubr.msk.bf16.gmra.mrb[12].mxu0 %vm137_vm0, %v65_v52 }
  0x20   :  { %1148 = vmatmul.mubr.msk.bf16.gmra.mrb[12].mxu1 %vm137_vm0, %v113_v53  ;;  %1117 = vmatprep.mubr.msk.bf16.mxu0 %vm137_vm0, %v66_v54 }
  0x21   :  { %1151 = vmatprep.mubr.msk.bf16.mxu1 %vm137_vm0, %v114_v55 }
  0x27   :  { %1118 = vmatmul.mubr.msk.bf16.gmra.mrb[16].mxu0 %vm137_vm0, %v67_v0 }
  0x28   :  { %1152 = vmatmul.mubr.msk.bf16.gmra.mrb[16].mxu1 %vm137_vm0, %v115_v1  ;;  %1121 = vmatprep.mubr.msk.bf16.mxu0 %vm137_vm0, %v68_v2 }
  0x29   :  { %1155 = vmatprep.mubr.msk.bf16.mxu1 %vm137_vm0, %v116_v3 }
  0x2f   :  { %1122 = vmatmul.mubr.msk.bf16.gmra.mrb[20].mxu0 %vm137_vm0, %v69_v12 }
  0x30   :  { %1156 = vmatmul.mubr.msk.bf16.gmra.mrb[20].mxu1 %vm137_vm0, %v117_v13  ;;  %1125 = vmatprep.mubr.msk.bf16.mxu0 %vm137_vm0, %v70_v14 }
  0x31   :  { %1159 = vmatprep.mubr.msk.bf16.mxu1 %vm137_vm0, %v118_v15 }
  0x37   :  { %1126 = vmatmul.mubr.msk.bf16.gmra.mrb[24].mxu0 %vm137_vm0, %v71_v24 }
  0x38   :  { %1160 = vmatmul.mubr.msk.bf16.gmra.mrb[24].mxu1 %vm137_vm0, %v119_v25  ;;  %1129 = vmatprep.mubr.msk.bf16.mxu0 %vm137_vm0, %v72_v26 }
  0x39   :  { %1163 = vmatprep.mubr.msk.bf16.mxu1 %vm137_vm0, %v120_v27 }
  0x3f   :  { %1130 = vmatmul.mubr.msk.bf16.gmra.mrb[28].mxu0 %vm137_vm0, %v73_v32 }
  0x40   :  { %1164 = vmatmul.mubr.msk.bf16.gmra.mrb[28].mxu1 %vm137_vm0, %v121_v33 }
  0xda   :  { %v1103_v36 = vpop.f32.mrb[0].mxu0 }
  0xdb   :  { %v229_v37 = vadd.f32 %v1103_v36, %v1442_v34  ;;  %v1137_v38 = vpop.f32.mrb[0].mxu1  ;;  %v220_v39 = vpop.f32.mrb[1].mxu0 }
  0xdc   :  { %v453_v40 = vadd.f32 %v1137_v38, %v1447_v35  ;;  %v221_v41 = vadd.f32 %v1442_v34, %v220_v39  ;;  %v444_v42 = vpop.f32.mrb[1].mxu1  ;;  %v1104_v43 = vpop.f32.mrb[2].mxu0 }
  0xdd   :  { %v1003_v44 = vpack.c.bf16 %v229_v37, %v229_v37  ;;  %v445_v45 = vadd.f32 %v1447_v35, %v444_v42  ;;  %v232_v46 = vadd.f32 %v1104_v43, %v1442_v34  ;;  %v1138_v47 = vpop.f32.mrb[2].mxu1  ;;  %v223_v48 = vpop.f32.mrb[3].mxu0 }
  0xde   :  { %v1035_v49 = vpack.c.bf16 %v453_v40, %v453_v40  ;;  %v1001_v50 = vpack.c.bf16 %v221_v41, %v221_v41  ;;  %v456_v51 = vadd.f32 %v1138_v47, %v1447_v35  ;;  %v224_v52 = vadd.f32 %v1442_v34, %v223_v48  ;;  %v447_v53 = vpop.f32.mrb[3].mxu1 }
  0xdf   :  { %702 = vst.msk [vmem:[%s1775_s6 + $0x8] sm:$0xf] %vm699_vm1, %v1003_v44  ;;  %v1033_v54 = vpack.c.bf16 %v445_v45, %v445_v45  ;;  %v1004_v55 = vpack.c.bf16 %v232_v46, %v232_v46  ;;  %v448_v56 = vadd.f32 %v1447_v35, %v447_v53 }
  0xe0   :  { %863 = vst.msk [vmem:[%s1776_s7 + $0x8] sm:$0xf] %vm860_vm2, %v1035_v49  ;;  %v1036_v57 = vpack.c.bf16 %v456_v51, %v456_v51  ;;  %v1002_v58 = vpack.c.bf16 %v224_v52, %v224_v52 }
  0xe1   :  { %700 = vst.msk [vmem:[%s1775_s6] sm:$0xf] %vm699_vm1, %v1001_v50  ;;  %703 = vst.msk [vmem:[%s1775_s6 + $0xc] sm:$0xf] %vm699_vm1, %v1004_v55  ;;  %v1034_v59 = vpack.c.bf16 %v448_v56, %v448_v56 }
  0xe2   :  { %861 = vst.msk [vmem:[%s1776_s7] sm:$0xf] %vm860_vm2, %v1033_v54  ;;  %864 = vst.msk [vmem:[%s1776_s7 + $0xc] sm:$0xf] %vm860_vm2, %v1036_v57  ;;  %v1107_v60 = vpop.f32.mrb[4].mxu0 }
  0xe3   :  { %701 = vst.msk [vmem:[%s1775_s6 + $0x4] sm:$0xf] %vm699_vm1, %v1002_v58  ;;  %v245_v61 = vadd.f32 %v1107_v60, %v1442_v34  ;;  %v1141_v62 = vpop.f32.mrb[4].mxu1  ;;  %v236_v63 = vpop.f32.mrb[5].mxu0 }
  0xe4   :  { %862 = vst.msk [vmem:[%s1776_s7 + $0x4] sm:$0xf] %vm860_vm2, %v1034_v59  ;;  %v469_v0 = vadd.f32 %v1141_v62, %v1447_v35  ;;  %v237_v1 = vadd.f32 %v1442_v34, %v236_v63  ;;  %v460_v2 = vpop.f32.mrb[5].mxu1  ;;  %v1108_v3 = vpop.f32.mrb[6].mxu0 }
  0xe5   :  { %v1007_v4 = vpack.c.bf16 %v245_v61, %v245_v61  ;;  %v461_v5 = vadd.f32 %v1447_v35, %v460_v2  ;;  %v248_v6 = vadd.f32 %v1108_v3, %v1442_v34  ;;  %v1142_v7 = vpop.f32.mrb[6].mxu1  ;;  %v239_v8 = vpop.f32.mrb[7].mxu0 }
  0xe6   :  { %v1039_v9 = vpack.c.bf16 %v469_v0, %v469_v0  ;;  %v1005_v10 = vpack.c.bf16 %v237_v1, %v237_v1  ;;  %v472_v11 = vadd.f32 %v1142_v7, %v1447_v35  ;;  %v240_v12 = vadd.f32 %v1442_v34, %v239_v8  ;;  %v463_v13 = vpop.f32.mrb[7].mxu1 }
  0xe7   :  { %706 = vst.msk [vmem:[%s1775_s6 + $0x18] sm:$0xf] %vm699_vm1, %v1007_v4  ;;  %v1037_v14 = vpack.c.bf16 %v461_v5, %v461_v5  ;;  %v1008_v15 = vpack.c.bf16 %v248_v6, %v248_v6  ;;  %v464_v16 = vadd.f32 %v1447_v35, %v463_v13 }
  0xe8   :  { %867 = vst.msk [vmem:[%s1776_s7 + $0x18] sm:$0xf] %vm860_vm2, %v1039_v9  ;;  %v1040_v17 = vpack.c.bf16 %v472_v11, %v472_v11  ;;  %v1006_v18 = vpack.c.bf16 %v240_v12, %v240_v12 }
  0xe9   :  { %704 = vst.msk [vmem:[%s1775_s6 + $0x10] sm:$0xf] %vm699_vm1, %v1005_v10  ;;  %707 = vst.msk [vmem:[%s1775_s6 + $0x1c] sm:$0xf] %vm699_vm1, %v1008_v15  ;;  %v1038_v19 = vpack.c.bf16 %v464_v16, %v464_v16 }
  0xea   :  { %865 = vst.msk [vmem:[%s1776_s7 + $0x10] sm:$0xf] %vm860_vm2, %v1037_v14  ;;  %868 = vst.msk [vmem:[%s1776_s7 + $0x1c] sm:$0xf] %vm860_vm2, %v1040_v17  ;;  %v1111_v20 = vpop.f32.mrb[8].mxu0 }
  0xeb   :  { %705 = vst.msk [vmem:[%s1775_s6 + $0x14] sm:$0xf] %vm699_vm1, %v1006_v18  ;;  %v261_v21 = vadd.f32 %v1111_v20, %v1442_v34  ;;  %v1145_v22 = vpop.f32.mrb[8].mxu1  ;;  %v252_v23 = vpop.f32.mrb[9].mxu0 }
  0xec   :  { %866 = vst.msk [vmem:[%s1776_s7 + $0x14] sm:$0xf] %vm860_vm2, %v1038_v19  ;;  %v485_v24 = vadd.f32 %v1145_v22, %v1447_v35  ;;  %v253_v25 = vadd.f32 %v1442_v34, %v252_v23  ;;  %v476_v26 = vpop.f32.mrb[9].mxu1  ;;  %v1112_v27 = vpop.f32.mrb[10].mxu0 }
  0xed   :  { %v1011_v28 = vpack.c.bf16 %v261_v21, %v261_v21  ;;  %v477_v29 = vadd.f32 %v1447_v35, %v476_v26  ;;  %v264_v30 = vadd.f32 %v1112_v27, %v1442_v34  ;;  %v1146_v31 = vpop.f32.mrb[10].mxu1  ;;  %v255_v32 = vpop.f32.mrb[11].mxu0 }
  0xee   :  { %v1043_v33 = vpack.c.bf16 %v485_v24, %v485_v24  ;;  %v1009_v36 = vpack.c.bf16 %v253_v25, %v253_v25  ;;  %v488_v37 = vadd.f32 %v1146_v31, %v1447_v35  ;;  %v256_v38 = vadd.f32 %v1442_v34, %v255_v32  ;;  %v479_v39 = vpop.f32.mrb[11].mxu1 }
  0xef   :  { %710 = vst.msk [vmem:[%s1775_s6 + $0x28] sm:$0xf] %vm699_vm1, %v1011_v28  ;;  %v1041_v40 = vpack.c.bf16 %v477_v29, %v477_v29  ;;  %v1012_v41 = vpack.c.bf16 %v264_v30, %v264_v30  ;;  %v480_v42 = vadd.f32 %v1447_v35, %v479_v39 }
  0xf0   :  { %871 = vst.msk [vmem:[%s1776_s7 + $0x28] sm:$0xf] %vm860_vm2, %v1043_v33  ;;  %v1044_v43 = vpack.c.bf16 %v488_v37, %v488_v37  ;;  %v1010_v44 = vpack.c.bf16 %v256_v38, %v256_v38 }
  0xf1   :  { %708 = vst.msk [vmem:[%s1775_s6 + $0x20] sm:$0xf] %vm699_vm1, %v1009_v36  ;;  %711 = vst.msk [vmem:[%s1775_s6 + $0x2c] sm:$0xf] %vm699_vm1, %v1012_v41  ;;  %v1042_v45 = vpack.c.bf16 %v480_v42, %v480_v42 }
  0xf2   :  { %869 = vst.msk [vmem:[%s1776_s7 + $0x20] sm:$0xf] %vm860_vm2, %v1041_v40  ;;  %872 = vst.msk [vmem:[%s1776_s7 + $0x2c] sm:$0xf] %vm860_vm2, %v1044_v43  ;;  %v1115_v46 = vpop.f32.mrb[12].mxu0 }
  0xf3   :  { %709 = vst.msk [vmem:[%s1775_s6 + $0x24] sm:$0xf] %vm699_vm1, %v1010_v44  ;;  %v277_v47 = vadd.f32 %v1115_v46, %v1442_v34  ;;  %v1149_v48 = vpop.f32.mrb[12].mxu1  ;;  %v268_v49 = vpop.f32.mrb[13].mxu0 }
  0xf4   :  { %870 = vst.msk [vmem:[%s1776_s7 + $0x24] sm:$0xf] %vm860_vm2, %v1042_v45  ;;  %v501_v50 = vadd.f32 %v1149_v48, %v1447_v35  ;;  %v269_v51 = vadd.f32 %v1442_v34, %v268_v49  ;;  %v492_v52 = vpop.f32.mrb[13].mxu1  ;;  %v1116_v53 = vpop.f32.mrb[14].mxu0 }
  0xf5   :  { %v1015_v54 = vpack.c.bf16 %v277_v47, %v277_v47  ;;  %v493_v55 = vadd.f32 %v1447_v35, %v492_v52  ;;  %v280_v56 = vadd.f32 %v1116_v53, %v1442_v34  ;;  %v1150_v57 = vpop.f32.mrb[14].mxu1  ;;  %v271_v58 = vpop.f32.mrb[15].mxu0 }
  0xf6   :  { %v1047_v59 = vpack.c.bf16 %v501_v50, %v501_v50  ;;  %v1013_v60 = vpack.c.bf16 %v269_v51, %v269_v51  ;;  %v504_v61 = vadd.f32 %v1150_v57, %v1447_v35  ;;  %v272_v62 = vadd.f32 %v1442_v34, %v271_v58  ;;  %v495_v63 = vpop.f32.mrb[15].mxu1 }
  0xf7   :  { %714 = vst.msk [vmem:[%s1775_s6 + $0x38] sm:$0xf] %vm699_vm1, %v1015_v54  ;;  %v1045_v0 = vpack.c.bf16 %v493_v55, %v493_v55  ;;  %v1016_v1 = vpack.c.bf16 %v280_v56, %v280_v56  ;;  %v496_v2 = vadd.f32 %v1447_v35, %v495_v63 }
  0xf8   :  { %875 = vst.msk [vmem:[%s1776_s7 + $0x38] sm:$0xf] %vm860_vm2, %v1047_v59  ;;  %v1048_v3 = vpack.c.bf16 %v504_v61, %v504_v61  ;;  %v1014_v4 = vpack.c.bf16 %v272_v62, %v272_v62 }
  0xf9   :  { %712 = vst.msk [vmem:[%s1775_s6 + $0x30] sm:$0xf] %vm699_vm1, %v1013_v60  ;;  %715 = vst.msk [vmem:[%s1775_s6 + $0x3c] sm:$0xf] %vm699_vm1, %v1016_v1  ;;  %v1046_v5 = vpack.c.bf16 %v496_v2, %v496_v2 }
  0xfa   :  { %873 = vst.msk [vmem:[%s1776_s7 + $0x30] sm:$0xf] %vm860_vm2, %v1045_v0  ;;  %876 = vst.msk [vmem:[%s1776_s7 + $0x3c] sm:$0xf] %vm860_vm2, %v1048_v3  ;;  %v1119_v6 = vpop.f32.mrb[16].mxu0 }
  0xfb   :  { %713 = vst.msk [vmem:[%s1775_s6 + $0x34] sm:$0xf] %vm699_vm1, %v1014_v4  ;;  %v293_v7 = vadd.f32 %v1119_v6, %v1442_v34  ;;  %v1153_v8 = vpop.f32.mrb[16].mxu1  ;;  %v284_v9 = vpop.f32.mrb[17].mxu0 }
  0xfc   :  { %874 = vst.msk [vmem:[%s1776_s7 + $0x34] sm:$0xf] %vm860_vm2, %v1046_v5  ;;  %v517_v10 = vadd.f32 %v1153_v8, %v1447_v35  ;;  %v285_v11 = vadd.f32 %v1442_v34, %v284_v9  ;;  %v508_v12 = vpop.f32.mrb[17].mxu1  ;;  %v1120_v13 = vpop.f32.mrb[18].mxu0 }
  0xfd   :  { %v1019_v14 = vpack.c.bf16 %v293_v7, %v293_v7  ;;  %v509_v15 = vadd.f32 %v1447_v35, %v508_v12  ;;  %v296_v16 = vadd.f32 %v1120_v13, %v1442_v34  ;;  %v1154_v17 = vpop.f32.mrb[18].mxu1  ;;  %v287_v18 = vpop.f32.mrb[19].mxu0 }
  0xfe   :  { %v1051_v19 = vpack.c.bf16 %v517_v10, %v517_v10  ;;  %v1017_v20 = vpack.c.bf16 %v285_v11, %v285_v11  ;;  %v520_v21 = vadd.f32 %v1154_v17, %v1447_v35  ;;  %v288_v22 = vadd.f32 %v1442_v34, %v287_v18  ;;  %v511_v23 = vpop.f32.mrb[19].mxu1 }
  0xff   :  { %718 = vst.msk [vmem:[%s1775_s6 + $0x48] sm:$0xf] %vm699_vm1, %v1019_v14  ;;  %v1049_v24 = vpack.c.bf16 %v509_v15, %v509_v15  ;;  %v1020_v25 = vpack.c.bf16 %v296_v16, %v296_v16  ;;  %v512_v26 = vadd.f32 %v1447_v35, %v511_v23 }
 0x100   :  { %879 = vst.msk [vmem:[%s1776_s7 + $0x48] sm:$0xf] %vm860_vm2, %v1051_v19  ;;  %v1052_v27 = vpack.c.bf16 %v520_v21, %v520_v21  ;;  %v1018_v28 = vpack.c.bf16 %v288_v22, %v288_v22 }
 0x101   :  { %716 = vst.msk [vmem:[%s1775_s6 + $0x40] sm:$0xf] %vm699_vm1, %v1017_v20  ;;  %719 = vst.msk [vmem:[%s1775_s6 + $0x4c] sm:$0xf] %vm699_vm1, %v1020_v25  ;;  %v1050_v29 = vpack.c.bf16 %v512_v26, %v512_v26 }
 0x102   :  { %877 = vst.msk [vmem:[%s1776_s7 + $0x40] sm:$0xf] %vm860_vm2, %v1049_v24  ;;  %880 = vst.msk [vmem:[%s1776_s7 + $0x4c] sm:$0xf] %vm860_vm2, %v1052_v27  ;;  %v1123_v30 = vpop.f32.mrb[20].mxu0 }
 0x103   :  { %717 = vst.msk [vmem:[%s1775_s6 + $0x44] sm:$0xf] %vm699_vm1, %v1018_v28  ;;  %v309_v31 = vadd.f32 %v1123_v30, %v1442_v34  ;;  %v1157_v32 = vpop.f32.mrb[20].mxu1  ;;  %v300_v33 = vpop.f32.mrb[21].mxu0 }
 0x104   :  { %878 = vst.msk [vmem:[%s1776_s7 + $0x44] sm:$0xf] %vm860_vm2, %v1050_v29  ;;  %v533_v36 = vadd.f32 %v1157_v32, %v1447_v35  ;;  %v301_v37 = vadd.f32 %v1442_v34, %v300_v33  ;;  %v524_v38 = vpop.f32.mrb[21].mxu1  ;;  %v1124_v39 = vpop.f32.mrb[22].mxu0 }
 0x105   :  { %v1023_v40 = vpack.c.bf16 %v309_v31, %v309_v31  ;;  %v525_v41 = vadd.f32 %v1447_v35, %v524_v38  ;;  %v312_v42 = vadd.f32 %v1124_v39, %v1442_v34  ;;  %v1158_v43 = vpop.f32.mrb[22].mxu1  ;;  %v303_v44 = vpop.f32.mrb[23].mxu0 }
 0x106   :  { %v1055_v45 = vpack.c.bf16 %v533_v36, %v533_v36  ;;  %v1021_v46 = vpack.c.bf16 %v301_v37, %v301_v37  ;;  %v536_v47 = vadd.f32 %v1158_v43, %v1447_v35  ;;  %v304_v48 = vadd.f32 %v1442_v34, %v303_v44  ;;  %v527_v49 = vpop.f32.mrb[23].mxu1 }
 0x107   :  { %722 = vst.msk [vmem:[%s1775_s6 + $0x58] sm:$0xf] %vm699_vm1, %v1023_v40  ;;  %v1053_v50 = vpack.c.bf16 %v525_v41, %v525_v41  ;;  %v1024_v51 = vpack.c.bf16 %v312_v42, %v312_v42  ;;  %v528_v52 = vadd.f32 %v1447_v35, %v527_v49 }
 0x108   :  { %883 = vst.msk [vmem:[%s1776_s7 + $0x58] sm:$0xf] %vm860_vm2, %v1055_v45  ;;  %v1056_v53 = vpack.c.bf16 %v536_v47, %v536_v47  ;;  %v1022_v54 = vpack.c.bf16 %v304_v48, %v304_v48 }
 0x109   :  { %720 = vst.msk [vmem:[%s1775_s6 + $0x50] sm:$0xf] %vm699_vm1, %v1021_v46  ;;  %723 = vst.msk [vmem:[%s1775_s6 + $0x5c] sm:$0xf] %vm699_vm1, %v1024_v51  ;;  %v1054_v55 = vpack.c.bf16 %v528_v52, %v528_v52 }
 0x10a   :  { %881 = vst.msk [vmem:[%s1776_s7 + $0x50] sm:$0xf] %vm860_vm2, %v1053_v50  ;;  %884 = vst.msk [vmem:[%s1776_s7 + $0x5c] sm:$0xf] %vm860_vm2, %v1056_v53  ;;  %v1127_v56 = vpop.f32.mrb[24].mxu0 }
 0x10b   :  { %721 = vst.msk [vmem:[%s1775_s6 + $0x54] sm:$0xf] %vm699_vm1, %v1022_v54  ;;  %v325_v57 = vadd.f32 %v1127_v56, %v1442_v34  ;;  %v1161_v58 = vpop.f32.mrb[24].mxu1  ;;  %v316_v59 = vpop.f32.mrb[25].mxu0 }
 0x10c   :  { %882 = vst.msk [vmem:[%s1776_s7 + $0x54] sm:$0xf] %vm860_vm2, %v1054_v55  ;;  %v549_v60 = vadd.f32 %v1161_v58, %v1447_v35  ;;  %v317_v61 = vadd.f32 %v1442_v34, %v316_v59  ;;  %v540_v62 = vpop.f32.mrb[25].mxu1  ;;  %v1128_v63 = vpop.f32.mrb[26].mxu0 }
 0x10d   :  { %v1027_v0 = vpack.c.bf16 %v325_v57, %v325_v57  ;;  %v541_v1 = vadd.f32 %v1447_v35, %v540_v62  ;;  %v328_v2 = vadd.f32 %v1128_v63, %v1442_v34  ;;  %v1162_v3 = vpop.f32.mrb[26].mxu1  ;;  %v319_v4 = vpop.f32.mrb[27].mxu0 }
 0x10e   :  { %v1059_v5 = vpack.c.bf16 %v549_v60, %v549_v60  ;;  %v1025_v6 = vpack.c.bf16 %v317_v61, %v317_v61  ;;  %v552_v7 = vadd.f32 %v1162_v3, %v1447_v35  ;;  %v320_v8 = vadd.f32 %v1442_v34, %v319_v4  ;;  %v543_v9 = vpop.f32.mrb[27].mxu1 }
 0x10f   :  { %726 = vst.msk [vmem:[%s1775_s6 + $0x68] sm:$0xf] %vm699_vm1, %v1027_v0  ;;  %v1057_v10 = vpack.c.bf16 %v541_v1, %v541_v1  ;;  %v1028_v11 = vpack.c.bf16 %v328_v2, %v328_v2  ;;  %v544_v12 = vadd.f32 %v1447_v35, %v543_v9 }
 0x110   :  { %887 = vst.msk [vmem:[%s1776_s7 + $0x68] sm:$0xf] %vm860_vm2, %v1059_v5  ;;  %v1060_v13 = vpack.c.bf16 %v552_v7, %v552_v7  ;;  %v1026_v14 = vpack.c.bf16 %v320_v8, %v320_v8 }
 0x111   :  { %724 = vst.msk [vmem:[%s1775_s6 + $0x60] sm:$0xf] %vm699_vm1, %v1025_v6  ;;  %727 = vst.msk [vmem:[%s1775_s6 + $0x6c] sm:$0xf] %vm699_vm1, %v1028_v11  ;;  %v1058_v15 = vpack.c.bf16 %v544_v12, %v544_v12 }
 0x112   :  { %885 = vst.msk [vmem:[%s1776_s7 + $0x60] sm:$0xf] %vm860_vm2, %v1057_v10  ;;  %888 = vst.msk [vmem:[%s1776_s7 + $0x6c] sm:$0xf] %vm860_vm2, %v1060_v13  ;;  %v1131_v16 = vpop.f32.mrb[28].mxu0 }
 0x113   :  { %725 = vst.msk [vmem:[%s1775_s6 + $0x64] sm:$0xf] %vm699_vm1, %v1026_v14  ;;  %v341_v17 = vadd.f32 %v1131_v16, %v1442_v34  ;;  %v1165_v18 = vpop.f32.mrb[28].mxu1  ;;  %v332_v19 = vpop.f32.mrb[29].mxu0 }
 0x114   :  { %886 = vst.msk [vmem:[%s1776_s7 + $0x64] sm:$0xf] %vm860_vm2, %v1058_v15  ;;  %v565_v20 = vadd.f32 %v1165_v18, %v1447_v35  ;;  %v333_v21 = vadd.f32 %v1442_v34, %v332_v19  ;;  %v556_v22 = vpop.f32.mrb[29].mxu1  ;;  %v1132_v23 = vpop.f32.mrb[30].mxu0 }
 0x115   :  { %v1031_v24 = vpack.c.bf16 %v341_v17, %v341_v17  ;;  %v557_v25 = vadd.f32 %v1447_v35, %v556_v22  ;;  %v344_v26 = vadd.f32 %v1132_v23, %v1442_v34  ;;  %v1166_v27 = vpop.f32.mrb[30].mxu1  ;;  %v335_v28 = vpop.f32.mrb[31].mxu0 }
 0x116   :  { %v1063_v29 = vpack.c.bf16 %v565_v20, %v565_v20  ;;  %v1029_v30 = vpack.c.bf16 %v333_v21, %v333_v21  ;;  %v568_v31 = vadd.f32 %v1166_v27, %v1447_v35  ;;  %v336_v32 = vadd.f32 %v1442_v34, %v335_v28  ;;  %v559_v33 = vpop.f32.mrb[31].mxu1 }
 0x117   :  { %730 = vst.msk [vmem:[%s1775_s6 + $0x78] sm:$0xf] %vm699_vm1, %v1031_v24  ;;  %v1061_v36 = vpack.c.bf16 %v557_v25, %v557_v25  ;;  %v1032_v37 = vpack.c.bf16 %v344_v26, %v344_v26  ;;  %v560_v38 = vadd.f32 %v1447_v35, %v559_v33 }
 0x118   :  { %891 = vst.msk [vmem:[%s1776_s7 + $0x78] sm:$0xf] %vm860_vm2, %v1063_v29  ;;  %v1064_v34 = vpack.c.bf16 %v568_v31, %v568_v31  ;;  %v1030_v39 = vpack.c.bf16 %v336_v32, %v336_v32 }
 0x119   :  { %728 = vst.msk [vmem:[%s1775_s6 + $0x70] sm:$0xf] %vm699_vm1, %v1029_v30  ;;  %731 = vst.msk [vmem:[%s1775_s6 + $0x7c] sm:$0xf] %vm699_vm1, %v1032_v37  ;;  %v1062_v35 = vpack.c.bf16 %v560_v38, %v560_v38 }
 0x11a   :  { %889 = vst.msk [vmem:[%s1776_s7 + $0x70] sm:$0xf] %vm860_vm2, %v1061_v36  ;;  %892 = vst.msk [vmem:[%s1776_s7 + $0x7c] sm:$0xf] %vm860_vm2, %v1064_v34 }
 0x11b   :  { %729 = vst.msk [vmem:[%s1775_s6 + $0x74] sm:$0xf] %vm699_vm1, %v1030_v39 }
 0x11c   :  { %890 = vst.msk [vmem:[%s1776_s7 + $0x74] sm:$0xf] %vm860_vm2, %v1062_v35 }

// kernel: criss_cross_attention.3
= control target key start
LH: loop header
LB: loop body
LE: loop exit
PB: predicated region body
PF: predicated region fallthrough
CT: control target
= control target key end

     0   :  { %s5033_s24 = smov 0   ;;  %s5035_s25 = smov 0   ;;  %s6242_s0 = inlined_call_operand.vmem [shape: bf16[2,16,8,2], index: 0, kind: input, shape index: {}]   ;;  %s6243_s1 = inlined_call_operand.vmem [shape: bf16[2,16,2,8], index: 1, kind: input, shape index: {}]   ;;  %s6244_s2 = inlined_call_operand.vmem [shape: bf16[2,16,8,16], index: 2, kind: input, shape index: {}]   ;;  %s6245_s3 = inlined_call_operand.vmem [shape: bf16[2,8,16,2], index: 3, kind: input, shape index: {}]   ;;  %s6246_s4 = inlined_call_operand.vmem [shape: bf16[2,8,2,16], index: 4, kind: input, shape index: {}]   ;;  %s6247_s5 = inlined_call_operand.vmem [shape: bf16[2,8,16,16], index: 5, kind: input, shape index: {}]   ;;  %s6248_s6 = inlined_call_operand.vmem [shape: f32[2,16,8,16], index: 6, kind: output, shape index: {0}]   ;;  %s6249_s7 = inlined_call_operand.vmem [shape: f32[2,8,16,16], index: 7, kind: output, shape index: {1}]  }
   0x1   :  { %s5037_s26 = smov 0  }
   0x2 LB: > { %s30_s27 = sadd.s32 1, %s4985_s25  ;;  %p4388_p0 = scmp.ge.s32.totalorder %s4989_s26, 1  ;;  %s4989_s26 = sphi %s5037_s26, %s18_s26   ;;  %s4985_s25 = sphi %s5035_s25, %s6282_s25   ;;  %s4981_s24 = sphi %s5033_s24, %s6281_s24  }
   0x3   : > { %p32_p1 = scmp.ge.s32.totalorder %s30_s27, 2  ;;  %p332_p2 = scmp.lt.s32.totalorder %s4989_s26, 3 }
   0x5   : > { %s6284_s27 = smov (%p32_p1, %s30_s27), 0  ;;  %p333_p3 = pnand %p4388_p0, %p332_p2 }
   0x7   : > { %336 = sbr.rel (%p333_p3) target bundleno = 1507 (0x5e3), region = 44 }
   0xe   : > { %p417_p4 = scmp.lt.s32.totalorder %s4981_s24, 1  ;;  %v6250_v0 = vmov 0.0   ;;  %vm4992_vm0 = vmmov 0   ;;  %vm582_vm1 = vcmask 1040384   ;;  %vm578_vm2 = vcmask 15360  }
   0xf   : > { %4571 = vmatprep.subr.bf16.mxu0 %v6250_v0  ;;  %4577 = vmatprep.subr.bf16.mxu1 %v6250_v0  ;;  %vm1733_vm4 = vcmask 64512   ;;  %vm1782_vm5 = vcmask 130048   ;;  %vm1911_vm6 = vcmask 1041409   ;;  %vm1913_vm7 = vcmask 1042434  }
  0x10   : > { %s6286_s24 = smov (!%p417_p4, %s4981_s24), 1  ;;  %4573 = vmatprep.mubr.msk.bf16.mxu0 %vm4992_vm0, %v6250_v0  ;;  %4579 = vmatprep.mubr.msk.bf16.mxu1 %vm4992_vm0, %v6250_v0  ;;  %vm1915_vm8 = vcmask 1043459   ;;  %vm1917_vm9 = vcmask 1044484   ;;  %vm1919_vm10 = vcmask 1045509   ;;  %vm1921_vm11 = vcmask 1046534  }
  0x11   : > { %s5060_s28 = sshll.u32 %s6286_s24, 6  ;;  %s4396_s9 = sshll.u32 %s6286_s24, 3  ;;  %vm1923_vm12 = vcmask 1047559   ;;  %vm1991_vm13 = vcmask 130112   ;;  %vm2734_vm14 = vcmask 1043456  }
  0x12   : > { %s5066_s8 = scalar_lea.vmem %s6245_s3, %s5060_s28  ;;  %s5072_s12 = scalar_lea.vmem %s6246_s4, %s4396_s9 }
  0x13   : > { %v549_v1 = vld [vmem:[%s5072_s12] sm:$0x1]  ;;  %v550_v2 = vld [vmem:[%s5072_s12 + $0x1] sm:$0x1]  ;;  %v551_v3 = vld [vmem:[%s5072_s12 + $0x2] sm:$0x1]  ;;  %s5128_s19 = scalar_lea.vmem %s6247_s5, %s5060_s28  ;;  %s5146_s22 = scalar_lea.vmem %s6242_s0, %s5060_s28 }
  0x14   : > { %v584_v4 = vsel %vm582_vm1, %v549_v1, 0  ;;  %v636_v5 = vsel %vm582_vm1, %v550_v2, 0  ;;  %v4885_v6 = vld [vmem:[%s5066_s8] sm:$0xff]   ;;  %v4886_v7 = vld [vmem:[%s5066_s8 + $0x8] sm:$0xff]   ;;  %v688_v9 = vsel %vm582_vm1, %v551_v3, 0  ;;  %v4887_v13 = vld [vmem:[%s5066_s8 + $0x10] sm:$0xff]   ;;  %s5495_s30 = scalar_lea.vmem %s6244_s2, %s5060_s28 }
  0x15   : > { %v552_v8 = vld [vmem:[%s5072_s12 + $0x3] sm:$0x1]  ;;  %4572 = vmatpush3.bf16.msra.mxu0 %v584_v4  ;;  %4578 = vmatpush3.bf16.msra.mxu1 %v636_v5  ;;  %v553_v11 = vld [vmem:[%s5072_s12 + $0x4] sm:$0x1]  ;;  %v554_v12 = vld [vmem:[%s5072_s12 + $0x5] sm:$0x1] }
  0x16   : > { %4583 = vmatprep.subr.bf16.mxu0 %v6250_v0  ;;  %4589 = vmatprep.subr.bf16.mxu1 %v6250_v0  ;;  %v740_v10 = vsel %vm582_vm1, %v552_v8, 0  ;;  %v4888_v14 = vld [vmem:[%s5066_s8 + $0x18] sm:$0xff]   ;;  %v792_v15 = vsel %vm582_vm1, %v553_v11, 0  ;;  %v844_v16 = vsel %vm582_vm1, %v554_v12, 0  ;;  %s4391_s13 = sshll.u32 %s6286_s24, 4  ;;  %v4889_v19 = vld [vmem:[%s5066_s8 + $0x20] sm:$0xff]  }
  0x17   : > { %v555_v17 = vld [vmem:[%s5072_s12 + $0x6] sm:$0x1]  ;;  %v556_v18 = vld [vmem:[%s5072_s12 + $0x7] sm:$0x1]  ;;  %s5114_s16 = scalar_lea.vmem %s6243_s1, %s4391_s13  ;;  %v4890_v20 = vld [vmem:[%s5066_s8 + $0x28] sm:$0xff]   ;;  %s4473_s28 = sshll.u32 %s6286_s24, 7 }
  0x18   : > { %4574 = vmatmul.mubr.msk.bf16.vlgmr.msra.gmra.mrb[0].mxu0 %vm578_vm2, %v4885_v6  ;;  %4580 = vmatmul.mubr.msk.bf16.vlgmr.msra.gmra.mrb[0].mxu1 %vm578_vm2, %v4886_v7  ;;  %v896_v21 = vsel %vm582_vm1, %v555_v17, 0  ;;  %v948_v22 = vsel %vm582_vm1, %v556_v18, 0  ;;  %v501_v23 = vld [vmem:[%s5114_s16] sm:$0x1]  ;;  %v502_v24 = vld [vmem:[%s5114_s16 + $0x1] sm:$0x1]  ;;  %s6110_s10 = scalar_lea.vmem %s6249_s7, %s4473_s28  ;;  %s6177_s13 = scalar_lea.vmem %s6248_s6, %s4473_s28 }
  0x19   : > { %4584 = vmatpush3.bf16.msra.mxu0 %v688_v9  ;;  %4590 = vmatpush3.bf16.msra.mxu1 %v740_v10  ;;  %v4891_v25 = vld [vmem:[%s5066_s8 + $0x30] sm:$0xff]   ;;  %v4892_v26 = vld [vmem:[%s5066_s8 + $0x38] sm:$0xff]   ;;  %v1001_v27 = vsel %vm582_vm1, %v501_v23, 0  ;;  %v1047_v28 = vsel %vm582_vm1, %v502_v24, 0  ;;  %v503_v29 = vld [vmem:[%s5114_s16 + $0x2] sm:$0x1] }
  0x1a   : > { %4585 = vmatprep.mubr.msk.bf16.mxu0 %vm4992_vm0, %v6250_v0  ;;  %4591 = vmatprep.mubr.msk.bf16.mxu1 %vm4992_vm0, %v6250_v0  ;;  %v504_v30 = vld [vmem:[%s5114_s16 + $0x3] sm:$0x1]  ;;  %v486_v32 = vld [vmem:[%s5146_s22 + $0x4] sm:$0xf]  ;;  %v1093_v33 = vsel %vm582_vm1, %v503_v29, 0 }
  0x1b   : > { %4595 = vmatprep.subr.bf16.mxu0 %v6250_v0  ;;  %4601 = vmatprep.subr.bf16.mxu1 %v6250_v0  ;;  %v485_v31 = vld [vmem:[%s5146_s22] sm:$0xf]  ;;  %v1139_v34 = vsel %vm582_vm1, %v504_v30, 0  ;;  %v505_v35 = vld [vmem:[%s5114_s16 + $0x4] sm:$0x1] }
  0x1c   : > { %v506_v36 = vld [vmem:[%s5114_s16 + $0x5] sm:$0x1]  ;;  %v487_v37 = vld [vmem:[%s5146_s22 + $0x8] sm:$0xf]  ;;  %v488_v38 = vld [vmem:[%s5146_s22 + $0xc] sm:$0xf] }
  0x1d   : > { %v1185_v39 = vsel %vm582_vm1, %v505_v35, 0  ;;  %v1231_v40 = vsel %vm582_vm1, %v506_v36, 0  ;;  %v507_v41 = vld [vmem:[%s5114_s16 + $0x6] sm:$0x1]  ;;  %v508_v42 = vld [vmem:[%s5114_s16 + $0x7] sm:$0x1] }
  0x1e   : > { %v489_v43 = vld [vmem:[%s5146_s22 + $0x10] sm:$0xf]  ;;  %v490_v44 = vld [vmem:[%s5146_s22 + $0x14] sm:$0xf]  ;;  %v1277_v45 = vsel %vm582_vm1, %v507_v41, 0  ;;  %v1323_v46 = vsel %vm582_vm1, %v508_v42, 0 }
  0x1f   : > { %v509_v47 = vld [vmem:[%s5114_s16 + $0x8] sm:$0x1]  ;;  %v510_v48 = vld [vmem:[%s5114_s16 + $0x9] sm:$0x1]  ;;  %v491_v49 = vld [vmem:[%s5146_s22 + $0x18] sm:$0xf] }
  0x20   : > { %4586 = vmatmul.mubr.msk.bf16.vlgmr.msra.gmra.mrb[4].mxu0 %vm578_vm2, %v4887_v13  ;;  %4592 = vmatmul.mubr.msk.bf16.vlgmr.msra.gmra.mrb[4].mxu1 %vm578_vm2, %v4888_v14  ;;  %v492_v50 = vld [vmem:[%s5146_s22 + $0x1c] sm:$0xf]  ;;  %v1369_v51 = vsel %vm582_vm1, %v509_v47, 0  ;;  %v1415_v52 = vsel %vm582_vm1, %v510_v48, 0  ;;  %v511_v53 = vld [vmem:[%s5114_s16 + $0xa] sm:$0x1] }
  0x21   : > { %4596 = vmatpush3.bf16.msra.mxu0 %v792_v15  ;;  %4602 = vmatpush3.bf16.msra.mxu1 %v844_v16  ;;  %v512_v54 = vld [vmem:[%s5114_s16 + $0xb] sm:$0x1]  ;;  %v493_v55 = vld [vmem:[%s5146_s22 + $0x20] sm:$0xf]  ;;  %v494_v56 = vld [vmem:[%s5146_s22 + $0x24] sm:$0xf] }
  0x22   : > { %4597 = vmatprep.mubr.msk.bf16.mxu0 %vm4992_vm0, %v6250_v0  ;;  %4603 = vmatprep.mubr.msk.bf16.mxu1 %vm4992_vm0, %v6250_v0  ;;  %v1461_v57 = vsel %vm582_vm1, %v511_v53, 0  ;;  %v1507_v58 = vsel %vm582_vm1, %v512_v54, 0  ;;  %v513_v59 = vld [vmem:[%s5114_s16 + $0xc] sm:$0x1]  ;;  %v514_v60 = vld [vmem:[%s5114_s16 + $0xd] sm:$0x1] }
  0x23   : > { %4607 = vmatprep.subr.bf16.mxu0 %v6250_v0  ;;  %4613 = vmatprep.subr.bf16.mxu1 %v6250_v0  ;;  %v495_v61 = vld [vmem:[%s5146_s22 + $0x28] sm:$0xf]  ;;  %v496_v62 = vld [vmem:[%s5146_s22 + $0x2c] sm:$0xf]  ;;  %v1553_v63 = vsel %vm582_vm1, %v513_v59, 0  ;;  %v1599_v1 = vsel %vm582_vm1, %v514_v60, 0 }
  0x24   : > { %v515_v2 = vld [vmem:[%s5114_s16 + $0xe] sm:$0x1]  ;;  %v516_v3 = vld [vmem:[%s5114_s16 + $0xf] sm:$0x1]  ;;  %v497_v4 = vld [vmem:[%s5146_s22 + $0x30] sm:$0xf] }
  0x25   : > { %v498_v5 = vld [vmem:[%s5146_s22 + $0x34] sm:$0xf]  ;;  %v1645_v6 = vsel %vm582_vm1, %v515_v2, 0  ;;  %v1691_v7 = vsel %vm582_vm1, %v516_v3, 0  ;;  %v499_v8 = vld [vmem:[%s5146_s22 + $0x38] sm:$0xf] }
  0x26   : > { %v500_v9 = vld [vmem:[%s5146_s22 + $0x3c] sm:$0xf] }
  0x28   : > { %4598 = vmatmul.mubr.msk.bf16.vlgmr.msra.gmra.mrb[8].mxu0 %vm578_vm2, %v4889_v19  ;;  %4604 = vmatmul.mubr.msk.bf16.vlgmr.msra.gmra.mrb[8].mxu1 %vm578_vm2, %v4890_v20 }
  0x29   : > { %4608 = vmatpush3.bf16.msra.mxu0 %v896_v21  ;;  %4614 = vmatpush3.bf16.msra.mxu1 %v948_v22 }
  0x2a   : > { %4609 = vmatprep.mubr.msk.bf16.mxu0 %vm4992_vm0, %v6250_v0  ;;  %4615 = vmatprep.mubr.msk.bf16.mxu1 %vm4992_vm0, %v6250_v0 }
  0x2b   : > { %4619 = vmatprep.subr.bf16.mxu0 %v6250_v0  ;;  %4625 = vmatprep.subr.bf16.mxu1 %v6250_v0 }
  0x30   : > { %4610 = vmatmul.mubr.msk.bf16.vlgmr.msra.gmra.mrb[12].mxu0 %vm578_vm2, %v4891_v25  ;;  %4616 = vmatmul.mubr.msk.bf16.vlgmr.msra.gmra.mrb[12].mxu1 %vm578_vm2, %v4892_v26 }
  0x31   : > { %4620 = vmatpush3.bf16.msra.mxu0 %v1001_v27  ;;  %4626 = vmatpush3.bf16.msra.mxu1 %v1047_v28 }
  0x32   : > { %4621 = vmatprep.mubr.msk.bf16.mxu0 %vm4992_vm0, %v6250_v0  ;;  %4627 = vmatprep.mubr.msk.bf16.mxu1 %vm4992_vm0, %v6250_v0 }
  0x33   : > { %4631 = vmatprep.subr.bf16.mxu0 %v6250_v0  ;;  %4637 = vmatprep.subr.bf16.mxu1 %v6250_v0 }
  0x38   : > { %4622 = vmatmul.mubr.msk.bf16.vlgmr.msra.gmra.mrb[16].mxu0 %vm578_vm2, %v485_v31  ;;  %4628 = vmatmul.mubr.msk.bf16.vlgmr.msra.gmra.mrb[16].mxu1 %vm578_vm2, %v486_v32 }
  0x39   : > { %4632 = vmatpush3.bf16.msra.mxu0 %v1093_v33  ;;  %4638 = vmatpush3.bf16.msra.mxu1 %v1139_v34  ;;  %v991_v34 = vlaneseq }
  0x3a   : > { %4633 = vmatprep.mubr.msk.bf16.mxu0 %vm4992_vm0, %v6250_v0  ;;  %4639 = vmatprep.mubr.msk.bf16.mxu1 %vm4992_vm0, %v6250_v0 }
  0x3b   : > { %4643 = vmatprep.subr.bf16.mxu0 %v6250_v0  ;;  %4649 = vmatprep.subr.bf16.mxu1 %v6250_v0  ;;  %v5284_v35 = vshrl.u32 %v991_v34, 7  ;;  %v5286_v36 = vand.u32 127, %v991_v34 }
  0x3d   : > { %vm995_vm3 = vcmp.eq.s32.totalorder %v5284_v35, %v5286_v36 }
  0x40   : > { %4634 = vmatmul.mubr.msk.bf16.vlgmr.msra.gmra.mrb[20].mxu0 %vm578_vm2, %v487_v37  ;;  %4640 = vmatmul.mubr.msk.bf16.vlgmr.msra.gmra.mrb[20].mxu1 %vm578_vm2, %v488_v38 }
  0x41   : > { %4644 = vmatpush3.bf16.msra.mxu0 %v1185_v39  ;;  %4650 = vmatpush3.bf16.msra.mxu1 %v1231_v40 }
  0x42   : > { %4645 = vmatprep.mubr.msk.bf16.mxu0 %vm4992_vm0, %v6250_v0  ;;  %4651 = vmatprep.mubr.msk.bf16.mxu1 %vm4992_vm0, %v6250_v0 }
  0x43   : > { %4655 = vmatprep.subr.bf16.mxu0 %v6250_v0  ;;  %4661 = vmatprep.subr.bf16.mxu1 %v6250_v0 }
  0x48   : > { %4646 = vmatmul.mubr.msk.bf16.vlgmr.msra.gmra.mrb[24].mxu0 %vm578_vm2, %v489_v43  ;;  %4652 = vmatmul.mubr.msk.bf16.vlgmr.msra.gmra.mrb[24].mxu1 %vm578_vm2, %v490_v44 }
  0x49   : > { %4656 = vmatpush3.bf16.msra.mxu0 %v1277_v45  ;;  %4662 = vmatpush3.bf16.msra.mxu1 %v1323_v46  ;;  %v5299_v45 = vsel %vm995_vm3, -1e+30, %v6250_v0 }
  0x4a   : > { %4657 = vmatprep.mubr.msk.bf16.mxu0 %vm4992_vm0, %v6250_v0  ;;  %4663 = vmatprep.mubr.msk.bf16.mxu1 %vm4992_vm0, %v6250_v0 }
  0x4b   : > { %4667 = vmatprep.subr.bf16.mxu0 %v6250_v0  ;;  %4673 = vmatprep.subr.bf16.mxu1 %v6250_v0 }
  0x50   : > { %4658 = vmatmul.mubr.msk.bf16.vlgmr.msra.gmra.mrb[28].mxu0 %vm578_vm2, %v491_v49  ;;  %4664 = vmatmul.mubr.msk.bf16.vlgmr.msra.gmra.mrb[28].mxu1 %vm578_vm2, %v492_v50 }
  0x51   : > { %4668 = vmatpush3.bf16.msra.mxu0 %v1369_v51  ;;  %4674 = vmatpush3.bf16.msra.mxu1 %v1415_v52 }
  0x52   : > { %4669 = vmatprep.mubr.msk.bf16.mxu0 %vm4992_vm0, %v6250_v0  ;;  %4675 = vmatprep.mubr.msk.bf16.mxu1 %vm4992_vm0, %v6250_v0 }
  0x53   : > { %4679 = vmatprep.subr.bf16.mxu0 %v6250_v0  ;;  %4685 = vmatprep.subr.bf16.mxu1 %v6250_v0 }
  0x58   : > { %4670 = vmatmul.mubr.msk.bf16.vlgmr.msra.gmra.mrb[32].mxu0 %vm578_vm2, %v493_v55  ;;  %4676 = vmatmul.mubr.msk.bf16.vlgmr.msra.gmra.mrb[32].mxu1 %vm578_vm2, %v494_v56 }
  0x59   : > { %4680 = vmatpush3.bf16.msra.mxu0 %v1461_v57  ;;  %4686 = vmatpush3.bf16.msra.mxu1 %v1507_v58 }
  0x5a   : > { %4681 = vmatprep.mubr.msk.bf16.mxu0 %vm4992_vm0, %v6250_v0  ;;  %4687 = vmatprep.mubr.msk.bf16.mxu1 %vm4992_vm0, %v6250_v0 }
  0x5b   : > { %4691 = vmatprep.subr.bf16.mxu0 %v6250_v0  ;;  %4697 = vmatprep.subr.bf16.mxu1 %v6250_v0 }
  0x60   : > { %4682 = vmatmul.mubr.msk.bf16.vlgmr.msra.gmra.mrb[36].mxu0 %vm578_vm2, %v495_v61  ;;  %4688 = vmatmul.mubr.msk.bf16.vlgmr.msra.gmra.mrb[36].mxu1 %vm578_vm2, %v496_v62 }
  0x61   : > { %4692 = vmatpush3.bf16.msra.mxu0 %v1553_v63  ;;  %4698 = vmatpush3.bf16.msra.mxu1 %v1599_v1 }
  0x62   : > { %4693 = vmatprep.mubr.msk.bf16.mxu0 %vm4992_vm0, %v6250_v0  ;;  %4699 = vmatprep.mubr.msk.bf16.mxu1 %vm4992_vm0, %v6250_v0 }
  0x63   : > { %4703 = vmatprep.subr.bf16.mxu0 %v6250_v0  ;;  %4709 = vmatprep.subr.bf16.mxu1 %v6250_v0 }
  0x68   : > { %4694 = vmatmul.mubr.msk.bf16.vlgmr.msra.gmra.mrb[40].mxu0 %vm578_vm2, %v497_v4  ;;  %4700 = vmatmul.mubr.msk.bf16.vlgmr.msra.gmra.mrb[40].mxu1 %vm578_vm2, %v498_v5 }
  0x69   : > { %4704 = vmatpush3.bf16.msra.mxu0 %v1645_v6  ;;  %4710 = vmatpush3.bf16.msra.mxu1 %v1691_v7 }
  0x6a   : > { %4705 = vmatprep.mubr.msk.bf16.mxu0 %vm4992_vm0, %v6250_v0  ;;  %4711 = vmatprep.mubr.msk.bf16.mxu1 %vm4992_vm0, %v6250_v0 }
  0x6b   : > { %4715 = vmatprep.subr.bf16.mxu0 %v6250_v0  ;;  %4721 = vmatprep.subr.bf16.mxu1 %v6250_v0 }
  0x70   : > { %4706 = vmatmul.mubr.msk.bf16.vlgmr.msra.gmra.mrb[44].mxu0 %vm578_vm2, %v499_v8  ;;  %4712 = vmatmul.mubr.msk.bf16.vlgmr.msra.gmra.mrb[44].mxu1 %vm578_vm2, %v500_v9 }
  0x71   : > { %4717 = vmatprep.mubr.msk.bf16.mxu0 %vm4992_vm0, %v6250_v0  ;;  %4723 = vmatprep.mubr.msk.bf16.mxu1 %vm4992_vm0, %v6250_v0 }
  0xeb   : > { %v5260_v10 = vpop.f32.mrb[0].mxu0  ;;  %v5262_v11 = vpop.f32.mrb[0].mxu1 }
  0xec   : > { %v4575_v12 = vpop.f32.mrb[1].mxu0  ;;  %v4581_v13 = vpop.f32.mrb[1].mxu1 }
  0xed   : > { %v5264_v14 = vpop.f32.mrb[2].mxu0  ;;  %v5266_v15 = vpop.f32.mrb[2].mxu1 }
  0xee   : > { %v4576_v16 = vpop.f32.mrb[3].mxu0  ;;  %v4582_v17 = vpop.f32.mrb[3].mxu1 }
  0xf3   : > { %v5268_v18 = vpop.f32.mrb[4].mxu0  ;;  %v5270_v19 = vpop.f32.mrb[4].mxu1 }
  0xf4   : > { %v4587_v20 = vpop.f32.mrb[5].mxu0  ;;  %v4593_v21 = vpop.f32.mrb[5].mxu1 }
  0xf5   : > { %v5272_v22 = vpop.f32.mrb[6].mxu0  ;;  %v5274_v23 = vpop.f32.mrb[6].mxu1 }
  0xf6   : > { %v4588_v24 = vpop.f32.mrb[7].mxu0  ;;  %v4594_v25 = vpop.f32.mrb[7].mxu1 }
  0xfb   : > { %v5276_v26 = vpop.f32.mrb[8].mxu0  ;;  %v5278_v27 = vpop.f32.mrb[8].mxu1 }
  0xfc   : > { %v4599_v28 = vpop.f32.mrb[9].mxu0  ;;  %v4605_v29 = vpop.f32.mrb[9].mxu1 }
  0xfd   : > { %v5280_v30 = vpop.f32.mrb[10].mxu0  ;;  %v5282_v31 = vpop.f32.mrb[10].mxu1 }
  0xfe   : > { %v4600_v32 = vpop.f32.mrb[11].mxu0  ;;  %v4606_v33 = vpop.f32.mrb[11].mxu1 }
 0x103   : > { %v5288_v37 = vpop.f32.mrb[12].mxu0  ;;  %v5290_v38 = vpop.f32.mrb[12].mxu1 }
 0x104   : > { %v4611_v39 = vpop.f32.mrb[13].mxu0  ;;  %v4617_v40 = vpop.f32.mrb[13].mxu1 }
 0x105   : > { %v5292_v41 = vpop.f32.mrb[14].mxu0  ;;  %v5294_v42 = vpop.f32.mrb[14].mxu1 }
 0x106   : > { %v4612_v43 = vpop.f32.mrb[15].mxu0  ;;  %v4618_v44 = vpop.f32.mrb[15].mxu1 }
 0x10b   : > { %v1037_v46 = vpop.f32.mrb[16].mxu0  ;;  %v1083_v47 = vpop.f32.mrb[16].mxu1 }
 0x10c   : > { %v5302_v48 = vadd.f32 %v1037_v46, %v5299_v45  ;;  %v4623_v49 = vpop.f32.mrb[17].mxu0  ;;  %v4629_v50 = vpop.f32.mrb[17].mxu1  ;;  %v5305_v53 = vadd.f32 %v1083_v47, %v5299_v45 }
 0x10d   : > { %v1040_v51 = vpop.f32.mrb[18].mxu0  ;;  %v1086_v52 = vpop.f32.mrb[18].mxu1 }
 0x10e   : > { %v4624_v54 = vpop.f32.mrb[19].mxu0  ;;  %v4630_v55 = vpop.f32.mrb[19].mxu1  ;;  %v1734_v56 = vsel %vm1733_vm4, %v5302_v48, -inf  ;;  %v1737_v57 = vsel %vm1733_vm4, %v5305_v53, -inf }
 0x10f   : > { %1735 = vmax.xlane.f32.xlu0 %v1734_v56 }
 0x113   : > { %v1175_v58 = vpop.f32.mrb[20].mxu1  ;;  %1738 = vmax.xlane.f32.xlu0 %v1737_v57  ;;  %v1129_v59 = vpop.f32.mrb[20].mxu0 }
 0x114   : > { %v5312_v60 = vadd.f32 %v1129_v59, %v5299_v45  ;;  %v4635_v61 = vpop.f32.mrb[21].mxu0  ;;  %v4641_v62 = vpop.f32.mrb[21].mxu1  ;;  %v5315_v2 = vadd.f32 %v1175_v58, %v5299_v45 }
 0x115   : > { %v1132_v63 = vpop.f32.mrb[22].mxu0  ;;  %v1178_v1 = vpop.f32.mrb[22].mxu1 }
 0x116   : > { %v4636_v3 = vpop.f32.mrb[23].mxu0  ;;  %v4642_v4 = vpop.f32.mrb[23].mxu1  ;;  %v1740_v5 = vsel %vm1733_vm4, %v5312_v60, -inf  ;;  %v1743_v6 = vsel %vm1733_vm4, %v5315_v2, -inf }
 0x117   : > { %1741 = vmax.xlane.f32.xlu1 %v1740_v5 }
 0x11b   : > { %v1267_v7 = vpop.f32.mrb[24].mxu1  ;;  %1744 = vmax.xlane.f32.xlu1 %v1743_v6  ;;  %v1221_v8 = vpop.f32.mrb[24].mxu0 }
 0x11c   : > { %v5322_v9 = vadd.f32 %v1221_v8, %v5299_v45  ;;  %v4647_v12 = vpop.f32.mrb[25].mxu0  ;;  %v4653_v13 = vpop.f32.mrb[25].mxu1  ;;  %v5325_v20 = vadd.f32 %v1267_v7, %v5299_v45 }
 0x11d   : > { %v1224_v16 = vpop.f32.mrb[26].mxu0  ;;  %v1270_v17 = vpop.f32.mrb[26].mxu1 }
 0x11e   : > { %v4648_v21 = vpop.f32.mrb[27].mxu0  ;;  %v4654_v24 = vpop.f32.mrb[27].mxu1  ;;  %v1746_v25 = vsel %vm1733_vm4, %v5322_v9, -inf  ;;  %v1749_v28 = vsel %vm1733_vm4, %v5325_v20, -inf }
 0x11f   : > { %1747 = vmax.xlane.f32.xlu0 %v1746_v25 }
 0x123   : > { %v1359_v29 = vpop.f32.mrb[28].mxu1  ;;  %1750 = vmax.xlane.f32.xlu0 %v1749_v28  ;;  %v1313_v32 = vpop.f32.mrb[28].mxu0 }
 0x124   : > { %v5332_v33 = vadd.f32 %v1313_v32, %v5299_v45  ;;  %v4659_v34 = vpop.f32.mrb[29].mxu0  ;;  %v4665_v39 = vpop.f32.mrb[29].mxu1  ;;  %v5335_v44 = vadd.f32 %v1359_v29, %v5299_v45 }
 0x125   : > { %v1316_v40 = vpop.f32.mrb[30].mxu0  ;;  %v1362_v43 = vpop.f32.mrb[30].mxu1 }
 0x126   : > { %v4660_v46 = vpop.f32.mrb[31].mxu0  ;;  %v4666_v47 = vpop.f32.mrb[31].mxu1  ;;  %v1752_v49 = vsel %vm1733_vm4, %v5332_v33, -inf  ;;  %v1755_v50 = vsel %vm1733_vm4, %v5335_v44, -inf }
 0x127   : > { %1753 = vmax.xlane.f32.xlu0 %v1752_v49 }
 0x12b   : > { %v1451_v51 = vpop.f32.mrb[32].mxu1  ;;  %1756 = vmax.xlane.f32.xlu0 %v1755_v50  ;;  %v1405_v52 = vpop.f32.mrb[32].mxu0 }
 0x12c   : > { %v5342_v54 = vadd.f32 %v1451_v51, %v5299_v45  ;;  %v5345_v55 = vadd.f32 %v1405_v52, %v5299_v45  ;;  %v4671_v56 = vpop.f32.mrb[33].mxu0  ;;  %v4677_v57 = vpop.f32.mrb[33].mxu1 }
 0x12d   : > { %v1408_v58 = vpop.f32.mrb[34].mxu0  ;;  %v1454_v59 = vpop.f32.mrb[34].mxu1 }
 0x12e   : > { %v4672_v61 = vpop.f32.mrb[35].mxu0  ;;  %v4678_v62 = vpop.f32.mrb[35].mxu1  ;;  %v1761_v63 = vsel %vm1733_vm4, %v5342_v54, -inf  ;;  %v1758_v1 = vsel %vm1733_vm4, %v5345_v55, -inf }
 0x12f   : > { %1762 = vmax.xlane.f32.xlu1 %v1761_v63  ;;  %1759 = vmax.xlane.f32.xlu0 %v1758_v1 }
 0x133   : > { %v1497_v3 = vpop.f32.mrb[36].mxu0  ;;  %v1543_v4 = vpop.f32.mrb[36].mxu1 }
 0x134   : > { %v5352_v5 = vadd.f32 %v1497_v3, %v5299_v45  ;;  %v4683_v6 = vpop.f32.mrb[37].mxu0  ;;  %v4689_v7 = vpop.f32.mrb[37].mxu1  ;;  %v5355_v13 = vadd.f32 %v1543_v4, %v5299_v45 }
 0x135   : > { %v1500_v8 = vpop.f32.mrb[38].mxu0  ;;  %v1546_v12 = vpop.f32.mrb[38].mxu1  ;;  %v1786_v6 = vsel %vm1782_vm5, %v5264_v14, -inf  ;;  %v1792_v7 = vsel %vm1782_vm5, %v5266_v15, -inf }
 0x136   : > { %v4684_v16 = vpop.f32.mrb[39].mxu0  ;;  %v4690_v17 = vpop.f32.mrb[39].mxu1  ;;  %v1764_v21 = vsel %vm1733_vm4, %v5352_v5, -inf  ;;  %v1767_v24 = vsel %vm1733_vm4, %v5355_v13, -inf  ;;  %v1789_v8 = vsel %vm1782_vm5, %v5262_v11, -inf  ;;  %v1798_v12 = vsel %vm1782_vm5, %v5272_v22, -inf }
 0x137   : > { %1765 = vmax.xlane.f32.xlu1 %v1764_v21  ;;  %v1795_v16 = vsel %vm1782_vm5, %v5268_v18, -inf  ;;  %v1804_v17 = vsel %vm1782_vm5, %v5274_v23, -inf  ;;  %v1801_v21 = vsel %vm1782_vm5, %v5270_v19, -inf }
 0x13b   : > { %v1635_v25 = vpop.f32.mrb[40].mxu1  ;;  %1768 = vmax.xlane.f32.xlu1 %v1767_v24  ;;  %v1589_v28 = vpop.f32.mrb[40].mxu0  ;;  %v1810_v24 = vsel %vm1782_vm5, %v5280_v30, -inf }
 0x13c   : > { %v5362_v29 = vadd.f32 %v1589_v28, %v5299_v45  ;;  %v4695_v32 = vpop.f32.mrb[41].mxu0  ;;  %v4701_v34 = vpop.f32.mrb[41].mxu1  ;;  %v5365_v43 = vadd.f32 %v1635_v25, %v5299_v45  ;;  %v1807_v25 = vsel %vm1782_vm5, %v5276_v26, -inf  ;;  %v1816_v28 = vsel %vm1782_vm5, %v5282_v31, -inf }
 0x13d   : > { %v1592_v39 = vpop.f32.mrb[42].mxu0  ;;  %v1638_v40 = vpop.f32.mrb[42].mxu1  ;;  %v1813_v32 = vsel %vm1782_vm5, %v5278_v27, -inf  ;;  %v1822_v34 = vsel %vm1782_vm5, %v5292_v41, -inf }
 0x13e   : > { %v4696_v46 = vpop.f32.mrb[43].mxu0  ;;  %v4702_v47 = vpop.f32.mrb[43].mxu1  ;;  %v1770_v49 = vsel %vm1733_vm4, %v5362_v29, -inf  ;;  %v1773_v50 = vsel %vm1733_vm4, %v5365_v43, -inf  ;;  %v1819_v39 = vsel %vm1782_vm5, %v5288_v37, -inf  ;;  %v1828_v40 = vsel %vm1782_vm5, %v5294_v42, -inf }
 0x13f   : > { %1771 = vmax.xlane.f32.xlu1 %v1770_v49  ;;  %v1825_v46 = vsel %vm1782_vm5, %v5290_v38, -inf }
 0x143   : > { %v1727_v51 = vpop.f32.mrb[44].mxu1  ;;  %1774 = vmax.xlane.f32.xlu1 %v1773_v50  ;;  %v1681_v52 = vpop.f32.mrb[44].mxu0 }
 0x144   : > { %v5372_v56 = vadd.f32 %v1727_v51, %v5299_v45  ;;  %v5375_v57 = vadd.f32 %v1681_v52, %v5299_v45  ;;  %v4707_v58 = vpop.f32.mrb[45].mxu0  ;;  %v4713_v59 = vpop.f32.mrb[45].mxu1  ;;  %v1783_v45 = vsel %vm1782_vm5, %v5260_v10, -inf  ;;  %v5415_v52 = vsub.s32 %v5286_v36, %v5284_v35 }
 0x145   : > { %v1684_v61 = vpop.f32.mrb[46].mxu0  ;;  %v1730_v62 = vpop.f32.mrb[46].mxu1 }
 0x146   : > { %v4708_v63 = vpop.f32.mrb[47].mxu0  ;;  %v4714_v1 = vpop.f32.mrb[47].mxu1  ;;  %v1779_v3 = vsel %vm1733_vm4, %v5372_v56, -inf  ;;  %v1776_v4 = vsel %vm1733_vm4, %v5375_v57, -inf }
 0x147   : > { %1780 = vmax.xlane.f32.xlu1 %v1779_v3  ;;  %1777 = vmax.xlane.f32.xlu0 %v1776_v4 }
 0x14b   : > { %1787 = vmax.xlane.f32.xlu1 %v1786_v6  ;;  %1784 = vmax.xlane.f32.xlu0 %v1783_v45 }
 0x14f   : > { %1793 = vmax.xlane.f32.xlu1 %v1792_v7  ;;  %1790 = vmax.xlane.f32.xlu0 %v1789_v8 }
 0x153   : > { %1799 = vmax.xlane.f32.xlu1 %v1798_v12  ;;  %1796 = vmax.xlane.f32.xlu0 %v1795_v16 }
 0x157   : > { %1805 = vmax.xlane.f32.xlu1 %v1804_v17  ;;  %1802 = vmax.xlane.f32.xlu0 %v1801_v21 }
 0x15b   : > { %1811 = vmax.xlane.f32.xlu1 %v1810_v24  ;;  %1808 = vmax.xlane.f32.xlu0 %v1807_v25 }
 0x15f   : > { %1817 = vmax.xlane.f32.xlu1 %v1816_v28  ;;  %1814 = vmax.xlane.f32.xlu0 %v1813_v32 }
 0x163   : > { %1823 = vmax.xlane.f32.xlu1 %v1822_v34  ;;  %1820 = vmax.xlane.f32.xlu0 %v1819_v39 }
 0x167   : > { %1829 = vmax.xlane.f32.xlu1 %v1828_v40  ;;  %1826 = vmax.xlane.f32.xlu0 %v1825_v46 }
 0x19c   : > { %v1736_v47 = vpop.xlane.xlu0 %1735 }
 0x19d   : > { %v1850_v63 = vrot.slane %v1736_v47, %v5415_v52 }
 0x1a0   : > { %v1739_v49 = vpop.xlane.xlu0 %1738 }
 0x1a1   : > { %v1854_v61 = vrot.slane %v1739_v49, %v5415_v52 }
 0x1a3   : > { %v1912_v6 = vsel %vm1911_vm6, %v1854_v61, %v1850_v63 }
 0x1a4   : > { %v1742_v50 = vpop.xlane.xlu1 %1741 }
 0x1a5   : > { %v1858_v62 = vrot.slane %v1742_v50, %v5415_v52 }
 0x1a7   : > { %v1914_v7 = vsel %vm1913_vm7, %v1858_v62, %v1912_v6 }
 0x1a8   : > { %v1745_v58 = vpop.xlane.xlu1 %1744 }
 0x1a9   : > { %v1862_v1 = vrot.slane %v1745_v58, %v5415_v52 }
 0x1ab   : > { %v1916_v12 = vsel %vm1915_vm8, %v1862_v1, %v1914_v7 }
 0x1ac   : > { %v1748_v51 = vpop.xlane.xlu0 %1747 }
 0x1ad   : > { %v1866_v3 = vrot.slane %v1748_v51, %v5415_v52 }
 0x1af   : > { %v1918_v16 = vsel %vm1917_vm9, %v1866_v3, %v1916_v12 }
 0x1b0   : > { %v1751_v59 = vpop.xlane.xlu0 %1750 }
 0x1b1   : > { %v1870_v45 = vrot.slane %v1751_v59, %v5415_v52 }
 0x1b3   : > { %v1920_v24 = vsel %vm1919_vm10, %v1870_v45, %v1918_v16 }
 0x1b4   : > { %v1754_v4 = vpop.xlane.xlu0 %1753 }
 0x1b5   : > { %v1874_v8 = vrot.slane %v1754_v4, %v5415_v52 }
 0x1b7   : > { %v1922_v25 = vsel %vm1921_vm11, %v1874_v8, %v1920_v24 }
 0x1b8   : > { %v1757_v17 = vpop.xlane.xlu0 %1756 }
 0x1b9   : > { %v1878_v21 = vrot.slane %v1757_v17, %v5415_v52 }
 0x1bb   : > { %v1924_v28 = vsel %vm1923_vm12, %v1878_v21, %v1922_v25 }
 0x1bc   : > { %1934 = vxpose.xlu0.b32.start [1/2] (short) (narrow) %v1924_v28, 8  ;;  %v1763_v32 = vpop.xlane.xlu1 %1762  ;;  %v1760_v40 = vpop.xlane.xlu0 %1759 }
 0x1bd   : > { %v1886_v47 = vrot.slane %v1763_v32, %v5415_v52  ;;  %v1882_v49 = vrot.slane %v1760_v40, %v5415_v52 }
 0x1bf   : > { %v1925_v61 = vsel %vm1911_vm6, %v1886_v47, %v1882_v49 }
 0x1c4   : > { %v1766_v34 = vpop.xlane.xlu1 %1765 }
 0x1c5   : > { %v1890_v50 = vrot.slane %v1766_v34, %v5415_v52 }
 0x1c7   : > { %v1926_v63 = vsel %vm1913_vm7, %v1890_v50, %v1925_v61  ;;  %v1986_v50 = vadd.s32 4294967288, %v5286_v36 }
 0x1c8   : > { %v1769_v39 = vpop.xlane.xlu1 %1768 }
 0x1c9   : > { %v1894_v51 = vrot.slane %v1769_v39, %v5415_v52 }
 0x1cb   : > { %v1927_v1 = vsel %vm1915_vm8, %v1894_v51, %v1926_v63 }
 0x1cc   : > { %v1772_v46 = vpop.xlane.xlu1 %1771 }
 0x1cd   : > { %v1898_v59 = vrot.slane %v1772_v46, %v5415_v52 }
 0x1cf   : > { %v1928_v6 = vsel %vm1917_vm9, %v1898_v59, %v1927_v1  ;;  %v5449_v59 = vsub.s32 %v1986_v50, %v5284_v35 }
 0x1d0   : > { %v1775_v58 = vpop.xlane.xlu1 %1774 }
 0x1d1   : > { %v1902_v62 = vrot.slane %v1775_v58, %v5415_v52 }
 0x1d3   : > { %v1929_v8 = vsel %vm1919_vm10, %v1902_v62, %v1928_v6 }
 0x1d4   : > { %v1781_v3 = vpop.xlane.xlu1 %1780  ;;  %v1778_v4 = vpop.xlane.xlu0 %1777 }
 0x1d5   : > { %v1910_v45 = vrot.slane %v1781_v3, %v5415_v52  ;;  %v1906_v7 = vrot.slane %v1778_v4, %v5415_v52 }
 0x1d7   : > { %v1930_v12 = vsel %vm1921_vm11, %v1906_v7, %v1929_v8 }
 0x1d8   : > { %v1931_v16 = vsel %vm1923_vm12, %v1910_v45, %v1930_v12  ;;  %v1788_v17 = vpop.xlane.xlu1 %1787  ;;  %v1785_v21 = vpop.xlane.xlu0 %1784 }
 0x1d9   : > { %1935 = vxpose.xlu0.b32.end [2/2] (short) (narrow) %v1931_v16, 8  ;;  %v1990_v3 = vrot.slane %v1788_v17, %v5449_v59  ;;  %v1985_v4 = vrot.slane %v1785_v21, %v5415_v52 }
 0x1dc   : > { %v1794_v24 = vpop.xlane.xlu1 %1793  ;;  %v1791_v25 = vpop.xlane.xlu0 %1790 }
 0x1dd   : > { %v2000_v61 = vrot.slane %v1794_v24, %v5449_v59  ;;  %v1996_v62 = vrot.slane %v1791_v25, %v5415_v52 }
 0x1df   : > { %v2001_v16 = vsel %vm1991_vm13, %v2000_v61, %v1996_v62 }
 0x1e0   : > { %v1800_v28 = vpop.xlane.xlu1 %1799  ;;  %v1797_v32 = vpop.xlane.xlu0 %1796 }
 0x1e1   : > { %v2009_v63 = vrot.slane %v1800_v28, %v5449_v59  ;;  %v2005_v1 = vrot.slane %v1797_v32, %v5415_v52  ;;  %v1992_v32 = vsel %vm1991_vm13, %v1990_v3, %v1985_v4 }
 0x1e3   : > { %v2010_v17 = vsel %vm1991_vm13, %v2009_v63, %v2005_v1 }
 0x1e4   : > { %v1806_v34 = vpop.xlane.xlu1 %1805  ;;  %v1803_v39 = vpop.xlane.xlu0 %1802 }
 0x1e5   : > { %v2018_v6 = vrot.slane %v1806_v34, %v5449_v59  ;;  %v2014_v36 = vrot.slane %v1803_v39, %v5415_v52 }
 0x1e7   : > { %v2019_v34 = vsel %vm1991_vm13, %v2018_v6, %v2014_v36  ;;  %v5486_v36 = vsub.s32 1, %v5284_v35 }
 0x1e8   : > { %v1812_v40 = vpop.xlane.xlu1 %1811  ;;  %v1809_v46 = vpop.xlane.xlu0 %1808 }
 0x1e9   : > { %v2027_v45 = vrot.slane %v1812_v40, %v5449_v59  ;;  %v2023_v7 = vrot.slane %v1809_v46, %v5415_v52  ;;  %v2056_v46 = vsel %vm1911_vm6, %v2001_v16, %v1992_v32  ;;  %6266 = vst [vmem:[#allocation2_spill] sm:$0xff] %v5486_v36  ;;  %v5500_v16 = vsub.s32 2, %v5284_v35 }
 0x1eb   : > { %6267 = vst [vmem:[#allocation3_spill] sm:$0xff] %v5500_v16 }
 0x1ec   : > { %v1818_v47 = vpop.xlane.xlu1 %1817  ;;  %v1815_v49 = vpop.xlane.xlu0 %1814 }
 0x1ed   : > { %v2036_v24 = vrot.slane %v1818_v47, %v5449_v59  ;;  %v2032_v25 = vrot.slane %v1815_v49, %v5415_v52  ;;  %v2028_v47 = vsel %vm1991_vm13, %v2027_v45, %v2023_v7  ;;  %v2057_v49 = vsel %vm1913_vm7, %v2010_v17, %v2056_v46 }
 0x1ee   : > { %v5489_v45 = vsub.s32 0, %v5284_v35 }
 0x1ef   : > { %v2037_v50 = vsel %vm1991_vm13, %v2036_v24, %v2032_v25  ;;  %v5503_v24 = vsub.s32 4, %v5284_v35  ;;  %v517_v25 = vld [vmem:[%s5495_s30] sm:$0xf] }
 0x1f0   : > { %v1824_v51 = vpop.xlane.xlu1 %1823  ;;  %v1821_v58 = vpop.xlane.xlu0 %1820  ;;  %v2736_v17 = vsel %vm2734_vm14, %v517_v25, 0  ;;  %v522_v25 = vld [vmem:[%s5495_s30 + $0x14] sm:$0xf] }
 0x1f1   : > { %v2045_v21 = vrot.slane %v1824_v51, %v5449_v59  ;;  %v2041_v28 = vrot.slane %v1821_v58, %v5415_v52  ;;  %v2058_v51 = vsel %vm1915_vm8, %v2019_v34, %v2057_v49  ;;  %6268 = vst [vmem:[#allocation4_spill] sm:$0xff] %v5503_v24  ;;  %4716 = vmatpush3.bf16.msra.mxu0 %v2736_v17  ;;  %v5512_v34 = vsub.s32 3, %v5284_v35 }
 0x1f2   : > { %v2059_v62 = vsel %vm1917_vm9, %v2028_v47, %v2058_v51  ;;  %4727 = vmatprep.subr.bf16.mxu0 %v6250_v0 }
 0x1f3   : > { %v2046_v58 = vsel %vm1991_vm13, %v2045_v21, %v2041_v28  ;;  %v2060_v63 = vsel %vm1919_vm10, %v2037_v50, %v2059_v62  ;;  %v518_v21 = vld [vmem:[%s5495_s30 + $0x4] sm:$0xf]  ;;  %6269 = vst [vmem:[#allocation5_spill] sm:$0xff] %v5512_v34  ;;  %v5522_v50 = vsub.s32 5, %v5284_v35 }
 0x1f4   : > { %v1830_v8 = vpop.xlane.xlu1 %1829  ;;  %v1827_v12 = vpop.xlane.xlu0 %1826  ;;  %v2061_v1 = vsel %vm1921_vm11, %v2046_v58, %v2060_v63  ;;  %v519_v58 = vld [vmem:[%s5495_s30 + $0x8] sm:$0xf] }
 0x1f5   : > { %v2054_v39 = vrot.slane %v1830_v8, %v5449_v59  ;;  %v2050_v40 = vrot.slane %v1827_v12, %v5415_v52  ;;  %6271 = vst [vmem:[#allocation7_spill] sm:$0xff] %v5522_v50  ;;  %v5528_v62 = vsel %vm2734_vm14, %v519_v58, 0 }
 0x1f7   : > { %v2055_v61 = vsel %vm1991_vm13, %v2054_v39, %v2050_v40  ;;  %v5515_v39 = vsub.s32 6, %v5284_v35  ;;  %v2782_v40 = vsel %vm2734_vm14, %v518_v21, 0  ;;  %v5545_v21 = vsel %vm2734_vm14, %v522_v25, 0 }
 0x1f8   : > { %v2062_v3 = vsel %vm1923_vm12, %v2055_v61, %v2061_v1  ;;  %4722 = vmatpush3.bf16.msra.mxu1 %v2782_v40  ;;  %v520_v61 = vld [vmem:[%s5495_s30 + $0xc] sm:$0xf]  ;;  %v523_v40 = vld [vmem:[%s5495_s30 + $0x18] sm:$0xf] }
 0x1f9   : > { %6270 = vst [vmem:[#allocation6_spill] sm:$0xff] %v5515_v39  ;;  %4733 = vmatprep.subr.bf16.mxu1 %v6250_v0  ;;  %v5531_v63 = vsel %vm2734_vm14, %v520_v61, 0 }
 0x255   : > { %v1950_v4 = vpop.trf.xlu0 }
 0x256   : > { %v5482_v6 = vmax.f32 %v1950_v4, %v2062_v3  ;;  %v5535_v3 = vsub.s32 7, %v5284_v35 }
 0x258   : > { %2065 = vxpose.xlu1.b32.start.end [1/1] (short) (narrow) %v5482_v6, 16  ;;  %6272 = vst [vmem:[#allocation8_spill] sm:$0xff] %v5535_v3  ;;  %v2260_v61 = vrot.slane %v5482_v6, %v5489_v45 }
 0x2d8   : > { %v2081_v7 = vpop.trf.xlu1 }
 0x2d9   : > { %v2107_v8 = vrot.slane %v2081_v7, %v5486_v36  ;;  %v2100_v12 = vrot.slane %v2081_v7, %v5489_v45  ;;  %v2114_v28 = vrot.slane %v2081_v7, %v5500_v16  ;;  %v2128_v32 = vrot.slane %v2081_v7, %v5503_v24 }
 0x2da   : > { %v2121_v47 = vrot.slane %v2081_v7, %v5512_v34  ;;  %v2142_v49 = vrot.slane %v2081_v7, %v5515_v39  ;;  %v2135_v1 = vrot.slane %v2081_v7, %v5522_v50  ;;  %v2149_v4 = vrot.slane %v2081_v7, %v5535_v3 }
 0x2db   : > { %2109 = vbcast.lane.b32.xlu1 %v2107_v8, 256  ;;  %2102 = vbcast.lane.b32.xlu0 %v2100_v12, 256  ;;  %v521_v12 = vld [vmem:[%s5495_s30 + $0x10] sm:$0xf] }
 0x2dc   : > { %v2082_v46 = vpop.trf.xlu1  ;;  %v5542_v17 = vsel %vm2734_vm14, %v521_v12, 0  ;;  %v526_v12 = vld [vmem:[%s5495_s30 + $0x24] sm:$0xf] }
 0x2dd   : > { %v2156_v51 = vrot.slane %v2082_v46, %v5489_v45  ;;  %v2170_v8 = vrot.slane %v2082_v46, %v5500_v16  ;;  %v2184_v35 = vrot.slane %v2082_v46, %v5503_v24  ;;  %v2177_v7 = vrot.slane %v2082_v46, %v5512_v34 }
 0x2de   : > { %v2191_v58 = vrot.slane %v2082_v46, %v5522_v50 }
 0x2df   : > { %2116 = vbcast.lane.b32.xlu1 %v2114_v28, 256  ;;  %2130 = vbcast.lane.b32.xlu0 %v2128_v32, 256  ;;  %v2163_v28 = vrot.slane %v2082_v46, %v5486_v36  ;;  %v2198_v32 = vrot.slane %v2082_v46, %v5515_v39 }
 0x2e3   : > { %2123 = vbcast.lane.b32.xlu1 %v2121_v47, 256  ;;  %2144 = vbcast.lane.b32.xlu0 %v2142_v49, 256  ;;  %v524_v47 = vld [vmem:[%s5495_s30 + $0x1c] sm:$0xf]  ;;  %v5554_v49 = vsel %vm2734_vm14, %v523_v40, 0 }
 0x2e7   : > { %2137 = vbcast.lane.b32.xlu1 %v2135_v1, 256  ;;  %2158 = vbcast.lane.b32.xlu0 %v2156_v51, 256  ;;  %v5557_v51 = vsel %vm2734_vm14, %v524_v47, 0  ;;  %v2205_v1 = vrot.slane %v2082_v46, %v5535_v3  ;;  %v2293_v46 = vrot.slane %v5482_v6, %v5512_v34 }
 0x2eb   : > { %2151 = vbcast.lane.b32.xlu1 %v2149_v4, 256  ;;  %2172 = vbcast.lane.b32.xlu0 %v2170_v8, 256  ;;  %v2271_v4 = vrot.slane %v5482_v6, %v5486_v36  ;;  %v525_v8 = vld [vmem:[%s5495_s30 + $0x20] sm:$0xf] }
 0x2ec   : > { %v5568_v25 = vsel %vm2734_vm14, %v525_v8, 0  ;;  %v2326_v8 = vrot.slane %v5482_v6, %v5515_v39 }
 0x2ef   : > { %2165 = vbcast.lane.b32.xlu1 %v2163_v28, 256  ;;  %2186 = vbcast.lane.b32.xlu0 %v2184_v35, 256  ;;  %v5571_v28 = vsel %vm2734_vm14, %v526_v12, 0  ;;  %v2282_v35 = vrot.slane %v5482_v6, %v5500_v16 }
 0x2f3   : > { %2179 = vbcast.lane.b32.xlu1 %v2177_v7, 256  ;;  %2200 = vbcast.lane.b32.xlu0 %v2198_v32, 256  ;;  %v527_v7 = vld [vmem:[%s5495_s30 + $0x28] sm:$0xf]  ;;  %v528_v32 = vld [vmem:[%s5495_s30 + $0x2c] sm:$0xf] }
 0x2f4   : > { %v5580_v40 = vsel %vm2734_vm14, %v527_v7, 0  ;;  %v5583_v47 = vsel %vm2734_vm14, %v528_v32, 0  ;;  %v532_v32 = vld [vmem:[%s5495_s30 + $0x3c] sm:$0xf] }
 0x2f5   : > { %v5607_v39 = vsel %vm2734_vm14, %v532_v32, 0 }
 0x2f7   : > { %2193 = vbcast.lane.b32.xlu1 %v2191_v58, 256  ;;  %2262 = vbcast.lane.b32.xlu0 %v2260_v61, 256  ;;  %v2304_v58 = vrot.slane %v5482_v6, %v5503_v24 }
 0x2fb   : > { %2207 = vbcast.lane.b32.xlu1 %v2205_v1, 256  ;;  %2273 = vbcast.lane.b32.xlu0 %v2271_v4, 256  ;;  %v529_v1 = vld [vmem:[%s5495_s30 + $0x30] sm:$0xf] }
 0x2fc   : > { %v5594_v12 = vsel %vm2734_vm14, %v529_v1, 0 }
 0x2ff   : > { %2266 = vbcast.lane.b32.xlu1 %v2260_v61, 264  ;;  %2284 = vbcast.lane.b32.xlu0 %v2282_v35, 256  ;;  %v2315_v61 = vrot.slane %v5482_v6, %v5522_v50 }
 0x303   : > { %2277 = vbcast.lane.b32.xlu1 %v2271_v4, 264  ;;  %2295 = vbcast.lane.b32.xlu0 %v2293_v46, 256  ;;  %v530_v4 = vld [vmem:[%s5495_s30 + $0x34] sm:$0xf] }
 0x304   : > { %v5597_v7 = vsel %vm2734_vm14, %v530_v4, 0 }
 0x307   : > { %2288 = vbcast.lane.b32.xlu1 %v2282_v35, 264  ;;  %2306 = vbcast.lane.b32.xlu0 %v2304_v58, 256  ;;  %v2337_v35 = vrot.slane %v5482_v6, %v5535_v3 }
 0x30b   : > { %2299 = vbcast.lane.b32.xlu1 %v2293_v46, 264  ;;  %2317 = vbcast.lane.b32.xlu0 %v2315_v61, 256  ;;  %v531_v46 = vld [vmem:[%s5495_s30 + $0x38] sm:$0xf] }
 0x30c   : > { %v5604_v0 = vsel %vm2734_vm14, %v531_v46, 0 }
 0x30f   : > { %2310 = vbcast.lane.b32.xlu1 %v2304_v58, 264  ;;  %2328 = vbcast.lane.b32.xlu0 %v2326_v8, 256 }
 0x313   : > { %2321 = vbcast.lane.b32.xlu1 %v2315_v61, 264  ;;  %2339 = vbcast.lane.b32.xlu0 %v2337_v35, 256 }
 0x317   : > { %2332 = vbcast.lane.b32.xlu1 %v2326_v8, 264 }
 0x31b   : > { %2343 = vbcast.lane.b32.xlu1 %v2337_v35, 264 }
 0x34d   : > { %v2103_v1 = vpop.permute.xlu0 %2102  ;;  %v2110_v4 = vpop.permute.xlu1 %2109 }
 0x34e   : > { %v2209_v58 = vsub.f32 %v5302_v48, %v2103_v1  ;;  %v2210_v50 = vsub.f32 %v5305_v53, %v2110_v4 }
 0x350   : > { %v2225_v24 = vmul.f32 1.442695, %v2209_v58  ;;  %v2227_v6 = vmul.f32 1.442695, %v2210_v50 }
 0x351   : > { %v2131_v61 = vpop.permute.xlu0 %2130  ;;  %v2117_v3 = vpop.permute.xlu1 %2116 }
 0x352   : > { %4901 = vpow2.f32 %v2225_v24  ;;  %v2211_v34 = vsub.f32 %v5312_v60, %v2117_v3  ;;  %v2213_v35 = vsub.f32 %v5322_v9, %v2131_v61  ;;  %v6273_v61 = vmov 0.0  }
 0x353   : > { %4903 = vpow2.f32 %v2227_v6 }
 0x354   : > { %v2229_v46 = vmul.f32 1.442695, %v2211_v34  ;;  %v2233_v24 = vmul.f32 1.442695, %v2213_v35 }
 0x355   : > { %v2145_v16 = vpop.permute.xlu0 %2144  ;;  %v2124_v32 = vpop.permute.xlu1 %2123 }
 0x356   : > { %v2212_v8 = vsub.f32 %v5315_v2, %v2124_v32  ;;  %4905 = vpow2.f32 %v2229_v46 }
 0x358   : > { %v2231_v36 = vmul.f32 1.442695, %v2212_v8 }
 0x359   : > { %v2159_v48 = vpop.permute.xlu0 %2158  ;;  %v2138_v1 = vpop.permute.xlu1 %2137 }
 0x35a   : > { %v2214_v53 = vsub.f32 %v5325_v20, %v2138_v1  ;;  %4907 = vpow2.f32 %v2231_v36  ;;  %v2215_v20 = vsub.f32 %v5332_v33, %v2145_v16  ;;  %v2217_v35 = vsub.f32 %v5345_v55, %v2159_v48 }
 0x35b   : > { %4909 = vpow2.f32 %v2233_v24 }
 0x35c   : > { %v5615_v50 = vpop.eup %4901  ;;  %v2235_v60 = vmul.f32 1.442695, %v2214_v53  ;;  %v2237_v33 = vmul.f32 1.442695, %v2215_v20 }
 0x35d   : > { %v5617_v4 = vpop.eup %4903  ;;  %v2173_v34 = vpop.permute.xlu0 %2172  ;;  %v2715_v2 = vpack.c.bf16 %v5615_v50, %v5615_v50 }
 0x35e   : > { %v2152_v3 = vpop.permute.xlu1 %2151  ;;  %v2716_v9 = vpack.c.bf16 %v5617_v4, %v5617_v4  ;;  %4911 = vpow2.f32 %v2235_v60 }
 0x35f   : > { %4718 = vmatmul.mubr.msk.bf16.vlgmr.msra.gmra.mrb[48].mxu0 %vm1733_vm4, %v2715_v2  ;;  %v2216_v36 = vsub.f32 %v5335_v44, %v2152_v3  ;;  %4913 = vpow2.f32 %v2237_v33 }
 0x360   : > { %4724 = vmatmul.mubr.msk.bf16.vlgmr.msra.gmra.mrb[48].mxu1 %vm1733_vm4, %v2716_v9  ;;  %4728 = vmatpush3.bf16.msra.mxu0 %v5528_v62  ;;  %v5633_v46 = vpop.eup %4905 }
 0x361   : > { %v5628_v58 = vpop.permute.xlu0 %2186  ;;  %4734 = vmatpush3.bf16.msra.mxu1 %v5531_v63  ;;  %4729 = vmatprep.mubr.msk.bf16.mxu0 %vm4992_vm0, %v6273_v61  ;;  %v2239_v44 = vmul.f32 1.442695, %v2216_v36  ;;  %v2717_v63 = vpack.c.bf16 %v5633_v46, %v5633_v46 }
 0x362   : > { %v2166_v6 = vpop.permute.xlu1 %2165  ;;  %4735 = vmatprep.mubr.msk.bf16.mxu1 %vm4992_vm0, %v6273_v61  ;;  %4739 = vmatprep.subr.bf16.mxu0 %v6273_v61 }
 0x363   : > { %4745 = vmatprep.subr.bf16.mxu1 %v6273_v61  ;;  %4915 = vpow2.f32 %v2239_v44  ;;  %v2218_v1 = vsub.f32 %v5342_v54, %v2166_v6  ;;  %v2241_v54 = vmul.f32 1.442695, %v2217_v35 }
 0x364   : > { %v5639_v16 = vpop.eup %4907 }
 0x365   : > { %v5641_v62 = vpop.permute.xlu0 %2200  ;;  %v2718_v8 = vpack.c.bf16 %v5639_v16, %v5639_v16  ;;  %v5657_v60 = vpop.eup %4909  ;;  %v2243_v48 = vmul.f32 1.442695, %v2218_v1 }
 0x366   : > { %v2180_v32 = vpop.permute.xlu1 %2179 }
 0x367   : > { %4730 = vmatmul.mubr.msk.bf16.vlgmr.msra.gmra.mrb[52].mxu0 %vm1733_vm4, %v2717_v63 }
 0x368   : > { %4736 = vmatmul.mubr.msk.bf16.vlgmr.msra.gmra.mrb[52].mxu1 %vm1733_vm4, %v2718_v8  ;;  %4740 = vmatpush3.bf16.msra.mxu0 %v5542_v17  ;;  %v5663_v55 = vpop.eup %4911 }
 0x369   : > { %v2263_v24 = vpop.permute.xlu0 %2262  ;;  %4746 = vmatpush3.bf16.msra.mxu1 %v5545_v21  ;;  %4741 = vmatprep.mubr.msk.bf16.mxu0 %vm4992_vm0, %v6273_v61  ;;  %v2219_v21 = vsub.f32 %v5352_v5, %v2173_v34  ;;  %v2720_v36 = vpack.c.bf16 %v5663_v55, %v5663_v55  ;;  %v2220_v34 = vsub.f32 %v5355_v13, %v2180_v32 }
 0x36a   : > { %v5652_v53 = vpop.permute.xlu1 %2193  ;;  %v2345_v3 = vsub.f32 %v5260_v10, %v2263_v24  ;;  %4747 = vmatprep.mubr.msk.bf16.mxu1 %vm4992_vm0, %v6273_v61  ;;  %4751 = vmatprep.subr.bf16.mxu0 %v6273_v61  ;;  %v2719_v10 = vpack.c.bf16 %v5657_v60, %v5657_v60 }
 0x36b   : > { %4757 = vmatprep.subr.bf16.mxu1 %v6273_v61  ;;  %v2245_v5 = vmul.f32 1.442695, %v2219_v21  ;;  %v2247_v32 = vmul.f32 1.442695, %v2220_v34 }
 0x36c   : > { %v2361_v17 = vmul.f32 1.442695, %v2345_v3  ;;  %v2221_v3 = vsub.f32 %v5362_v29, %v5628_v58 }
 0x36d   : > { %v2274_v9 = vpop.permute.xlu0 %2273 }
 0x36e   : > { %v5667_v2 = vpop.permute.xlu1 %2207  ;;  %v2347_v20 = vsub.f32 %v5262_v11, %v2274_v9  ;;  %4917 = vpow2.f32 %v2361_v17  ;;  %v5681_v11 = vpop.eup %4913  ;;  %v2249_v58 = vmul.f32 1.442695, %v2221_v3 }
 0x36f   : > { %4742 = vmatmul.mubr.msk.bf16.vlgmr.msra.gmra.mrb[56].mxu0 %vm1733_vm4, %v2719_v10  ;;  %4919 = vpow2.f32 %v2241_v54  ;;  %v2222_v54 = vsub.f32 %v5365_v43, %v5652_v53 }
 0x370   : > { %v2365_v6 = vmul.f32 1.442695, %v2347_v20  ;;  %4748 = vmatmul.mubr.msk.bf16.vlgmr.msra.gmra.mrb[56].mxu1 %vm1733_vm4, %v2720_v36  ;;  %4752 = vmatpush3.bf16.msra.mxu0 %v5554_v49  ;;  %4921 = vpow2.f32 %v2243_v48  ;;  %v5688_v49 = vpop.eup %4915 }
 0x371   : > { %v2285_v44 = vpop.permute.xlu0 %2284  ;;  %4758 = vmatpush3.bf16.msra.mxu1 %v5557_v51  ;;  %4753 = vmatprep.mubr.msk.bf16.mxu0 %vm4992_vm0, %v6273_v61  ;;  %v2722_v24 = vpack.c.bf16 %v5688_v49, %v5688_v49  ;;  %v2251_v53 = vmul.f32 1.442695, %v2222_v54 }
 0x372   : > { %v2267_v33 = vpop.permute.xlu1 %2266  ;;  %v2349_v8 = vsub.f32 %v5268_v18, %v2285_v44  ;;  %4759 = vmatprep.mubr.msk.bf16.mxu1 %vm4992_vm0, %v6273_v61  ;;  %4763 = vmatprep.subr.bf16.mxu0 %v6273_v61  ;;  %4923 = vpow2.f32 %v2365_v6 }
 0x373   : > { %v2346_v63 = vsub.f32 %v5264_v14, %v2267_v33  ;;  %4769 = vmatprep.subr.bf16.mxu1 %v6273_v61  ;;  %4925 = vpow2.f32 %v2245_v5  ;;  %v2721_v14 = vpack.c.bf16 %v5681_v11, %v5681_v11 }
 0x374   : > { %v2369_v51 = vmul.f32 1.442695, %v2349_v8 }
 0x375   : > { %v2363_v13 = vmul.f32 1.442695, %v2346_v63  ;;  %v2296_v1 = vpop.permute.xlu0 %2295 }
 0x376   : > { %v2278_v35 = vpop.permute.xlu1 %2277 }
 0x377   : > { %4927 = vpow2.f32 %v2363_v13  ;;  %v2348_v18 = vsub.f32 %v5266_v15, %v2278_v35  ;;  %4754 = vmatmul.mubr.msk.bf16.vlgmr.msra.gmra.mrb[60].mxu0 %vm1733_vm4, %v2721_v14  ;;  %v2351_v15 = vsub.f32 %v5270_v19, %v2296_v1 }
 0x378   : > { %4929 = vpow2.f32 %v2369_v51  ;;  %4760 = vmatmul.mubr.msk.bf16.vlgmr.msra.gmra.mrb[60].mxu1 %vm1733_vm4, %v2722_v24  ;;  %4764 = vmatpush3.bf16.msra.mxu0 %v5568_v25  ;;  %v5703_v21 = vpop.eup %4917 }
 0x379   : > { %v2367_v17 = vmul.f32 1.442695, %v2348_v18  ;;  %4931 = vpow2.f32 %v2247_v32  ;;  %v2307_v9 = vpop.permute.xlu0 %2306  ;;  %4770 = vmatpush3.bf16.msra.mxu1 %v5571_v28  ;;  %4765 = vmatprep.mubr.msk.bf16.mxu0 %vm4992_vm0, %v6273_v61  ;;  %v5709_v29 = vpop.eup %4919  ;;  %v2569_v25 = vsel %vm1782_vm5, %v5703_v21, 0.0  ;;  %v2223_v28 = vsub.f32 %v5375_v57, %v5641_v62 }
 0x37a   : > { %v2289_v48 = vpop.permute.xlu1 %2288  ;;  %4771 = vmatprep.mubr.msk.bf16.mxu1 %vm4992_vm0, %v6273_v61  ;;  %4775 = vmatprep.subr.bf16.mxu0 %v6273_v61  ;;  %v5717_v19 = vpop.eup %4921  ;;  %v2373_v20 = vmul.f32 1.442695, %v2351_v15  ;;  %v2353_v36 = vsub.f32 %v5276_v26, %v2307_v9  ;;  %v2723_v34 = vpack.c.bf16 %v5709_v29, %v5709_v29  ;;  %v2224_v26 = vsub.f32 %v5372_v56, %v5667_v2 }
 0x37b   : > { %4933 = vpow2.f32 %v2367_v17  ;;  %v2350_v43 = vsub.f32 %v5272_v22, %v2289_v48  ;;  %2570 = vadd.xlane.f32.xlu0 %v2569_v25  ;;  %4781 = vmatprep.subr.bf16.mxu1 %v6273_v61  ;;  %v2724_v57 = vpack.c.bf16 %v5717_v19, %v5717_v19  ;;  %v2253_v8 = vmul.f32 1.442695, %v2223_v28 }
 0x37c   : > { %v5722_v22 = vpop.eup %4923  ;;  %v2377_v32 = vmul.f32 1.442695, %v2353_v36  ;;  %v2255_v18 = vmul.f32 1.442695, %v2224_v26  ;;  %v2393_v25 = vsel %vm1733_vm4, %v5615_v50, 0.0 }
 0x37d   : > { %v2371_v10 = vmul.f32 1.442695, %v2350_v43  ;;  %v2318_v5 = vpop.permute.xlu0 %2317  ;;  %v2575_v44 = vsel %vm1782_vm5, %v5722_v22, 0.0  ;;  %v5732_v62 = vpop.eup %4925 }
 0x37e   : > { %v2300_v6 = vpop.permute.xlu1 %2299  ;;  %v2355_v13 = vsub.f32 %v5278_v27, %v2318_v5 }
 0x37f   : > { %4935 = vpow2.f32 %v2371_v10  ;;  %v2352_v33 = vsub.f32 %v5274_v23, %v2300_v6  ;;  %2576 = vadd.xlane.f32.xlu0 %v2575_v44  ;;  %4766 = vmatmul.mubr.msk.bf16.vlgmr.msra.gmra.mrb[64].mxu0 %vm1733_vm4, %v2723_v34 }
 0x380   : > { %4937 = vpow2.f32 %v2249_v58  ;;  %4772 = vmatmul.mubr.msk.bf16.vlgmr.msra.gmra.mrb[64].mxu1 %vm1733_vm4, %v2724_v57  ;;  %4776 = vmatpush3.bf16.msra.mxu0 %v5580_v40  ;;  %v2381_v24 = vmul.f32 1.442695, %v2355_v13 }
 0x381   : > { %v5737_v63 = vpop.eup %4927  ;;  %4939 = vpow2.f32 %v2251_v53  ;;  %v2375_v23 = vmul.f32 1.442695, %v2352_v33  ;;  %v2329_v56 = vpop.permute.xlu0 %2328  ;;  %4782 = vmatpush3.bf16.msra.mxu1 %v5583_v47  ;;  %4777 = vmatprep.mubr.msk.bf16.mxu0 %vm4992_vm0, %v6273_v61  ;;  %v2396_v33 = vsel %vm1733_vm4, %v5617_v4, 0.0  ;;  %v2402_v4 = vsel %vm1733_vm4, %v5639_v16, 0.0 }
 0x382   : > { %v5742_v51 = vpop.eup %4929  ;;  %4941 = vpow2.f32 %v2373_v20  ;;  %v2311_v35 = vpop.permute.xlu1 %2310  ;;  %v2572_v2 = vsel %vm1782_vm5, %v5737_v63, 0.0  ;;  %v3468_v27 = vpack.c.bf16 %v5737_v63, %v5703_v21  ;;  %4783 = vmatprep.mubr.msk.bf16.mxu1 %vm4992_vm0, %v6273_v61  ;;  %4787 = vmatprep.subr.bf16.mxu0 %v6273_v61  ;;  %v2357_v54 = vsub.f32 %v5288_v37, %v2329_v56  ;;  %v4897_v21 = vld [vmem:[%s5128_s19 + $0x20] sm:$0xff]   ;;  %v4898_v63 = vld [vmem:[%s5128_s19 + $0x28] sm:$0xff]  }
 0x383   : > { %4943 = vpow2.f32 %v2375_v23  ;;  %v2354_v40 = vsub.f32 %v5280_v30, %v2311_v35  ;;  %2573 = vadd.xlane.f32.xlu1 %v2572_v2  ;;  %v2581_v1 = vsel %vm1782_vm5, %v5742_v51, 0.0  ;;  %v5756_v14 = vpop.eup %4931  ;;  %v2725_v30 = vpack.c.bf16 %v5732_v62, %v5732_v62  ;;  %4793 = vmatprep.subr.bf16.mxu1 %v6273_v61 }
 0x384   : > { %2582 = vadd.xlane.f32.xlu0 %v2581_v1  ;;  %4945 = vpow2.f32 %v2253_v8  ;;  %v2726_v58 = vpack.c.bf16 %v5756_v14, %v5756_v14  ;;  %v2385_v53 = vmul.f32 1.442695, %v2357_v54  ;;  %v2420_v16 = vsel %vm1733_vm4, %v5717_v19, 0.0  ;;  %v4893_v19 = vld [vmem:[%s5128_s19] sm:$0xff]  }
 0x385   : > { %v5759_v47 = vpop.eup %4933  ;;  %v2379_v3 = vmul.f32 1.442695, %v2354_v40  ;;  %4947 = vpow2.f32 %v2377_v32  ;;  %v2340_v43 = vpop.permute.xlu0 %2339  ;;  %v2423_v40 = vsel %vm1733_vm4, %v5732_v62, 0.0  ;;  %v2426_v54 = vsel %vm1733_vm4, %v5756_v14, 0.0 }
 0x386   : > { %v2322_v17 = vpop.permute.xlu1 %2321  ;;  %v2578_v15 = vsel %vm1782_vm5, %v5759_v47, 0.0  ;;  %v3469_v48 = vpack.c.bf16 %v5759_v47, %v5722_v22  ;;  %v2359_v50 = vsub.f32 %v5290_v38, %v2340_v43  ;;  %v2399_v38 = vsel %vm1733_vm4, %v5633_v46, 0.0 }
 0x387   : > { %4949 = vpow2.f32 %v2379_v3  ;;  %v2356_v9 = vsub.f32 %v5282_v31, %v2322_v17  ;;  %2579 = vadd.xlane.f32.xlu1 %v2578_v15  ;;  %4778 = vmatmul.mubr.msk.bf16.vlgmr.msra.gmra.mrb[68].mxu0 %vm1733_vm4, %v2725_v30  ;;  %v2411_v17 = vsel %vm1733_vm4, %v5681_v11, 0.0  ;;  %v2414_v11 = vsel %vm1733_vm4, %v5688_v49, 0.0 }
 0x388   : > { %4951 = vpow2.f32 %v2255_v18  ;;  %2394 = vadd.xlane.f32.xlu0 %v2393_v25  ;;  %4784 = vmatmul.mubr.msk.bf16.vlgmr.msra.gmra.mrb[68].mxu1 %vm1733_vm4, %v2726_v58  ;;  %v4894_v18 = vld [vmem:[%s5128_s19 + $0x8] sm:$0xff]   ;;  %v4896_v25 = vld [vmem:[%s5128_s19 + $0x18] sm:$0xff]   ;;  %v2417_v49 = vsel %vm1733_vm4, %v5709_v29, 0.0 }
 0x389   : > { %v5775_v37 = vpop.eup %4935  ;;  %4953 = vpow2.f32 %v2381_v24  ;;  %v2383_v28 = vmul.f32 1.442695, %v2356_v9  ;;  %4788 = vmatpush3.bf16.msra.mxu0 %v5594_v12  ;;  %4794 = vmatpush3.bf16.msra.mxu1 %v5597_v7  ;;  %v2408_v24 = vsel %vm1733_vm4, %v5663_v55, 0.0  ;;  %v4895_v9 = vld [vmem:[%s5128_s19 + $0x10] sm:$0xff]  }
 0x38a   : > { %v5779_v31 = vpop.eup %4937  ;;  %v2333_v10 = vpop.permute.xlu1 %2332  ;;  %v2584_v20 = vsel %vm1782_vm5, %v5775_v37, 0.0  ;;  %4789 = vmatprep.mubr.msk.bf16.mxu0 %vm4992_vm0, %v6273_v61  ;;  %v3470_v36 = vpack.c.bf16 %v5775_v37, %v5742_v51  ;;  %4795 = vmatprep.mubr.msk.bf16.mxu1 %vm4992_vm0, %v6273_v61  ;;  %v4899_v51 = vld [vmem:[%s5128_s19 + $0x30] sm:$0xff]   ;;  %v4900_v37 = vld [vmem:[%s5128_s19 + $0x38] sm:$0xff]  }
 0x38b   : > { %v5789_v6 = vpop.eup %4939  ;;  %4955 = vpow2.f32 %v2383_v28  ;;  %v2358_v12 = vsub.f32 %v5292_v41, %v2333_v10  ;;  %2585 = vadd.xlane.f32.xlu1 %v2584_v20  ;;  %4799 = vmatprep.subr.bf16.mxu0 %v6273_v61  ;;  %v2389_v41 = vmul.f32 1.442695, %v2359_v50  ;;  %v2727_v46 = vpack.c.bf16 %v5779_v31, %v5779_v31 }
 0x38c   : > { %v5796_v5 = vpop.eup %4941  ;;  %2400 = vadd.xlane.f32.xlu0 %v2399_v38  ;;  %4805 = vmatprep.subr.bf16.mxu1 %v6273_v61  ;;  %4957 = vpow2.f32 %v2385_v53  ;;  %v2728_v23 = vpack.c.bf16 %v5789_v6, %v5789_v6  ;;  %v2429_v43 = vsel %vm1733_vm4, %v5779_v31, 0.0  ;;  %v2432_v28 = vsel %vm1733_vm4, %v5789_v6, 0.0 }
 0x38d   : > { %v5799_v7 = vpop.eup %4943  ;;  %v2387_v34 = vmul.f32 1.442695, %v2358_v12  ;;  %v2587_v47 = vsel %vm1782_vm5, %v5796_v5, 0.0 }
 0x38e   : > { %v2344_v44 = vpop.permute.xlu1 %2343  ;;  %v3471_v57 = vpack.c.bf16 %v5799_v7, %v5796_v5  ;;  %v5808_v26 = vpop.eup %4945  ;;  %v2590_v22 = vsel %vm1782_vm5, %v5799_v7, 0.0 }
 0x38f   : > { %4959 = vpow2.f32 %v2387_v34  ;;  %v2360_v8 = vsub.f32 %v5294_v42, %v2344_v44  ;;  %2397 = vadd.xlane.f32.xlu1 %v2396_v33  ;;  %v5815_v13 = vpop.eup %4947  ;;  %4790 = vmatmul.mubr.msk.bf16.vlgmr.msra.gmra.mrb[72].mxu0 %vm1733_vm4, %v2727_v46  ;;  %v2729_v1 = vpack.c.bf16 %v5808_v26, %v5808_v26 }
 0x390   : > { %2403 = vadd.xlane.f32.xlu0 %v2402_v4  ;;  %4796 = vmatmul.mubr.msk.bf16.vlgmr.msra.gmra.mrb[72].mxu1 %vm1733_vm4, %v2728_v23  ;;  %4961 = vpow2.f32 %v2389_v41  ;;  %v2593_v31 = vsel %vm1782_vm5, %v5815_v13, 0.0 }
 0x391   : > { %v5818_v32 = vpop.eup %4949  ;;  %v2391_v35 = vmul.f32 1.442695, %v2360_v8  ;;  %4800 = vmatpush3.bf16.msra.mxu0 %v5604_v0  ;;  %4806 = vmatpush3.bf16.msra.mxu1 %v5607_v39  ;;  %v2405_v0 = vsel %vm1733_vm4, %v5657_v60, 0.0 }
 0x392   : > { %v5822_v42 = vpop.eup %4951  ;;  %4801 = vmatprep.mubr.msk.bf16.mxu0 %vm4992_vm0, %v6273_v61  ;;  %v3472_v56 = vpack.c.bf16 %v5818_v32, %v5815_v13  ;;  %4807 = vmatprep.mubr.msk.bf16.mxu1 %vm4992_vm0, %v6273_v61 }
 0x393   : > { %v5831_v2 = vpop.eup %4953  ;;  %4963 = vpow2.f32 %v2391_v35  ;;  %2421 = vadd.xlane.f32.xlu1 %v2420_v16  ;;  %4811 = vmatprep.subr.bf16.mxu0 %v6273_v61  ;;  %v2730_v3 = vpack.c.bf16 %v5822_v42, %v5822_v42  ;;  %v2438_v29 = vsel %vm1733_vm4, %v5822_v42, 0.0 }
 0x394   : > { %2406 = vadd.xlane.f32.xlu0 %v2405_v0  ;;  %4817 = vmatprep.subr.bf16.mxu1 %v6273_v61  ;;  %v2599_v50 = vsel %vm1782_vm5, %v5831_v2, 0.0 }
 0x395   : > { %v5838_v39 = vpop.eup %4955 }
 0x396   : > { %v3473_v60 = vpack.c.bf16 %v5838_v39, %v5831_v2  ;;  %v5853_v30 = vpop.eup %4957  ;;  %v2602_v53 = vsel %vm1782_vm5, %v5838_v39, 0.0 }
 0x397   : > { %2424 = vadd.xlane.f32.xlu1 %v2423_v40  ;;  %4802 = vmatmul.mubr.msk.bf16.vlgmr.msra.gmra.mrb[76].mxu0 %vm1733_vm4, %v2729_v1  ;;  %v2605_v20 = vsel %vm1782_vm5, %v5853_v30, 0.0 }
 0x398   : > { %2409 = vadd.xlane.f32.xlu0 %v2408_v24  ;;  %4808 = vmatmul.mubr.msk.bf16.vlgmr.msra.gmra.mrb[76].mxu1 %vm1733_vm4, %v2730_v3 }
 0x399   : > { %v5856_v62 = vpop.eup %4959  ;;  %4812 = vmatpush3.bf16.msra.mxu0 %v4893_v19  ;;  %4818 = vmatpush3.bf16.msra.mxu1 %v4894_v18 }
 0x39a   : > { %4813 = vmatprep.mubr.msk.bf16.mxu0 %vm4992_vm0, %v6273_v61  ;;  %v3474_v55 = vpack.c.bf16 %v5856_v62, %v5853_v30  ;;  %4819 = vmatprep.mubr.msk.bf16.mxu1 %vm4992_vm0, %v6273_v61  ;;  %v5869_v15 = vpop.eup %4961  ;;  %v2608_v10 = vsel %vm1782_vm5, %v5856_v62, 0.0 }
 0x39b   : > { %2427 = vadd.xlane.f32.xlu1 %v2426_v54  ;;  %4823 = vmatprep.subr.bf16.mxu0 %v6273_v61 }
 0x39c   : > { %2412 = vadd.xlane.f32.xlu0 %v2411_v17  ;;  %4829 = vmatprep.subr.bf16.mxu1 %v6273_v61 }
 0x39d   : > { %v4964_v14 = vpop.eup %4963 }
 0x39e   : > { %v3475_v58 = vpack.c.bf16 %v4964_v14, %v5869_v15 }
 0x39f   : > { %2430 = vadd.xlane.f32.xlu1 %v2429_v43  ;;  %4814 = vmatmul.mubr.msk.bf16.vlgmr.msra.gmra.mrb[80].mxu0 %vm1782_vm5, %v3468_v27  ;;  %v2435_v27 = vsel %vm1733_vm4, %v5808_v26, 0.0 }
 0x3a0   : > { %2415 = vadd.xlane.f32.xlu0 %v2414_v11  ;;  %4820 = vmatmul.mubr.msk.bf16.vlgmr.msra.gmra.mrb[80].mxu1 %vm1782_vm5, %v3469_v48  ;;  %v2596_v48 = vsel %vm1782_vm5, %v5818_v32, 0.0 }
 0x3a1   : > { %4824 = vmatpush3.bf16.msra.mxu0 %v4895_v9  ;;  %4830 = vmatpush3.bf16.msra.mxu1 %v4896_v25 }
 0x3a2   : > { %4825 = vmatprep.mubr.msk.bf16.mxu0 %vm4992_vm0, %v6273_v61  ;;  %4831 = vmatprep.mubr.msk.bf16.mxu1 %vm4992_vm0, %v6273_v61 }
 0x3a3   : > { %2433 = vadd.xlane.f32.xlu1 %v2432_v28  ;;  %4835 = vmatprep.subr.bf16.mxu0 %v6273_v61 }
 0x3a4   : > { %2418 = vadd.xlane.f32.xlu0 %v2417_v49  ;;  %4841 = vmatprep.subr.bf16.mxu1 %v6273_v61 }
 0x3a7   : > { %2591 = vadd.xlane.f32.xlu1 %v2590_v22  ;;  %4826 = vmatmul.mubr.msk.bf16.vlgmr.msra.gmra.mrb[84].mxu0 %vm1782_vm5, %v3470_v36  ;;  %v2614_v36 = vsel %vm1782_vm5, %v4964_v14, 0.0 }
 0x3a8   : > { %2436 = vadd.xlane.f32.xlu0 %v2435_v27  ;;  %4832 = vmatmul.mubr.msk.bf16.vlgmr.msra.gmra.mrb[84].mxu1 %vm1782_vm5, %v3471_v57 }
 0x3a9   : > { %4836 = vmatpush3.bf16.msra.mxu0 %v4897_v21  ;;  %4842 = vmatpush3.bf16.msra.mxu1 %v4898_v63 }
 0x3aa   : > { %4837 = vmatprep.mubr.msk.bf16.mxu0 %vm4992_vm0, %v6273_v61  ;;  %4843 = vmatprep.mubr.msk.bf16.mxu1 %vm4992_vm0, %v6273_v61 }
 0x3ab   : > { %2439 = vadd.xlane.f32.xlu1 %v2438_v29  ;;  %4847 = vmatprep.subr.bf16.mxu0 %v6273_v61 }
 0x3ac   : > { %2588 = vadd.xlane.f32.xlu0 %v2587_v47  ;;  %4853 = vmatprep.subr.bf16.mxu1 %v6273_v61 }
 0x3af   : > { %2597 = vadd.xlane.f32.xlu1 %v2596_v48  ;;  %4838 = vmatmul.mubr.msk.bf16.vlgmr.msra.gmra.mrb[88].mxu0 %vm1782_vm5, %v3472_v56 }
 0x3b0   : > { %2594 = vadd.xlane.f32.xlu0 %v2593_v31  ;;  %4844 = vmatmul.mubr.msk.bf16.vlgmr.msra.gmra.mrb[88].mxu1 %vm1782_vm5, %v3473_v60 }
 0x3b1   : > { %4848 = vmatpush3.bf16.msra.mxu0 %v4899_v51  ;;  %4854 = vmatpush3.bf16.msra.mxu1 %v4900_v37 }
 0x3b2   : > { %4849 = vmatprep.mubr.msk.bf16.mxu0 %vm4992_vm0, %v6273_v61  ;;  %4855 = vmatprep.mubr.msk.bf16.mxu1 %vm4992_vm0, %v6273_v61  ;;  %v2611_v61 = vsel %vm1782_vm5, %v5869_v15, 0.0 }
 0x3b3   : > { %2603 = vadd.xlane.f32.xlu1 %v2602_v53 }
 0x3b4   : > { %2600 = vadd.xlane.f32.xlu0 %v2599_v50 }
 0x3b7   : > { %2609 = vadd.xlane.f32.xlu1 %v2608_v10  ;;  %4850 = vmatmul.mubr.msk.bf16.vlgmr.msra.gmra.mrb[92].mxu0 %vm1782_vm5, %v3474_v55 }
 0x3b8   : > { %2606 = vadd.xlane.f32.xlu0 %v2605_v20  ;;  %4856 = vmatmul.mubr.msk.bf16.vlgmr.msra.gmra.mrb[92].mxu1 %vm1782_vm5, %v3475_v58 }
 0x3bb   : > { %2615 = vadd.xlane.f32.xlu1 %v2614_v36 }
 0x3bc   : > { %2612 = vadd.xlane.f32.xlu0 %v2611_v61 }
 0x408   : > { %v2571_v6 = vpop.xlane.xlu0 %2570 }
 0x409   : > { %v2636_v5 = vrot.slane %v2571_v6, %v5415_v52 }
 0x40c   : > { %v2577_v12 = vpop.xlane.xlu0 %2576 }
 0x40d   : > { %v2645_v44 = vrot.slane %v2577_v12, %v5415_v52 }
 0x410   : > { %v2574_v38 = vpop.xlane.xlu1 %2573 }
 0x411   : > { %v2640_v7 = vrot.slane %v2574_v38, %v5449_v59  ;;  %v2583_v34 = vpop.xlane.xlu0 %2582 }
 0x412   : > { %v2654_v23 = vrot.slane %v2583_v34, %v5415_v52 }
 0x413   : > { %v2641_v33 = vsel %vm1991_vm13, %v2640_v7, %v2636_v5 }
 0x414   : > { %v2580_v41 = vpop.xlane.xlu1 %2579 }
 0x415   : > { %v2649_v46 = vrot.slane %v2580_v41, %v5449_v59  ;;  %v2395_v57 = vpop.xlane.xlu0 %2394 }
 0x416   : > { %v2460_v19 = vrot.slane %v2395_v57, %v5415_v52 }
 0x417   : > { %v2650_v26 = vsel %vm1991_vm13, %v2649_v46, %v2645_v44 }
 0x418   : > { %v2705_v8 = vsel %vm1911_vm6, %v2650_v26, %v2641_v33  ;;  %v2586_v4 = vpop.xlane.xlu1 %2585 }
 0x419   : > { %v2658_v13 = vrot.slane %v2586_v4, %v5449_v59  ;;  %v2401_v32 = vpop.xlane.xlu0 %2400 }
 0x41a   : > { %v2468_v18 = vrot.slane %v2401_v32, %v5415_v52 }
 0x41b   : > { %v2659_v35 = vsel %vm1991_vm13, %v2658_v13, %v2654_v23 }
 0x41c   : > { %v5967_v42 = vsel %vm1913_vm7, %v2659_v35, %v2705_v8  ;;  %v2398_v16 = vpop.xlane.xlu1 %2397 }
 0x41d   : > { %v2404_v56 = vpop.xlane.xlu0 %2403  ;;  %v2464_v2 = vrot.slane %v2398_v16, %v5415_v52 }
 0x41e   : > { %v2472_v3 = vrot.slane %v2404_v56, %v5415_v52 }
 0x41f   : > { %v2521_v40 = vsel %vm1911_vm6, %v2464_v2, %v2460_v19 }
 0x420   : > { %v2422_v0 = vpop.xlane.xlu1 %2421  ;;  %v2522_v24 = vsel %vm1913_vm7, %v2468_v18, %v2521_v40 }
 0x421   : > { %v2407_v39 = vpop.xlane.xlu0 %2406  ;;  %v2523_v55 = vsel %vm1915_vm8, %v2472_v3, %v2522_v24  ;;  %v2496_v22 = vrot.slane %v2422_v0, %v5415_v52 }
 0x422   : > { %v2476_v62 = vrot.slane %v2407_v39, %v5415_v52 }
 0x424   : > { %v2425_v1 = vpop.xlane.xlu1 %2424  ;;  %v2524_v9 = vsel %vm1917_vm9, %v2476_v62, %v2523_v55 }
 0x425   : > { %v2410_v60 = vpop.xlane.xlu0 %2409  ;;  %v2500_v27 = vrot.slane %v2425_v1, %v5415_v52 }
 0x426   : > { %v2480_v17 = vrot.slane %v2410_v60, %v5415_v52 }
 0x428   : > { %v2428_v30 = vpop.xlane.xlu1 %2427  ;;  %v2525_v25 = vsel %vm1919_vm10, %v2480_v17, %v2524_v9 }
 0x429   : > { %v2413_v54 = vpop.xlane.xlu0 %2412  ;;  %v2504_v47 = vrot.slane %v2428_v30, %v5415_v52 }
 0x42a   : > { %v2484_v15 = vrot.slane %v2413_v54, %v5415_v52 }
 0x42c   : > { %v2431_v14 = vpop.xlane.xlu1 %2430  ;;  %v2526_v11 = vsel %vm1921_vm11, %v2484_v15, %v2525_v25 }
 0x42d   : > { %v2416_v43 = vpop.xlane.xlu0 %2415  ;;  %v2508_v31 = vrot.slane %v2431_v14, %v5415_v52 }
 0x42e   : > { %v2488_v58 = vrot.slane %v2416_v43, %v5415_v52 }
 0x430   : > { %v2434_v28 = vpop.xlane.xlu1 %2433  ;;  %v2527_v49 = vsel %vm1923_vm12, %v2488_v58, %v2526_v11 }
 0x431   : > { %2537 = vxpose.xlu0.b32.start [1/2] (short) (narrow) %v2527_v49, 8  ;;  %v2419_v21 = vpop.xlane.xlu0 %2418  ;;  %v2512_v20 = vrot.slane %v2434_v28, %v5415_v52 }
 0x432   : > { %v2492_v63 = vrot.slane %v2419_v21, %v5415_v52  ;;  %v5987_v29 = vpop.f32.mrb[48].mxu0 }
 0x433   : > { %v5991_v48 = vpop.f32.mrb[48].mxu1  ;;  %v4719_v6 = vpop.f32.mrb[49].mxu0 }
 0x434   : > { %v2528_v51 = vsel %vm1911_vm6, %v2496_v22, %v2492_v63  ;;  %v2592_v37 = vpop.xlane.xlu1 %2591  ;;  %v4725_v50 = vpop.f32.mrb[49].mxu1 }
 0x435   : > { %v2529_v53 = vsel %vm1913_vm7, %v2500_v27, %v2528_v51  ;;  %v2437_v10 = vpop.xlane.xlu0 %2436  ;;  %v2821_v12 = vpop.f32.mrb[50].mxu1  ;;  %v2667_v57 = vrot.slane %v2592_v37, %v5449_v59 }
 0x436   : > { %v2530_v36 = vsel %vm1915_vm8, %v2504_v47, %v2529_v53  ;;  %v2516_v61 = vrot.slane %v2437_v10, %v5415_v52  ;;  %v2775_v5 = vpop.f32.mrb[50].mxu0  ;;  %v4726_v7 = vpop.f32.mrb[51].mxu1 }
 0x437   : > { %v2531_v38 = vsel %vm1917_vm9, %v2508_v31, %v2530_v36  ;;  %v4720_v33 = vpop.f32.mrb[51].mxu0 }
 0x438   : > { %v2532_v34 = vsel %vm1919_vm10, %v2512_v20, %v2531_v38  ;;  %v2440_v41 = vpop.xlane.xlu1 %2439 }
 0x439   : > { %v2520_v44 = vrot.slane %v2440_v41, %v5415_v52  ;;  %v2589_v46 = vpop.xlane.xlu0 %2588  ;;  %v2533_v26 = vsel %vm1921_vm11, %v2516_v61, %v2532_v34 }
 0x43a   : > { %v2663_v8 = vrot.slane %v2589_v46, %v5415_v52  ;;  %v6004_v4 = vpop.f32.mrb[52].mxu0 }
 0x43b   : > { %v2534_v23 = vsel %vm1923_vm12, %v2520_v44, %v2533_v26  ;;  %v6008_v32 = vpop.f32.mrb[52].mxu1  ;;  %v4731_v56 = vpop.f32.mrb[53].mxu0 }
 0x43c   : > { %v2668_v13 = vsel %vm1991_vm13, %v2667_v57, %v2663_v8  ;;  %2538 = vxpose.xlu0.b32.end [2/2] (short) (narrow) %v2534_v23, 8  ;;  %v4737_v16 = vpop.f32.mrb[53].mxu1  ;;  %v2867_v0 = vpop.f32.mrb[54].mxu0 }
 0x43d   : > { %v6012_v35 = vsel %vm1915_vm8, %v2668_v13, %v5967_v42  ;;  %v2913_v2 = vpop.f32.mrb[54].mxu1  ;;  %v4732_v19 = vpop.f32.mrb[55].mxu0 }
 0x43e   : > { %v4738_v39 = vpop.f32.mrb[55].mxu1 }
 0x442   : > { %v6014_v40 = vpop.f32.mrb[56].mxu0 }
 0x443   : > { %v6016_v1 = vpop.f32.mrb[56].mxu1  ;;  %v4743_v60 = vpop.f32.mrb[57].mxu0 }
 0x444   : > { %v4749_v18 = vpop.f32.mrb[57].mxu1  ;;  %v2959_v3 = vpop.f32.mrb[58].mxu0 }
 0x445   : > { %v3005_v24 = vpop.f32.mrb[58].mxu1  ;;  %v4744_v62 = vpop.f32.mrb[59].mxu0 }
 0x446   : > { %v4750_v30 = vpop.f32.mrb[59].mxu1 }
 0x44a   : > { %v6018_v54 = vpop.f32.mrb[60].mxu0 }
 0x44b   : > { %v6020_v42 = vpop.f32.mrb[60].mxu1  ;;  %v4755_v55 = vpop.f32.mrb[61].mxu0 }
 0x44c   : > { %v4761_v17 = vpop.f32.mrb[61].mxu1  ;;  %v3051_v15 = vpop.f32.mrb[62].mxu0 }
 0x44d   : > { %v3097_v14 = vpop.f32.mrb[62].mxu1  ;;  %v4756_v9 = vpop.f32.mrb[63].mxu0 }
 0x44e   : > { %v4762_v43 = vpop.f32.mrb[63].mxu1 }
 0x452   : > { %v6022_v25 = vpop.f32.mrb[64].mxu0 }
 0x453   : > { %v6024_v58 = vpop.f32.mrb[64].mxu1  ;;  %v4767_v11 = vpop.f32.mrb[65].mxu0 }
 0x454   : > { %v4773_v28 = vpop.f32.mrb[65].mxu1  ;;  %v3143_v49 = vpop.f32.mrb[66].mxu0 }
 0x455   : > { %v3189_v21 = vpop.f32.mrb[66].mxu1  ;;  %v4768_v22 = vpop.f32.mrb[67].mxu0 }
 0x456   : > { %v4774_v63 = vpop.f32.mrb[67].mxu1 }
 0x45a   : > { %v6026_v27 = vpop.f32.mrb[68].mxu0 }
 0x45b   : > { %v6028_v47 = vpop.f32.mrb[68].mxu1  ;;  %v4779_v51 = vpop.f32.mrb[69].mxu0 }
 0x45c   : > { %v4785_v37 = vpop.f32.mrb[69].mxu1  ;;  %v3235_v31 = vpop.f32.mrb[70].mxu0 }
 0x45d   : > { %v3281_v53 = vpop.f32.mrb[70].mxu1  ;;  %v4780_v50 = vpop.f32.mrb[71].mxu0 }
 0x45e   : > { %v4786_v10 = vpop.f32.mrb[71].mxu1 }
 0x462   : > { %v6030_v20 = vpop.f32.mrb[72].mxu0 }
 0x463   : > { %v6032_v36 = vpop.f32.mrb[72].mxu1  ;;  %v4791_v61 = vpop.f32.mrb[73].mxu0 }
 0x464   : > { %v4797_v6 = vpop.f32.mrb[73].mxu1  ;;  %v3327_v12 = vpop.f32.mrb[74].mxu0 }
 0x465   : > { %v3373_v38 = vpop.f32.mrb[74].mxu1  ;;  %v4792_v5 = vpop.f32.mrb[75].mxu0 }
 0x466   : > { %v4798_v7 = vpop.f32.mrb[75].mxu1  ;;  %v2598_v61 = vpop.xlane.xlu1 %2597 }
 0x467   : > { %v2595_v6 = vpop.xlane.xlu0 %2594 }
 0x46a   : > { %v6034_v34 = vpop.f32.mrb[76].mxu0  ;;  %v2604_v12 = vpop.xlane.xlu1 %2603 }
 0x46b   : > { %v6036_v33 = vpop.f32.mrb[76].mxu1  ;;  %v4803_v41 = vpop.f32.mrb[77].mxu0 }
 0x46c   : > { %v4809_v44 = vpop.f32.mrb[77].mxu1  ;;  %v3419_v46 = vpop.f32.mrb[78].mxu0  ;;  %v2676_v41 = vrot.slane %v2598_v61, %v5449_v59 }
 0x46d   : > { %v3465_v57 = vpop.f32.mrb[78].mxu1  ;;  %v4804_v26 = vpop.f32.mrb[79].mxu0  ;;  %v2672_v44 = vrot.slane %v2595_v6, %v5415_v52  ;;  %v6276_v6 = vld [vmem:[#allocation5_spill] sm:$0xff] }
 0x46e   : > { %v4810_v8 = vpop.f32.mrb[79].mxu1  ;;  %v2601_v38 = vpop.xlane.xlu0 %2600  ;;  %v2685_v26 = vrot.slane %v2604_v12, %v5449_v59 }
 0x46f   : > { %v2610_v5 = vpop.xlane.xlu1 %2609  ;;  %v2681_v8 = vrot.slane %v2601_v38, %v5415_v52  ;;  %v6277_v38 = vld [vmem:[#allocation4_spill] sm:$0xff] }
 0x472   : > { %v6038_v23 = vpop.f32.mrb[80].mxu0  ;;  %v2607_v7 = vpop.xlane.xlu0 %2606 }
 0x473   : > { %v6040_v13 = vpop.f32.mrb[80].mxu1  ;;  %v4815_v16 = vpop.f32.mrb[81].mxu0 }
 0x474   : > { %v4821_v56 = vpop.f32.mrb[81].mxu1  ;;  %v6042_v2 = vpop.f32.mrb[82].mxu0  ;;  %v2694_v16 = vrot.slane %v2610_v5, %v5449_v59 }
 0x475   : > { %v6044_v0 = vpop.f32.mrb[82].mxu1  ;;  %v4816_v39 = vpop.f32.mrb[83].mxu0  ;;  %v2690_v56 = vrot.slane %v2607_v7, %v5415_v52  ;;  %v6278_v7 = vld [vmem:[#allocation7_spill] sm:$0xff] }
 0x476   : > { %v4822_v19 = vpop.f32.mrb[83].mxu1  ;;  %v2616_v46 = vpop.xlane.xlu1 %2615 }
 0x477   : > { %v2613_v57 = vpop.xlane.xlu0 %2612  ;;  %v2703_v39 = vrot.slane %v2616_v46, %v5449_v59 }
 0x478   : > { %v2699_v19 = vrot.slane %v2613_v57, %v5415_v52 }
 0x47a   : > { %v6046_v18 = vpop.f32.mrb[84].mxu0 }
 0x47b   : > { %v6048_v60 = vpop.f32.mrb[84].mxu1  ;;  %v4827_v24 = vpop.f32.mrb[85].mxu0 }
 0x47c   : > { %v4833_v3 = vpop.f32.mrb[85].mxu1  ;;  %v6050_v30 = vpop.f32.mrb[86].mxu0  ;;  %v2677_v24 = vsel %vm1991_vm13, %v2676_v41, %v2672_v44  ;;  %v6279_v44 = vld [vmem:[#allocation6_spill] sm:$0xff] }
 0x47d   : > { %v6052_v62 = vpop.f32.mrb[86].mxu1  ;;  %v4828_v55 = vpop.f32.mrb[87].mxu0  ;;  %v2686_v3 = vsel %vm1991_vm13, %v2685_v26, %v2681_v8 }
 0x47e   : > { %v4834_v17 = vpop.f32.mrb[87].mxu1  ;;  %v2695_v55 = vsel %vm1991_vm13, %v2694_v16, %v2690_v56 }
 0x47f   : > { %v2708_v17 = vsel %vm1917_vm9, %v2677_v24, %v6012_v35  ;;  %v6274_v35 = vld [vmem:[#allocation2_spill] sm:$0xff] }
 0x482   : > { %v6054_v15 = vpop.f32.mrb[88].mxu0 }
 0x483   : > { %v6056_v14 = vpop.f32.mrb[88].mxu1  ;;  %v4839_v9 = vpop.f32.mrb[89].mxu0 }
 0x484   : > { %v4845_v43 = vpop.f32.mrb[89].mxu1  ;;  %v6058_v11 = vpop.f32.mrb[90].mxu0  ;;  %v2704_v9 = vsel %vm1991_vm13, %v2703_v39, %v2699_v19 }
 0x485   : > { %v6060_v28 = vpop.f32.mrb[90].mxu1  ;;  %v4840_v49 = vpop.f32.mrb[91].mxu0  ;;  %v2709_v43 = vsel %vm1919_vm10, %v2686_v3, %v2708_v17 }
 0x486   : > { %v4846_v21 = vpop.f32.mrb[91].mxu1  ;;  %v2710_v49 = vsel %vm1921_vm11, %v2695_v55, %v2709_v43 }
 0x487   : > { %v2711_v21 = vsel %vm1923_vm12, %v2704_v9, %v2710_v49 }
 0x48a   : > { %v6062_v22 = vpop.f32.mrb[92].mxu0 }
 0x48b   : > { %v6064_v63 = vpop.f32.mrb[92].mxu1  ;;  %v4851_v51 = vpop.f32.mrb[93].mxu0 }
 0x48c   : > { %v4857_v37 = vpop.f32.mrb[93].mxu1  ;;  %v6066_v31 = vpop.f32.mrb[94].mxu0 }
 0x48d   : > { %v6068_v53 = vpop.f32.mrb[94].mxu1  ;;  %v4852_v50 = vpop.f32.mrb[95].mxu0 }
 0x48e   : > { %v4858_v10 = vpop.f32.mrb[95].mxu1 }
 0x48f   : > { %v6275_v10 = vld [vmem:[#allocation3_spill] sm:$0xff] }
 0x4b8   : > { %v2553_v59 = vpop.trf.xlu0 }
 0x4b9   : > { %v2713_v51 = vadd.f32 %v2711_v21, %v2553_v59 }
 0x4bb   : > { %4965 = vrcp.f32 %v2713_v51 }
 0x4c5   : > { %v6087_v52 = vpop.eup %4965 }
 0x4c6   : > { %3876 = vxpose.xlu1.b32.start.end [1/1] (short) (narrow) %v6087_v52, 16  ;;  %v4055_v37 = vrot.slane %v6087_v52, %v5489_v45  ;;  %v4066_v50 = vrot.slane %v6087_v52, %v6274_v35  ;;  %v4077_v61 = vrot.slane %v6087_v52, %v6275_v10  ;;  %v4088_v12 = vrot.slane %v6087_v52, %v6276_v6 }
 0x4c7   : > { %v4099_v5 = vrot.slane %v6087_v52, %v6277_v38  ;;  %v4110_v41 = vrot.slane %v6087_v52, %v6278_v7  ;;  %v4121_v46 = vrot.slane %v6087_v52, %v6279_v44 }
 0x4c8   : > { %4057 = vbcast.lane.b32.xlu0 %v4055_v37, 256 }
 0x4cc   : > { %4068 = vbcast.lane.b32.xlu0 %v4066_v50, 256 }
 0x4d0   : > { %4079 = vbcast.lane.b32.xlu0 %v4077_v61, 256 }
 0x4d4   : > { %4090 = vbcast.lane.b32.xlu0 %v4088_v12, 256 }
 0x4d8   : > { %4101 = vbcast.lane.b32.xlu0 %v4099_v5, 256 }
 0x4dc   : > { %4112 = vbcast.lane.b32.xlu0 %v4110_v41, 256 }
 0x4e0   : > { %4123 = vbcast.lane.b32.xlu0 %v4121_v46, 256 }
 0x4e8   : > { %4061 = vbcast.lane.b32.xlu1 %v4055_v37, 264 }
 0x4ec   : > { %4072 = vbcast.lane.b32.xlu1 %v4066_v50, 264 }
 0x4f0   : > { %4083 = vbcast.lane.b32.xlu1 %v4077_v61, 264  ;;  %v6280_v61 = vld [vmem:[#allocation8_spill] sm:$0xff] }
 0x4f4   : > { %4094 = vbcast.lane.b32.xlu1 %v4088_v12, 264 }
 0x4f8   : > { %4105 = vbcast.lane.b32.xlu1 %v4099_v5, 264 }
 0x4fc   : > { %4116 = vbcast.lane.b32.xlu1 %v4110_v41, 264 }
 0x500   : > { %4127 = vbcast.lane.b32.xlu1 %v4121_v46, 264 }
 0x53a   : > { %v4058_v57 = vpop.permute.xlu0 %4057 }
 0x53b   : > { %v4140_v26 = vmul.f32 %v4058_v57, %v6038_v23 }
 0x53d   : > { %4156 = vst.msk [vmem:[%s6110_s10] sm:$0xff] %vm1782_vm5, %v4140_v26 }
 0x53e   : > { %v4069_v8 = vpop.permute.xlu0 %4068 }
 0x53f   : > { %v4142_v16 = vmul.f32 %v4069_v8, %v6040_v13  ;;  %v4132_v8 = vrot.slane %v6087_v52, %v6280_v61 }
 0x541   : > { %4158 = vst.msk [vmem:[%s6110_s10 + $0x10] sm:$0xff] %vm1782_vm5, %v4142_v16 }
 0x542   : > { %v4080_v56 = vpop.permute.xlu0 %4079 }
 0x543   : > { %v4144_v39 = vmul.f32 %v4080_v56, %v6046_v18 }
 0x545   : > { %4160 = vst.msk [vmem:[%s6110_s10 + $0x20] sm:$0xff] %vm1782_vm5, %v4144_v39 }
 0x546   : > { %v3892_v19 = vpop.trf.xlu1  ;;  %v4091_v24 = vpop.permute.xlu0 %4090 }
 0x547   : > { %v4146_v3 = vmul.f32 %v4091_v24, %v6048_v60  ;;  %v3918_v55 = vrot.slane %v3892_v19, %v6274_v35  ;;  %v3911_v23 = vrot.slane %v3892_v19, %v5489_v45  ;;  %v3925_v18 = vrot.slane %v3892_v19, %v6275_v10 }
 0x548   : > { %v3939_v9 = vrot.slane %v3892_v19, %v6277_v38  ;;  %v3932_v21 = vrot.slane %v3892_v19, %v6276_v6  ;;  %v3953_v59 = vrot.slane %v3892_v19, %v6279_v44  ;;  %v3946_v50 = vrot.slane %v3892_v19, %v6278_v7 }
 0x549   : > { %4162 = vst.msk [vmem:[%s6110_s10 + $0x30] sm:$0xff] %vm1782_vm5, %v4146_v3  ;;  %3920 = vbcast.lane.b32.xlu1 %v3918_v55, 256  ;;  %3913 = vbcast.lane.b32.xlu0 %v3911_v23, 256  ;;  %v3960_v12 = vrot.slane %v3892_v19, %v6280_v61 }
 0x54a   : > { %v4102_v13 = vpop.permute.xlu0 %4101  ;;  %v3893_v43 = vpop.trf.xlu1 }
 0x54b   : > { %v4148_v17 = vmul.f32 %v4102_v13, %v6054_v15  ;;  %v3967_v15 = vrot.slane %v3893_v43, %v5489_v45  ;;  %v3974_v5 = vrot.slane %v3893_v43, %v6274_v35  ;;  %v3995_v45 = vrot.slane %v3893_v43, %v6277_v38 }
 0x54c   : > { %v4009_v26 = vrot.slane %v3893_v43, %v6279_v44  ;;  %v4002_v38 = vrot.slane %v3893_v43, %v6278_v7  ;;  %v4016_v44 = vrot.slane %v3893_v43, %v6280_v61 }
 0x54d   : > { %4164 = vst.msk [vmem:[%s6110_s10 + $0x40] sm:$0xff] %vm1782_vm5, %v4148_v17  ;;  %3927 = vbcast.lane.b32.xlu1 %v3925_v18, 256  ;;  %3941 = vbcast.lane.b32.xlu0 %v3939_v9, 256 }
 0x54e   : > { %v4113_v60 = vpop.permute.xlu0 %4112 }
 0x54f   : > { %v4150_v49 = vmul.f32 %v4113_v60, %v6056_v14  ;;  %v3981_v14 = vrot.slane %v3893_v43, %v6275_v10  ;;  %v3988_v10 = vrot.slane %v3893_v43, %v6276_v6 }
 0x551   : > { %4166 = vst.msk [vmem:[%s6110_s10 + $0x50] sm:$0xff] %vm1782_vm5, %v4150_v49  ;;  %3934 = vbcast.lane.b32.xlu1 %v3932_v21, 256  ;;  %3955 = vbcast.lane.b32.xlu0 %v3953_v59, 256 }
 0x552   : > { %v4124_v51 = vpop.permute.xlu0 %4123 }
 0x553   : > { %v4152_v37 = vmul.f32 %v4124_v51, %v6062_v22 }
 0x555   : > { %4168 = vst.msk [vmem:[%s6110_s10 + $0x60] sm:$0xff] %vm1782_vm5, %v4152_v37  ;;  %3948 = vbcast.lane.b32.xlu1 %v3946_v50, 256  ;;  %3969 = vbcast.lane.b32.xlu0 %v3967_v15, 256 }
 0x559   : > { %3962 = vbcast.lane.b32.xlu1 %v3960_v12, 256  ;;  %3983 = vbcast.lane.b32.xlu0 %v3981_v14, 256 }
 0x55a   : > { %v4062_v41 = vpop.permute.xlu1 %4061 }
 0x55b   : > { %v4141_v22 = vmul.f32 %v4062_v41, %v6042_v2 }
 0x55d   : > { %4157 = vst.msk [vmem:[%s6110_s10 + $0x8] sm:$0xff] %vm1782_vm5, %v4141_v22  ;;  %3976 = vbcast.lane.b32.xlu1 %v3974_v5, 256  ;;  %3997 = vbcast.lane.b32.xlu0 %v3995_v45, 256 }
 0x55e   : > { %v4073_v46 = vpop.permute.xlu1 %4072 }
 0x55f   : > { %v4143_v57 = vmul.f32 %v4073_v46, %v6044_v0 }
 0x561   : > { %4159 = vst.msk [vmem:[%s6110_s10 + $0x18] sm:$0xff] %vm1782_vm5, %v4143_v57  ;;  %3990 = vbcast.lane.b32.xlu1 %v3988_v10, 256  ;;  %4011 = vbcast.lane.b32.xlu0 %v4009_v26, 256 }
 0x562   : > { %v4084_v35 = vpop.permute.xlu1 %4083 }
 0x563   : > { %v4145_v2 = vmul.f32 %v4084_v35, %v6050_v30 }
 0x565   : > { %4161 = vst.msk [vmem:[%s6110_s10 + $0x28] sm:$0xff] %vm1782_vm5, %v4145_v2  ;;  %4004 = vbcast.lane.b32.xlu1 %v4002_v38, 256  ;;  %4134 = vbcast.lane.b32.xlu0 %v4132_v8, 256 }
 0x566   : > { %v4095_v0 = vpop.permute.xlu1 %4094 }
 0x567   : > { %v4147_v6 = vmul.f32 %v4095_v0, %v6052_v62 }
 0x569   : > { %4163 = vst.msk [vmem:[%s6110_s10 + $0x38] sm:$0xff] %vm1782_vm5, %v4147_v6  ;;  %4018 = vbcast.lane.b32.xlu1 %v4016_v44, 256 }
 0x56a   : > { %v4106_v30 = vpop.permute.xlu1 %4105 }
 0x56b   : > { %v4149_v7 = vmul.f32 %v4106_v30, %v6058_v11 }
 0x56d   : > { %4165 = vst.msk [vmem:[%s6110_s10 + $0x48] sm:$0xff] %vm1782_vm5, %v4149_v7  ;;  %4138 = vbcast.lane.b32.xlu1 %v4132_v8, 264 }
 0x56e   : > { %v4117_v52 = vpop.permute.xlu1 %4116 }
 0x56f   : > { %v4151_v16 = vmul.f32 %v4117_v52, %v6060_v28 }
 0x571   : > { %4167 = vst.msk [vmem:[%s6110_s10 + $0x58] sm:$0xff] %vm1782_vm5, %v4151_v16 }
 0x572   : > { %v4128_v56 = vpop.permute.xlu1 %4127 }
 0x573   : > { %v4153_v39 = vmul.f32 %v4128_v56, %v6066_v31 }
 0x575   : > { %4169 = vst.msk [vmem:[%s6110_s10 + $0x68] sm:$0xff] %vm1782_vm5, %v4153_v39 }
 0x5bb   : > { %v3921_v62 = vpop.permute.xlu1 %3920  ;;  %v3914_v11 = vpop.permute.xlu0 %3913 }
 0x5bc   : > { %v4021_v28 = vmul.f32 %v3921_v62, %v5991_v48  ;;  %v4020_v31 = vmul.f32 %v3914_v11, %v5987_v29 }
 0x5be   : > { %4037 = vst.msk [vmem:[%s6177_s13 + $0x8] sm:$0xff] %vm1782_vm5, %v4021_v28  ;;  %4036 = vst.msk [vmem:[%s6177_s13] sm:$0xff] %vm1782_vm5, %v4020_v31 }
 0x5bf   : > { %v3928_v19 = vpop.permute.xlu1 %3927  ;;  %v3942_v24 = vpop.permute.xlu0 %3941 }
 0x5c0   : > { %v4022_v3 = vmul.f32 %v3928_v19, %v6004_v4  ;;  %v4024_v55 = vmul.f32 %v3942_v24, %v6014_v40 }
 0x5c2   : > { %4038 = vst.msk [vmem:[%s6177_s13 + $0x10] sm:$0xff] %vm1782_vm5, %v4022_v3  ;;  %4040 = vst.msk [vmem:[%s6177_s13 + $0x20] sm:$0xff] %vm1782_vm5, %v4024_v55 }
 0x5c3   : > { %v3935_v23 = vpop.permute.xlu1 %3934  ;;  %v3956_v48 = vpop.permute.xlu0 %3955 }
 0x5c4   : > { %v4023_v29 = vmul.f32 %v3935_v23, %v6008_v32  ;;  %v4026_v13 = vmul.f32 %v3956_v48, %v6018_v54 }
 0x5c6   : > { %4039 = vst.msk [vmem:[%s6177_s13 + $0x18] sm:$0xff] %vm1782_vm5, %v4023_v29  ;;  %4042 = vst.msk [vmem:[%s6177_s13 + $0x30] sm:$0xff] %vm1782_vm5, %v4026_v13 }
 0x5c7   : > { %v3949_v17 = vpop.permute.xlu1 %3948  ;;  %v3970_v4 = vpop.permute.xlu0 %3969 }
 0x5c8   : > { %v4025_v40 = vmul.f32 %v3949_v17, %v6016_v1  ;;  %v4028_v18 = vmul.f32 %v3970_v4, %v6022_v25 }
 0x5ca   : > { %4041 = vst.msk [vmem:[%s6177_s13 + $0x28] sm:$0xff] %vm1782_vm5, %v4025_v40  ;;  %4044 = vst.msk [vmem:[%s6177_s13 + $0x40] sm:$0xff] %vm1782_vm5, %v4028_v18 }
 0x5cb   : > { %v3963_v9 = vpop.permute.xlu1 %3962  ;;  %v3984_v32 = vpop.permute.xlu0 %3983 }
 0x5cc   : > { %v4027_v54 = vmul.f32 %v3963_v9, %v6020_v42  ;;  %v4030_v60 = vmul.f32 %v3984_v32, %v6026_v27 }
 0x5ce   : > { %4043 = vst.msk [vmem:[%s6177_s13 + $0x38] sm:$0xff] %vm1782_vm5, %v4027_v54  ;;  %4046 = vst.msk [vmem:[%s6177_s13 + $0x50] sm:$0xff] %vm1782_vm5, %v4030_v60 }
 0x5cf   : > { %v3977_v43 = vpop.permute.xlu1 %3976  ;;  %v3998_v1 = vpop.permute.xlu0 %3997 }
 0x5d0   : > { %v4029_v25 = vmul.f32 %v3977_v43, %v6024_v58  ;;  %v4032_v49 = vmul.f32 %v3998_v1, %v6030_v20 }
 0x5d2   : > { %4045 = vst.msk [vmem:[%s6177_s13 + $0x48] sm:$0xff] %vm1782_vm5, %v4029_v25  ;;  %4048 = vst.msk [vmem:[%s6177_s13 + $0x60] sm:$0xff] %vm1782_vm5, %v4032_v49 }
 0x5d3   : > { %v3991_v42 = vpop.permute.xlu1 %3990  ;;  %v4012_v21 = vpop.permute.xlu0 %4011 }
 0x5d4   : > { %v4031_v27 = vmul.f32 %v3991_v42, %v6028_v47  ;;  %v4034_v59 = vmul.f32 %v4012_v21, %v6034_v34 }
 0x5d6   : > { %4047 = vst.msk [vmem:[%s6177_s13 + $0x58] sm:$0xff] %vm1782_vm5, %v4031_v27  ;;  %4050 = vst.msk [vmem:[%s6177_s13 + $0x70] sm:$0xff] %vm1782_vm5, %v4034_v59 }
 0x5d7   : > { %v4005_v15 = vpop.permute.xlu1 %4004  ;;  %v4135_v58 = vpop.permute.xlu0 %4134 }
 0x5d8   : > { %v4033_v20 = vmul.f32 %v4005_v15, %v6032_v36  ;;  %v4154_v51 = vmul.f32 %v4135_v58, %v6064_v63 }
 0x5da   : > { %4049 = vst.msk [vmem:[%s6177_s13 + $0x68] sm:$0xff] %vm1782_vm5, %v4033_v20  ;;  %4170 = vst.msk [vmem:[%s6110_s10 + $0x70] sm:$0xff] %vm1782_vm5, %v4154_v51 }
 0x5db   : > { %v4019_v37 = vpop.permute.xlu1 %4018 }
 0x5dc   : > { %v4035_v50 = vmul.f32 %v4019_v37, %v6036_v33 }
 0x5de   : > { %4051 = vst.msk [vmem:[%s6177_s13 + $0x78] sm:$0xff] %vm1782_vm5, %v4035_v50 }
 0x5df   : > { %v4139_v47 = vpop.permute.xlu1 %4138 }
 0x5e0   : > { %v4155_v34 = vmul.f32 %v4139_v47, %v6068_v53 }
 0x5e2   : > { %4171 = vst.msk [vmem:[%s6110_s10 + $0x78] sm:$0xff] %vm1782_vm5, %v4155_v34 }
 0x5e3 PF: > { %s18_s26 = sadd.s32 1, %s4989_s26   ;;  %s6281_s24 = smov %s4985_s25 }
 0x5e4   : > { %p15_p5 = scmp.ge.s32.totalorder %s18_s26, 4   ;;  %s6282_s25 = smov %s6284_s27 }
 0x5e6   :  { %17 = sbr.rel (!%p15_p5) target bundleno = 2 (0x2), region = 101 }

</bundles_post_ra>
